<compile_context>
chip_gen: v7x
topology: tpu7x:2x2x1
jax: 0.10.0
libtpu: 0.0.40
codegen_flags: <defaults>
</compile_context>

<pallas_src>
import functools

import jax
import jax.numpy as jnp
from jax.experimental import pallas as pl
from jax.experimental.pallas import tpu as pltpu

LANE = 128


def _round_up(x, m):
    return (x + m - 1) // m * m


def _vmem_limit_bytes():
    """Generation-aware VMEM limit (v7x: 64 MiB/core, v5e/v6e: 128 MiB)."""
    cap = 0
    try:
        cap = int(getattr(pltpu.get_tpu_info(), "vmem_capacity_bytes", 0))
    except Exception:
        cap = 0
    if cap <= 0:
        cap = 64 * 1024 * 1024            # conservative default (v7x per-core)
    return min((cap * 3) // 4, 100 * 1024 * 1024)


def _pick_row_tile(hpool, width, cin, cp, cpf, pack9, out_itemsize, budget):
    """Largest divisor of hpool whose per-step working set fits `budget` bytes."""
    best = 1
    for tr in range(1, hpool + 1):
        if hpool % tr:
            continue
        rows = 2 * tr
        est = 2 * rows * width * cin * 2                    # double-buffered input
        est += 3 * (rows + 2) * width * cin * 2             # left/center/right copies
        est += (rows + 2) * width * 3 * cin * 2             # dw-packed patch
        if pack9:
            est += rows * width * 9 * cin * 2               # fully packed im2col patch
        est += rows * width * cp * 4                        # f32 conv accumulator
        est += rows * width * cp * 2                        # pooling temporaries (slack)
        est += 2 * tr * (width // 2) * cpf * out_itemsize   # double-buffered output
        if est <= budget and rows * width <= 8192:
            best = tr
    return best


# ----------------------------------------------------------------------------
# Kernel: 3x3 conv (K-packed matmuls) + folded BN/bias + ReLU + 2x2 max-pool,
# optionally fused with the final 1x1 conv + bias.
# ----------------------------------------------------------------------------
def _fused_conv_kernel(ti_ref, bi_ref, xm_ref, xt_ref, xb_ref, w_ref, s_ref,
                       *rest, tr, width, cin, pack9, fuse_final):
    """Refs:
    ti_ref/bi_ref : scalar-prefetched halo row indices (used by index maps only)
    xm_ref : (1, 2*tr, W, cin)   main input rows of this block
    xt_ref : (1, 1,    W, cin)   row above the block (clamped at the top edge)
    xb_ref : (1, 1,    W, cin)   row below the block (clamped at the bottom edge)
    w_ref  : (1, 9*cin, cp) if pack9 else (3, 3*cin, cp)   folded bf16 weights
    s_ref  : (1, cp)             folded conv-bias + BN shift (f32)
    [wf_ref: (cp, cpf), sf_ref: (1, cpf)]  final 1x1 weights/bias (fuse_final)
    o_ref  : (1, tr, W//2, cp or cpf)
    """
    del ti_ref, bi_ref
    if fuse_final:
        wf_ref, sf_ref, o_ref = rest
    else:
        (o_ref,) = rest

    rows = 2 * tr
    wpool = width // 2
    j = pl.program_id(1)
    j_last = pl.num_programs(1) - 1

    # ---- assemble the zero-padded window and its two column-shifted copies ---
    xm = xm_ref[0]                                           # (rows, W, cin)
    zrow = jnp.zeros((1, width, cin), xm.dtype)
    top = jnp.where(j == 0, zrow, xt_ref[0])                 # SAME pad (top edge)
    bot = jnp.where(j == j_last, zrow, xb_ref[0])            # SAME pad (bottom edge)
    ctr = jnp.concatenate([top, xm, bot], axis=0)            # (rows+2, W, cin), dw=1

    zcol = jnp.zeros((rows + 2, 1, cin), xm.dtype)
    lft = jnp.concatenate([zcol, ctr[:, :width - 1, :]], axis=1)   # dw=0
    rgt = jnp.concatenate([ctr[:, 1:, :], zcol], axis=1)           # dw=2
    dwp = jnp.concatenate([lft, ctr, rgt], axis=-1)          # (rows+2, W, 3*cin)

    # ---- conv as K-packed MXU matmuls (f32 accumulation) ----
    if pack9:
        patch = jnp.concatenate(
            [dwp[0:rows], dwp[1:rows + 1], dwp[2:rows + 2]], axis=-1)
        acc = jnp.dot(patch.reshape(rows * width, 9 * cin), w_ref[0],
                      preferred_element_type=jnp.float32)
    else:
        acc = jnp.dot(dwp[0:rows].reshape(rows * width, 3 * cin), w_ref[0],
                      preferred_element_type=jnp.float32)
        acc = acc + jnp.dot(dwp[1:rows + 1].reshape(rows * width, 3 * cin),
                            w_ref[1], preferred_element_type=jnp.float32)
        acc = acc + jnp.dot(dwp[2:rows + 2].reshape(rows * width, 3 * cin),
                            w_ref[2], preferred_element_type=jnp.float32)

    cp = acc.shape[-1]
    acc = jnp.maximum(acc + s_ref[...], 0.0)                 # folded BN/bias + ReLU

    # ---- fused MaxPool2d(2, 2): pairwise maxima over columns then rows ----
    a2 = acc.reshape(rows * wpool, 2, cp)
    col = jnp.maximum(a2[:, 0, :], a2[:, 1, :])              # (rows*wpool, cp)
    c2 = col.reshape(tr, 2, wpool, cp)
    pooled = jnp.maximum(c2[:, 0], c2[:, 1])                 # (tr, wpool, cp)

    if fuse_final:
        flat = pooled.reshape(tr * wpool, cp).astype(jnp.bfloat16)
        out = jnp.dot(flat, wf_ref[...], preferred_element_type=jnp.float32)
        out = out + sf_ref[...]
        o_ref[0] = out.reshape(tr, wpool, -1).astype(o_ref.dtype)
    else:
        o_ref[0] = pooled.astype(o_ref.dtype)


# ----------------------------------------------------------------------------
# Wrapper
# ----------------------------------------------------------------------------
def conv_bn_relu_pool(x, w, shift, *, pack9, wf=None, sf=None,
                      out_dtype=jnp.bfloat16):
    """x: (N, H, W, cin) bf16 -> (N, H//2, W//2, C_out).

    Fused 3x3 conv + folded BN/bias + ReLU + 2x2 max-pool, optionally fused
    with the final 1x1 conv when wf/sf are given.  SAME padding is in-kernel.
    """
    n, h, width, cin = x.shape
    assert h % 2 == 0 and width % 2 == 0, (h, width)
    hpool, wpool = h // 2, width // 2
    cp = w.shape[-1]
    fuse_final = wf is not None
    cpf = wf.shape[-1] if fuse_final else cp

    vmem_limit = _vmem_limit_bytes()
    weight_bytes = w.size * 2 + shift.size * 4
    if fuse_final:
        weight_bytes += wf.size * 2 + sf.size * 4
    budget = max((vmem_limit * 2) // 5 - 2 * weight_bytes, 1)
    tr = _pick_row_tile(hpool, width, cin, cp, cpf, pack9,
                        jnp.dtype(out_dtype).itemsize, budget)
    nj = hpool // tr

    # Scalar-prefetched halo row indices (clamped at the image boundary; the
    # kernel zeroes the boundary rows, clamping only avoids an OOB DMA).
    rng = jnp.arange(nj, dtype=jnp.int32)
    top_idx = jnp.maximum(2 * tr * rng - 1, 0)
    bot_idx = jnp.minimum(2 * tr * (rng + 1), h - 1)

    kernel = functools.partial(_fused_conv_kernel, tr=tr, width=width, cin=cin,
                               pack9=pack9, fuse_final=fuse_final)

    in_specs = [
        pl.BlockSpec((1, 2 * tr, width, cin),
                     lambda b, j, ti, bi: (b, j, 0, 0)),
        pl.BlockSpec((1, 1, width, cin),
                     lambda b, j, ti, bi: (b, ti[j], 0, 0)),
        pl.BlockSpec((1, 1, width, cin),
                     lambda b, j, ti, bi: (b, bi[j], 0, 0)),
        pl.BlockSpec(w.shape, lambda b, j, ti, bi: (0, 0, 0)),
        pl.BlockSpec(shift.shape, lambda b, j, ti, bi: (0, 0)),
    ]
    args = [top_idx, bot_idx, x, x, x, w, shift]
    if fuse_final:
        in_specs += [pl.BlockSpec(wf.shape, lambda b, j, ti, bi: (0, 0)),
                     pl.BlockSpec(sf.shape, lambda b, j, ti, bi: (0, 0))]
        args += [wf, sf]

    return pl.pallas_call(
        kernel,
        out_shape=jax.ShapeDtypeStruct((n, hpool, wpool, cpf), out_dtype),
        grid_spec=pltpu.PrefetchScalarGridSpec(
            num_scalar_prefetch=2,
            grid=(n, nj),
            in_specs=in_specs,
            out_specs=pl.BlockSpec((1, tr, wpool, cpf),
                                   lambda b, j, ti, bi: (b, j, 0, 0)),
        ),
        compiler_params=pltpu.CompilerParams(
            dimension_semantics=("parallel", "parallel"),
            vmem_limit_bytes=vmem_limit),
    )(*args)


# ----------------------------------------------------------------------------
# Parameter folding + forward
# ----------------------------------------------------------------------------
def _fold_conv_block(p, cin_pad, cout_pad, pack9, eps=1e-5):
    """Fold eval-mode BN + conv bias into K-packed bf16 matmul weights."""
    scale = p["gamma"] / jnp.sqrt(p["var"] + eps)
    shift = p["beta"] + (p["b"] - p["mean"]) * scale
    w = p["w"] * scale                                       # (3, 3, cin, cout)
    kh, kw, cin, cout = w.shape
    w = jnp.pad(w, ((0, 0), (0, 0), (0, cin_pad - cin), (0, cout_pad - cout)))
    shift = jnp.pad(shift, (0, cout_pad - cout))
    if pack9:
        w = w.reshape(1, kh * kw * cin_pad, cout_pad)        # one K = 9*cin matmul
    else:
        w = w.reshape(kh, kw * cin_pad, cout_pad)            # three K = 3*cin matmuls
    return (w.astype(jnp.bfloat16),
            shift.reshape(1, cout_pad).astype(jnp.float32))


def classifier_forward(x_nchw, params):
    # NCHW (PyTorch) -> NHWC (channels on the lane dim); bf16 MXU operands.
    x = jnp.transpose(x_nchw, (0, 2, 3, 1)).astype(jnp.bfloat16)
    cin0 = x.shape[-1]

    # Stage 1: conv3x3 + BN + ReLU + pool.
    p1 = params["conv_1"]
    cp1 = _round_up(p1["w"].shape[-1], LANE)
    pack9_1 = (3 * cin0) < 256           # fill the 256-deep MXU on v6e/v7x
    w1, s1 = _fold_conv_block(p1, cin_pad=cin0, cout_pad=cp1, pack9=pack9_1)
    x = conv_bn_relu_pool(x, w1, s1, pack9=pack9_1)          # (N, H/2, W/2, cp1)

    # Stage 2: conv3x3 + BN + ReLU + pool, fused with the final 1x1 conv+bias.
    p2 = params["conv_2"]
    cp2 = _round_up(p2["w"].shape[-1], LANE)
    pack9_2 = (3 * cp1) < 256
    w2, s2 = _fold_conv_block(p2, cin_pad=cp1, cout_pad=cp2, pack9=pack9_2)

    pf = params["final"]
    cout_f = pf["w"].shape[-1]
    cpf = _round_up(cout_f, LANE)
    wf = jnp.pad(pf["w"], ((0, cp2 - pf["w"].shape[0]), (0, cpf - cout_f)))
    sf = jnp.pad(pf["b"], (0, cpf - cout_f)).reshape(1, cpf).astype(jnp.float32)

    out = conv_bn_relu_pool(x, w2, s2, pack9=pack9_2,
                            wf=wf.astype(jnp.bfloat16), sf=sf,
                            out_dtype=jnp.float32)           # (N, H/4, W/4, cpf)
    out = out[..., :cout_f]
    return jnp.transpose(out, (0, 3, 1, 2))                  # back to NCHW


# ----------------------------------------------------------------------------
# Params + pure-JAX reference (for a sanity check)
# ----------------------------------------------------------------------------
def init_params(key, inp_dim, ndf):
    ks = jax.random.split(key, 6)

    def conv_block(kw, kb, cin, cout):
        return dict(
            w=jax.random.normal(kw, (3, 3, cin, cout), jnp.float32) * 0.05,
            b=jax.random.normal(kb, (cout,), jnp.float32) * 0.01,
            gamma=jnp.ones((cout,), jnp.float32),
            beta=jnp.zeros((cout,), jnp.float32),
            mean=jnp.zeros((cout,), jnp.float32),
            var=jnp.ones((cout,), jnp.float32),
        )

    return {
        "conv_1": conv_block(ks[0], ks[1], inp_dim, ndf),
        "conv_2": conv_block(ks[2], ks[3], ndf, ndf * 2),
        "final": {
            "w": jax.random.normal(ks[4], (ndf * 2, ndf * 2), jnp.float32) * 0.05,
            "b": jax.random.normal(ks[5], (ndf * 2,), jnp.float32) * 0.01,
        },
    }


def _reference_forward(x_nchw, params, eps=1e-5):
    x = jnp.transpose(x_nchw, (0, 2, 3, 1))

    def conv_block(y, p):
        y = jax.lax.conv_general_dilated(
            y, p["w"], window_strides=(1, 1), padding="SAME",
            dimension_numbers=("NHWC", "HWIO", "NHWC")) + p["b"]
        scale = p["gamma"] / jnp.sqrt(p["var"] + eps)
        y = (y - p["mean"]) * scale + p["beta"]
        y = jnp.maximum(y, 0.0)
        n, h, w, c = y.shape
        return y.reshape(n, h // 2, 2, w // 2, 2, c).max(axis=(2, 4))

    x = conv_block(x, params["conv_1"])
    x = conv_block(x, params["conv_2"])
    x = jnp.einsum("nhwc,cd->nhwd", x, params["final"]["w"]) + params["final"]["b"]
    return jnp.transpose(x, (0, 3, 1, 2))


# ----------------------------------------------------------------------------
if __name__ == "__main__":
    # Small shapes consistent with the module (scaled down from 256/128).
    batch, inp_dim, ndf, spatial = 2, 8, 16, 16
    key = jax.random.PRNGKey(0)
    k_x, k_p = jax.random.split(key)

    x = jax.random.normal(k_x, (batch, inp_dim, spatial, spatial), jnp.float32)
    params = init_params(k_p, inp_dim, ndf)

    out = jax.block_until_ready(jax.jit(classifier_forward)(x, params))

    expected = (batch, ndf * 2, spatial // 4, spatial // 4)
    assert out.shape == expected, (out.shape, expected)
    assert bool(jnp.all(jnp.isfinite(out)))

    # bf16 MXU operands -> small relative error vs the f32 reference.
    ref = _reference_forward(x, params)
    rel_err = float(jnp.max(jnp.abs(out.astype(jnp.float32) - ref))
                    / (jnp.max(jnp.abs(ref)) + 1e-6))
    assert rel_err < 0.15, rel_err

    print("KERNEL_OK")
</pallas_src>

<mosaic_0001>
module attributes {stable_mosaic.version = 11 : i64} {
  func.func @_fused_conv_kernel(%arg0: i32, %arg1: i32, %arg2: memref<1xi32, #tpu.memory_space<smem>>, %arg3: memref<1xi32, #tpu.memory_space<smem>>, %arg4: memref<1x16x16x8xbf16, #tpu.memory_space<vmem>>, %arg5: memref<1x1x16x8xbf16, #tpu.memory_space<vmem>>, %arg6: memref<1x1x16x8xbf16, #tpu.memory_space<vmem>>, %arg7: memref<1x72x128xbf16, #tpu.memory_space<vmem>>, %arg8: memref<1x128xf32, #tpu.memory_space<vmem>>, %arg9: memref<1x8x8x128xbf16, #tpu.memory_space<vmem>>) attributes {dimension_semantics = [#tpu.dimension_semantics<parallel>, #tpu.dimension_semantics<parallel>], iteration_bounds = array<i64: 2, 1>, scalar_prefetch = 2 : i64, scratch_operands = 0 : i64, tpu.core_type = #tpu.core_type<tc>, window_params = [{transform_indices = @transform_0, window_bounds = array<i64: 1, 16, 16, 8>}, {transform_indices = @transform_1, window_bounds = array<i64: 1, 1, 16, 8>}, {transform_indices = @transform_2, window_bounds = array<i64: 1, 1, 16, 8>}, {pipeline_mode = #tpu.pipeline_mode<synchronous>, transform_indices = @transform_3, window_bounds = array<i64: 1, 72, 128>}, {pipeline_mode = #tpu.pipeline_mode<synchronous>, transform_indices = @transform_4, window_bounds = array<i64: 1, 128>}, {transform_indices = @transform_5, window_bounds = array<i64: 1, 8, 8, 128>}]} {
    %c0 = arith.constant 0 : index
    %c0_0 = arith.constant 0 : index
    %c0_1 = arith.constant 0 : index
    %c0_2 = arith.constant 0 : index
    %0 = vector.load %arg4[%c0, %c0_0, %c0_1, %c0_2] : memref<1x16x16x8xbf16, #tpu.memory_space<vmem>>, vector<1x16x16x8xbf16>
    %1 = vector.shape_cast %0 : vector<1x16x16x8xbf16> to vector<16x16x8xbf16>
    %cst = arith.constant 0.000000e+00 : bf16
    %2 = vector.broadcast %cst : bf16 to vector<1x16x8xbf16>
    %c0_i32 = arith.constant 0 : i32
    %3 = arith.cmpi eq, %arg1, %c0_i32 : i32
    %c0_3 = arith.constant 0 : index
    %c0_4 = arith.constant 0 : index
    %c0_5 = arith.constant 0 : index
    %c0_6 = arith.constant 0 : index
    %4 = vector.load %arg5[%c0_3, %c0_4, %c0_5, %c0_6] : memref<1x1x16x8xbf16, #tpu.memory_space<vmem>>, vector<1x1x16x8xbf16>
    %5 = vector.shape_cast %4 : vector<1x1x16x8xbf16> to vector<1x16x8xbf16>
    %6 = arith.select %3, %2, %5 : vector<1x16x8xbf16>
    %c0_i32_7 = arith.constant 0 : i32
    %7 = arith.cmpi eq, %arg1, %c0_i32_7 : i32
    %c0_8 = arith.constant 0 : index
    %c0_9 = arith.constant 0 : index
    %c0_10 = arith.constant 0 : index
    %c0_11 = arith.constant 0 : index
    %8 = vector.load %arg6[%c0_8, %c0_9, %c0_10, %c0_11] : memref<1x1x16x8xbf16, #tpu.memory_space<vmem>>, vector<1x1x16x8xbf16>
    %9 = vector.shape_cast %8 : vector<1x1x16x8xbf16> to vector<1x16x8xbf16>
    %10 = arith.select %7, %2, %9 : vector<1x16x8xbf16>
    %11 = tpu.concatenate %6, %1, %10 in 0 : vector<1x16x8xbf16>, vector<16x16x8xbf16>, vector<1x16x8xbf16> -> vector<18x16x8xbf16>
    %cst_12 = arith.constant 0.000000e+00 : bf16
    %12 = vector.broadcast %cst_12 : bf16 to vector<18x1x8xbf16>
    %13 = vector.extract_strided_slice %11 {offsets = [0, 0, 0], sizes = [18, 15, 8], strides = [1, 1, 1]} : vector<18x16x8xbf16> to vector<18x15x8xbf16>
    %14 = tpu.concatenate %12, %13 in 1 : vector<18x1x8xbf16>, vector<18x15x8xbf16> -> vector<18x16x8xbf16>
    %15 = vector.extract_strided_slice %11 {offsets = [0, 1, 0], sizes = [18, 15, 8], strides = [1, 1, 1]} : vector<18x16x8xbf16> to vector<18x15x8xbf16>
    %16 = tpu.concatenate %15, %12 in 1 : vector<18x15x8xbf16>, vector<18x1x8xbf16> -> vector<18x16x8xbf16>
    %17 = tpu.concatenate %14, %11, %16 in 2 : vector<18x16x8xbf16>, vector<18x16x8xbf16>, vector<18x16x8xbf16> -> vector<18x16x24xbf16>
    %18 = vector.extract_strided_slice %17 {offsets = [0, 0, 0], sizes = [16, 16, 24], strides = [1, 1, 1]} : vector<18x16x24xbf16> to vector<16x16x24xbf16>
    %19 = vector.extract_strided_slice %17 {offsets = [1, 0, 0], sizes = [16, 16, 24], strides = [1, 1, 1]} : vector<18x16x24xbf16> to vector<16x16x24xbf16>
    %20 = vector.extract_strided_slice %17 {offsets = [2, 0, 0], sizes = [16, 16, 24], strides = [1, 1, 1]} : vector<18x16x24xbf16> to vector<16x16x24xbf16>
    %21 = tpu.concatenate %18, %19, %20 in 2 : vector<16x16x24xbf16>, vector<16x16x24xbf16>, vector<16x16x24xbf16> -> vector<16x16x72xbf16>
    %22 = vector.shape_cast %21 : vector<16x16x72xbf16> to vector<256x72xbf16>
    %c0_13 = arith.constant 0 : index
    %c0_14 = arith.constant 0 : index
    %c0_15 = arith.constant 0 : index
    %23 = vector.load %arg7[%c0_13, %c0_14, %c0_15] : memref<1x72x128xbf16, #tpu.memory_space<vmem>>, vector<1x72x128xbf16>
    %24 = vector.shape_cast %23 : vector<1x72x128xbf16> to vector<72x128xbf16>
    %cst_16 = arith.constant dense<0.000000e+00> : vector<256x128xf32>
    %25 = tpu.matmul %22, %24, %cst_16 {dimension_numbers = #tpu.dot_dimension_numbers<[1], [0], [0], [1], [0, 0, 1, 1], [], []>} : vector<256x72xbf16>, vector<72x128xbf16>, vector<256x128xf32> -> vector<256x128xf32>
    %c0_17 = arith.constant 0 : index
    %c0_18 = arith.constant 0 : index
    %26 = vector.load %arg8[%c0_17, %c0_18] : memref<1x128xf32, #tpu.memory_space<vmem>>, vector<1x128xf32>
    %27 = vector.broadcast %26 : vector<1x128xf32> to vector<256x128xf32>
    %28 = arith.addf %25, %27 : vector<256x128xf32>
    %cst_19 = arith.constant 0.000000e+00 : f32
    %29 = vector.broadcast %cst_19 : f32 to vector<256x128xf32>
    %30 = arith.maximumf %28, %29 : vector<256x128xf32>
    %31 = vector.shape_cast %30 : vector<256x128xf32> to vector<128x2x128xf32>
    %32 = vector.extract_strided_slice %31 {offsets = [0, 0, 0], sizes = [128, 1, 128], strides = [1, 1, 1]} : vector<128x2x128xf32> to vector<128x1x128xf32>
    %33 = vector.shape_cast %32 : vector<128x1x128xf32> to vector<128x128xf32>
    %34 = vector.extract_strided_slice %31 {offsets = [0, 1, 0], sizes = [128, 1, 128], strides = [1, 1, 1]} : vector<128x2x128xf32> to vector<128x1x128xf32>
    %35 = vector.shape_cast %34 : vector<128x1x128xf32> to vector<128x128xf32>
    %36 = arith.maximumf %33, %35 : vector<128x128xf32>
    %37 = vector.shape_cast %36 : vector<128x128xf32> to vector<8x2x8x128xf32>
    %38 = vector.extract_strided_slice %37 {offsets = [0, 0, 0, 0], sizes = [8, 1, 8, 128], strides = [1, 1, 1, 1]} : vector<8x2x8x128xf32> to vector<8x1x8x128xf32>
    %39 = vector.shape_cast %38 : vector<8x1x8x128xf32> to vector<8x8x128xf32>
    %40 = vector.extract_strided_slice %37 {offsets = [0, 1, 0, 0], sizes = [8, 1, 8, 128], strides = [1, 1, 1, 1]} : vector<8x2x8x128xf32> to vector<8x1x8x128xf32>
    %41 = vector.shape_cast %40 : vector<8x1x8x128xf32> to vector<8x8x128xf32>
    %42 = arith.maximumf %39, %41 : vector<8x8x128xf32>
    %43 = arith.truncf %42 : vector<8x8x128xf32> to vector<8x8x128xbf16>
    %c0_20 = arith.constant 0 : index
    %c0_21 = arith.constant 0 : index
    %c0_22 = arith.constant 0 : index
    %c0_23 = arith.constant 0 : index
    %44 = vector.load %arg9[%c0_20, %c0_21, %c0_22, %c0_23] : memref<1x8x8x128xbf16, #tpu.memory_space<vmem>>, vector<1x8x8x128xbf16>
    %45 = vector.shape_cast %44 : vector<1x8x8x128xbf16> to vector<8x8x128xbf16>
    %46 = vector.shape_cast %43 : vector<8x8x128xbf16> to vector<1x8x8x128xbf16>
    tpu.vector_store %arg9[%c0_20, %c0_21, %c0_22, %c0_23], %46 {strides = array<i32>} : memref<1x8x8x128xbf16, #tpu.memory_space<vmem>>, vector<1x8x8x128xbf16>,
    return
  }
  func.func @transform_0(%arg0: i32, %arg1: i32, %arg2: memref<1xi32, #tpu.memory_space<smem>>, %arg3: memref<1xi32, #tpu.memory_space<smem>>) -> (i32, i32, i32, i32) {
    %c0_i32 = arith.constant 0 : i32
    %c0_i32_0 = arith.constant 0 : i32
    %c0_i32_1 = arith.constant 0 : i32
    return %arg0, %arg1, %c0_i32, %c0_i32_0 : i32, i32, i32, i32
  }
  func.func @transform_1(%arg0: i32, %arg1: i32, %arg2: memref<1xi32, #tpu.memory_space<smem>>, %arg3: memref<1xi32, #tpu.memory_space<smem>>) -> (i32, i32, i32, i32) {
    %0 = arith.index_cast %arg1 : i32 to index
    %1 = memref.load %arg2[%0] : memref<1xi32, #tpu.memory_space<smem>>
    %c0_i32 = arith.constant 0 : i32
    %c0_i32_0 = arith.constant 0 : i32
    %c0_i32_1 = arith.constant 0 : i32
    return %arg0, %1, %c0_i32, %c0_i32_0 : i32, i32, i32, i32
  }
  func.func @transform_2(%arg0: i32, %arg1: i32, %arg2: memref<1xi32, #tpu.memory_space<smem>>, %arg3: memref<1xi32, #tpu.memory_space<smem>>) -> (i32, i32, i32, i32) {
    %0 = arith.index_cast %arg1 : i32 to index
    %1 = memref.load %arg3[%0] : memref<1xi32, #tpu.memory_space<smem>>
    %c0_i32 = arith.constant 0 : i32
    %c0_i32_0 = arith.constant 0 : i32
    %c0_i32_1 = arith.constant 0 : i32
    return %arg0, %1, %c0_i32, %c0_i32_0 : i32, i32, i32, i32
  }
  func.func @transform_3(%arg0: i32, %arg1: i32, %arg2: memref<1xi32, #tpu.memory_space<smem>>, %arg3: memref<1xi32, #tpu.memory_space<smem>>) -> (i32, i32, i32) {
    %c0_i32 = arith.constant 0 : i32
    %c0_i32_0 = arith.constant 0 : i32
    %c0_i32_1 = arith.constant 0 : i32
    %c0_i32_2 = arith.constant 0 : i32
    return %c0_i32, %c0_i32_0, %c0_i32_1 : i32, i32, i32
  }
  func.func @transform_4(%arg0: i32, %arg1: i32, %arg2: memref<1xi32, #tpu.memory_space<smem>>, %arg3: memref<1xi32, #tpu.memory_space<smem>>) -> (i32, i32) {
    %c0_i32 = arith.constant 0 : i32
    %c0_i32_0 = arith.constant 0 : i32
    %c0_i32_1 = arith.constant 0 : i32
    return %c0_i32, %c0_i32_0 : i32, i32
  }
  func.func @transform_5(%arg0: i32, %arg1: i32, %arg2: memref<1xi32, #tpu.memory_space<smem>>, %arg3: memref<1xi32, #tpu.memory_space<smem>>) -> (i32, i32, i32, i32) {
    %c0_i32 = arith.constant 0 : i32
    %c0_i32_0 = arith.constant 0 : i32
    %c0_i32_1 = arith.constant 0 : i32
    return %arg0, %arg1, %c0_i32, %c0_i32_0 : i32, i32, i32, i32
  }
}

module attributes {stable_mosaic.version = 11 : i64} {
  func.func @_fused_conv_kernel(%arg0: i32, %arg1: i32, %arg2: memref<1xi32, #tpu.memory_space<smem>>, %arg3: memref<1xi32, #tpu.memory_space<smem>>, %arg4: memref<1x8x8x128xbf16, #tpu.memory_space<vmem>>, %arg5: memref<1x1x8x128xbf16, #tpu.memory_space<vmem>>, %arg6: memref<1x1x8x128xbf16, #tpu.memory_space<vmem>>, %arg7: memref<3x384x128xbf16, #tpu.memory_space<vmem>>, %arg8: memref<1x128xf32, #tpu.memory_space<vmem>>, %arg9: memref<128x128xbf16, #tpu.memory_space<vmem>>, %arg10: memref<1x128xf32, #tpu.memory_space<vmem>>, %arg11: memref<1x4x4x128xf32, #tpu.memory_space<vmem>>) attributes {dimension_semantics = [#tpu.dimension_semantics<parallel>, #tpu.dimension_semantics<parallel>], iteration_bounds = array<i64: 2, 1>, scalar_prefetch = 2 : i64, scratch_operands = 0 : i64, tpu.core_type = #tpu.core_type<tc>, window_params = [{transform_indices = @transform_0, window_bounds = array<i64: 1, 8, 8, 128>}, {transform_indices = @transform_1, window_bounds = array<i64: 1, 1, 8, 128>}, {transform_indices = @transform_2, window_bounds = array<i64: 1, 1, 8, 128>}, {pipeline_mode = #tpu.pipeline_mode<synchronous>, transform_indices = @transform_3, window_bounds = array<i64: 3, 384, 128>}, {pipeline_mode = #tpu.pipeline_mode<synchronous>, transform_indices = @transform_4, window_bounds = array<i64: 1, 128>}, {pipeline_mode = #tpu.pipeline_mode<synchronous>, transform_indices = @transform_5, window_bounds = array<i64: 128, 128>}, {pipeline_mode = #tpu.pipeline_mode<synchronous>, transform_indices = @transform_6, window_bounds = array<i64: 1, 128>}, {transform_indices = @transform_7, window_bounds = array<i64: 1, 4, 4, 128>}]} {
    %c0 = arith.constant 0 : index
    %c0_0 = arith.constant 0 : index
    %c0_1 = arith.constant 0 : index
    %c0_2 = arith.constant 0 : index
    %0 = vector.load %arg4[%c0, %c0_0, %c0_1, %c0_2] : memref<1x8x8x128xbf16, #tpu.memory_space<vmem>>, vector<1x8x8x128xbf16>
    %1 = vector.shape_cast %0 : vector<1x8x8x128xbf16> to vector<8x8x128xbf16>
    %cst = arith.constant 0.000000e+00 : bf16
    %2 = vector.broadcast %cst : bf16 to vector<1x8x128xbf16>
    %c0_i32 = arith.constant 0 : i32
    %3 = arith.cmpi eq, %arg1, %c0_i32 : i32
    %c0_3 = arith.constant 0 : index
    %c0_4 = arith.constant 0 : index
    %c0_5 = arith.constant 0 : index
    %c0_6 = arith.constant 0 : index
    %4 = vector.load %arg5[%c0_3, %c0_4, %c0_5, %c0_6] : memref<1x1x8x128xbf16, #tpu.memory_space<vmem>>, vector<1x1x8x128xbf16>
    %5 = vector.shape_cast %4 : vector<1x1x8x128xbf16> to vector<1x8x128xbf16>
    %6 = arith.select %3, %2, %5 : vector<1x8x128xbf16>
    %c0_i32_7 = arith.constant 0 : i32
    %7 = arith.cmpi eq, %arg1, %c0_i32_7 : i32
    %c0_8 = arith.constant 0 : index
    %c0_9 = arith.constant 0 : index
    %c0_10 = arith.constant 0 : index
    %c0_11 = arith.constant 0 : index
    %8 = vector.load %arg6[%c0_8, %c0_9, %c0_10, %c0_11] : memref<1x1x8x128xbf16, #tpu.memory_space<vmem>>, vector<1x1x8x128xbf16>
    %9 = vector.shape_cast %8 : vector<1x1x8x128xbf16> to vector<1x8x128xbf16>
    %10 = arith.select %7, %2, %9 : vector<1x8x128xbf16>
    %11 = tpu.concatenate %6, %1, %10 in 0 : vector<1x8x128xbf16>, vector<8x8x128xbf16>, vector<1x8x128xbf16> -> vector<10x8x128xbf16>
    %cst_12 = arith.constant 0.000000e+00 : bf16
    %12 = vector.broadcast %cst_12 : bf16 to vector<10x1x128xbf16>
    %13 = vector.extract_strided_slice %11 {offsets = [0, 0, 0], sizes = [10, 7, 128], strides = [1, 1, 1]} : vector<10x8x128xbf16> to vector<10x7x128xbf16>
    %14 = tpu.concatenate %12, %13 in 1 : vector<10x1x128xbf16>, vector<10x7x128xbf16> -> vector<10x8x128xbf16>
    %15 = vector.extract_strided_slice %11 {offsets = [0, 1, 0], sizes = [10, 7, 128], strides = [1, 1, 1]} : vector<10x8x128xbf16> to vector<10x7x128xbf16>
    %16 = tpu.concatenate %15, %12 in 1 : vector<10x7x128xbf16>, vector<10x1x128xbf16> -> vector<10x8x128xbf16>
    %17 = tpu.concatenate %14, %11, %16 in 2 : vector<10x8x128xbf16>, vector<10x8x128xbf16>, vector<10x8x128xbf16> -> vector<10x8x384xbf16>
    %18 = vector.extract_strided_slice %17 {offsets = [0, 0, 0], sizes = [8, 8, 384], strides = [1, 1, 1]} : vector<10x8x384xbf16> to vector<8x8x384xbf16>
    %19 = vector.shape_cast %18 : vector<8x8x384xbf16> to vector<64x384xbf16>
    %c0_13 = arith.constant 0 : index
    %c0_14 = arith.constant 0 : index
    %c0_15 = arith.constant 0 : index
    %20 = vector.load %arg7[%c0_13, %c0_14, %c0_15] : memref<3x384x128xbf16, #tpu.memory_space<vmem>>, vector<1x384x128xbf16>
    %21 = vector.shape_cast %20 : vector<1x384x128xbf16> to vector<384x128xbf16>
    %cst_16 = arith.constant dense<0.000000e+00> : vector<64x128xf32>
    %22 = tpu.matmul %19, %21, %cst_16 {dimension_numbers = #tpu.dot_dimension_numbers<[1], [0], [0], [1], [0, 0, 1, 1], [], []>} : vector<64x384xbf16>, vector<384x128xbf16>, vector<64x128xf32> -> vector<64x128xf32>
    %23 = vector.extract_strided_slice %17 {offsets = [1, 0, 0], sizes = [8, 8, 384], strides = [1, 1, 1]} : vector<10x8x384xbf16> to vector<8x8x384xbf16>
    %24 = vector.shape_cast %23 : vector<8x8x384xbf16> to vector<64x384xbf16>
    %c1 = arith.constant 1 : index
    %c0_17 = arith.constant 0 : index
    %c0_18 = arith.constant 0 : index
    %25 = vector.load %arg7[%c1, %c0_17, %c0_18] : memref<3x384x128xbf16, #tpu.memory_space<vmem>>, vector<1x384x128xbf16>
    %26 = vector.shape_cast %25 : vector<1x384x128xbf16> to vector<384x128xbf16>
    %cst_19 = arith.constant dense<0.000000e+00> : vector<64x128xf32>
    %27 = tpu.matmul %24, %26, %cst_19 {dimension_numbers = #tpu.dot_dimension_numbers<[1], [0], [0], [1], [0, 0, 1, 1], [], []>} : vector<64x384xbf16>, vector<384x128xbf16>, vector<64x128xf32> -> vector<64x128xf32>
    %28 = arith.addf %22, %27 : vector<64x128xf32>
    %29 = vector.extract_strided_slice %17 {offsets = [2, 0, 0], sizes = [8, 8, 384], strides = [1, 1, 1]} : vector<10x8x384xbf16> to vector<8x8x384xbf16>
    %30 = vector.shape_cast %29 : vector<8x8x384xbf16> to vector<64x384xbf16>
    %c2 = arith.constant 2 : index
    %c0_20 = arith.constant 0 : index
    %c0_21 = arith.constant 0 : index
    %31 = vector.load %arg7[%c2, %c0_20, %c0_21] : memref<3x384x128xbf16, #tpu.memory_space<vmem>>, vector<1x384x128xbf16>
    %32 = vector.shape_cast %31 : vector<1x384x128xbf16> to vector<384x128xbf16>
    %cst_22 = arith.constant dense<0.000000e+00> : vector<64x128xf32>
    %33 = tpu.matmul %30, %32, %cst_22 {dimension_numbers = #tpu.dot_dimension_numbers<[1], [0], [0], [1], [0, 0, 1, 1], [], []>} : vector<64x384xbf16>, vector<384x128xbf16>, vector<64x128xf32> -> vector<64x128xf32>
    %34 = arith.addf %28, %33 : vector<64x128xf32>
    %c0_23 = arith.constant 0 : index
    %c0_24 = arith.constant 0 : index
    %35 = vector.load %arg8[%c0_23, %c0_24] : memref<1x128xf32, #tpu.memory_space<vmem>>, vector<1x128xf32>
    %36 = vector.broadcast %35 : vector<1x128xf32> to vector<64x128xf32>
    %37 = arith.addf %34, %36 : vector<64x128xf32>
    %cst_25 = arith.constant 0.000000e+00 : f32
    %38 = vector.broadcast %cst_25 : f32 to vector<64x128xf32>
    %39 = arith.maximumf %37, %38 : vector<64x128xf32>
    %40 = vector.shape_cast %39 : vector<64x128xf32> to vector<32x2x128xf32>
    %41 = vector.extract_strided_slice %40 {offsets = [0, 0, 0], sizes = [32, 1, 128], strides = [1, 1, 1]} : vector<32x2x128xf32> to vector<32x1x128xf32>
    %42 = vector.shape_cast %41 : vector<32x1x128xf32> to vector<32x128xf32>
    %43 = vector.extract_strided_slice %40 {offsets = [0, 1, 0], sizes = [32, 1, 128], strides = [1, 1, 1]} : vector<32x2x128xf32> to vector<32x1x128xf32>
    %44 = vector.shape_cast %43 : vector<32x1x128xf32> to vector<32x128xf32>
    %45 = arith.maximumf %42, %44 : vector<32x128xf32>
    %46 = vector.shape_cast %45 : vector<32x128xf32> to vector<4x2x4x128xf32>
    %47 = vector.extract_strided_slice %46 {offsets = [0, 0, 0, 0], sizes = [4, 1, 4, 128], strides = [1, 1, 1, 1]} : vector<4x2x4x128xf32> to vector<4x1x4x128xf32>
    %48 = vector.shape_cast %47 : vector<4x1x4x128xf32> to vector<4x4x128xf32>
    %49 = vector.extract_strided_slice %46 {offsets = [0, 1, 0, 0], sizes = [4, 1, 4, 128], strides = [1, 1, 1, 1]} : vector<4x2x4x128xf32> to vector<4x1x4x128xf32>
    %50 = vector.shape_cast %49 : vector<4x1x4x128xf32> to vector<4x4x128xf32>
    %51 = arith.maximumf %48, %50 : vector<4x4x128xf32>
    %52 = vector.shape_cast %51 : vector<4x4x128xf32> to vector<16x128xf32>
    %53 = arith.truncf %52 : vector<16x128xf32> to vector<16x128xbf16>
    %c0_26 = arith.constant 0 : index
    %c0_27 = arith.constant 0 : index
    %54 = vector.load %arg9[%c0_26, %c0_27] : memref<128x128xbf16, #tpu.memory_space<vmem>>, vector<128x128xbf16>
    %cst_28 = arith.constant dense<0.000000e+00> : vector<16x128xf32>
    %55 = tpu.matmul %53, %54, %cst_28 {dimension_numbers = #tpu.dot_dimension_numbers<[1], [0], [0], [1], [0, 0, 1, 1], [], []>} : vector<16x128xbf16>, vector<128x128xbf16>, vector<16x128xf32> -> vector<16x128xf32>
    %c0_29 = arith.constant 0 : index
    %c0_30 = arith.constant 0 : index
    %56 = vector.load %arg10[%c0_29, %c0_30] : memref<1x128xf32, #tpu.memory_space<vmem>>, vector<1x128xf32>
    %57 = vector.broadcast %56 : vector<1x128xf32> to vector<16x128xf32>
    %58 = arith.addf %55, %57 : vector<16x128xf32>
    %59 = vector.shape_cast %58 : vector<16x128xf32> to vector<4x4x128xf32>
    %c0_31 = arith.constant 0 : index
    %c0_32 = arith.constant 0 : index
    %c0_33 = arith.constant 0 : index
    %c0_34 = arith.constant 0 : index
    %60 = vector.load %arg11[%c0_31, %c0_32, %c0_33, %c0_34] : memref<1x4x4x128xf32, #tpu.memory_space<vmem>>, vector<1x4x4x128xf32>
    %61 = vector.shape_cast %60 : vector<1x4x4x128xf32> to vector<4x4x128xf32>
    %62 = vector.shape_cast %59 : vector<4x4x128xf32> to vector<1x4x4x128xf32>
    tpu.vector_store %arg11[%c0_31, %c0_32, %c0_33, %c0_34], %62 {strides = array<i32>} : memref<1x4x4x128xf32, #tpu.memory_space<vmem>>, vector<1x4x4x128xf32>,
    return
  }
  func.func @transform_0(%arg0: i32, %arg1: i32, %arg2: memref<1xi32, #tpu.memory_space<smem>>, %arg3: memref<1xi32, #tpu.memory_space<smem>>) -> (i32, i32, i32, i32) {
    %c0_i32 = arith.constant 0 : i32
    %c0_i32_0 = arith.constant 0 : i32
    %c0_i32_1 = arith.constant 0 : i32
    return %arg0, %arg1, %c0_i32, %c0_i32_0 : i32, i32, i32, i32
  }
  func.func @transform_1(%arg0: i32, %arg1: i32, %arg2: memref<1xi32, #tpu.memory_space<smem>>, %arg3: memref<1xi32, #tpu.memory_space<smem>>) -> (i32, i32, i32, i32) {
    %0 = arith.index_cast %arg1 : i32 to index
    %1 = memref.load %arg2[%0] : memref<1xi32, #tpu.memory_space<smem>>
    %c0_i32 = arith.constant 0 : i32
    %c0_i32_0 = arith.constant 0 : i32
    %c0_i32_1 = arith.constant 0 : i32
    return %arg0, %1, %c0_i32, %c0_i32_0 : i32, i32, i32, i32
  }
  func.func @transform_2(%arg0: i32, %arg1: i32, %arg2: memref<1xi32, #tpu.memory_space<smem>>, %arg3: memref<1xi32, #tpu.memory_space<smem>>) -> (i32, i32, i32, i32) {
    %0 = arith.index_cast %arg1 : i32 to index
    %1 = memref.load %arg3[%0] : memref<1xi32, #tpu.memory_space<smem>>
    %c0_i32 = arith.constant 0 : i32
    %c0_i32_0 = arith.constant 0 : i32
    %c0_i32_1 = arith.constant 0 : i32
    return %arg0, %1, %c0_i32, %c0_i32_0 : i32, i32, i32, i32
  }
  func.func @transform_3(%arg0: i32, %arg1: i32, %arg2: memref<1xi32, #tpu.memory_space<smem>>, %arg3: memref<1xi32, #tpu.memory_space<smem>>) -> (i32, i32, i32) {
    %c0_i32 = arith.constant 0 : i32
    %c0_i32_0 = arith.constant 0 : i32
    %c0_i32_1 = arith.constant 0 : i32
    %c0_i32_2 = arith.constant 0 : i32
    return %c0_i32, %c0_i32_0, %c0_i32_1 : i32, i32, i32
  }
  func.func @transform_4(%arg0: i32, %arg1: i32, %arg2: memref<1xi32, #tpu.memory_space<smem>>, %arg3: memref<1xi32, #tpu.memory_space<smem>>) -> (i32, i32) {
    %c0_i32 = arith.constant 0 : i32
    %c0_i32_0 = arith.constant 0 : i32
    %c0_i32_1 = arith.constant 0 : i32
    return %c0_i32, %c0_i32_0 : i32, i32
  }
  func.func @transform_5(%arg0: i32, %arg1: i32, %arg2: memref<1xi32, #tpu.memory_space<smem>>, %arg3: memref<1xi32, #tpu.memory_space<smem>>) -> (i32, i32) {
    %c0_i32 = arith.constant 0 : i32
    %c0_i32_0 = arith.constant 0 : i32
    %c0_i32_1 = arith.constant 0 : i32
    return %c0_i32, %c0_i32_0 : i32, i32
  }
  func.func @transform_6(%arg0: i32, %arg1: i32, %arg2: memref<1xi32, #tpu.memory_space<smem>>, %arg3: memref<1xi32, #tpu.memory_space<smem>>) -> (i32, i32) {
    %c0_i32 = arith.constant 0 : i32
    %c0_i32_0 = arith.constant 0 : i32
    %c0_i32_1 = arith.constant 0 : i32
    return %c0_i32, %c0_i32_0 : i32, i32
  }
  func.func @transform_7(%arg0: i32, %arg1: i32, %arg2: memref<1xi32, #tpu.memory_space<smem>>, %arg3: memref<1xi32, #tpu.memory_space<smem>>) -> (i32, i32, i32, i32) {
    %c0_i32 = arith.constant 0 : i32
    %c0_i32_0 = arith.constant 0 : i32
    %c0_i32_1 = arith.constant 0 : i32
    return %arg0, %arg1, %c0_i32, %c0_i32_0 : i32, i32, i32, i32
  }
}

</mosaic_0001>

<bundles_post_ra>
// kernel: classifier_forward.2
= control target key start
LH: loop header
LB: loop body
LE: loop exit
PB: predicated region body
PF: predicated region fallthrough
CT: control target
= control target key end

     0   :  { %s3722_s23 = smov 0   ;;  %s3724_s1 = smov 0   ;;  %s4542_s0 = inlined_call_operand.<no memory space> [shape: s32[1], index: 0, kind: input, shape index: {}]   ;;  %s4543_s1 = inlined_call_operand.<no memory space> [shape: s32[1], index: 1, kind: input, shape index: {}]   ;;  %s4544_s2 = inlined_call_operand.vmem [shape: bf16[2,16,16,8], index: 2, kind: input, shape index: {}, may-alias: {2,3,4}]   ;;  %s4545_s3 = inlined_call_operand.vmem [shape: bf16[2,16,16,8], index: 3, kind: input, shape index: {}, may-alias: {2,3,4}]   ;;  %s4546_s4 = inlined_call_operand.vmem [shape: bf16[2,16,16,8], index: 4, kind: input, shape index: {}, may-alias: {2,3,4}]   ;;  %s4547_s5 = inlined_call_operand.vmem [shape: bf16[1,72,128], index: 5, kind: input, shape index: {}]   ;;  %s4548_s6 = inlined_call_operand.vmem [shape: f32[1,128], index: 6, kind: input, shape index: {}]   ;;  %s4549_s7 = inlined_call_operand.vmem [shape: bf16[2,8,8,128], index: 7, kind: output, shape index: {}]  }
   0x1   :  { %s3726_s24 = smov 0  }
   0x2 LB: > { %s31_s3 = sadd.s32 1, %s3670_s1  ;;  %p3209_p0 = scmp.ge.s32.totalorder %s3674_s24, 1  ;;  %s3674_s24 = sphi %s3726_s24, %s19_s24   ;;  %s3670_s1 = sphi %s3724_s1, %s4555_s1   ;;  %s3666_s23 = sphi %s3722_s23, %s4554_s23  }
   0x3   : > { %p33_p1 = scmp.ge.s32.totalorder %s31_s3, 2  ;;  %p253_p2 = scmp.lt.s32.totalorder %s3674_s24, 3 }
   0x5   : > { %s4557_s3 = smov (%p33_p1, %s31_s3), 0  ;;  %p254_p3 = pnand %p3209_p0, %p253_p2 }
   0x6   : > { %p311_p4 = scmp.lt.s32.totalorder (!%p254_p3), %s3666_s23, 1  ;;  %vm708_vm0 = vsmask.f32 (!%p254_p3), 7424  ;;  %s3676_s28 = smov (!%p254_p3), 8   ;;  %vm707_vm1 = vcmask (!%p254_p3), 1047552   ;;  %vm632_vm3 = vcmask (!%p254_p3), 1040384  }
   0x7   : > { %257 = sbr.rel (%p254_p3) target bundleno = 692 (0x2b4), region = 40  ;;  %vm3770_vm2 = vmand (!%p254_p3), %vm707_vm1, %vm708_vm0  ;;  %s3677_s29 = smov (!%p254_p3), 16   ;;  %vm633_vm4 = vsmask.f32 (!%p254_p3), 256  ;;  %vm1133_vm6 = vcmask (!%p254_p3), 1043456   ;;  %vm818_vm7 = vcmask (!%p254_p3), 64512  }
   0x8   : > { %vm3936_vm5 = vmand (!%p254_p3), %vm632_vm3, %vm633_vm4  ;;  %vm873_vm8 = vcmask (!%p254_p3), 130048   ;;  %s3679_s17 = smov (!%p254_p3), 24   ;;  %s3680_s18 = smov (!%p254_p3), 48   ;;  %vm991_vm9 = vcmask (!%p254_p3), 195584   ;;  %vm1024_vm10 = vcmask (!%p254_p3), 392192   ;;  %vm1100_vm11 = vcmask (!%p254_p3), 588800  }
   0x9   : > { %vm2931_vm12 = vcmask (!%p254_p3), 1041409   ;;  %vm2934_vm13 = vcmask (!%p254_p3), 1042434   ;;  %vm2937_vm14 = vcmask (!%p254_p3), 1043459   ;;  %vm2940_vm15 = vcmask (!%p254_p3), 1044484  }
   0xa   : > { %vm2943_vm0 = vcmask (!%p254_p3), 1045509   ;;  %vm2946_vm1 = vcmask (!%p254_p3), 1046534  }
   0xe   : > { %s4559_s23 = smov (!%p311_p4, %s3666_s23), 1 }
   0xf   : > { %s3454_s4 = sshll.u32 %s4559_s23, 7  ;;  %s3455_s21 = sshll.u32 %s4559_s23, 5 }
  0x10   : > { %s3746_s27 = scalar_lea.vmem %s4544_s2, %s3454_s4  ;;  %s4324_s23 = scalar_lea.vmem %s4549_s7, %s3455_s21 }
  0x11   : > { %v3630_v0 = vld [vmem:[%s3746_s27 + $0x8] sm:$0xff]   ;;  %v3631_v1 = vld [vmem:[%s3746_s27] sm:$0xff]   ;;  %v3758_v7 = vld [vmem:[%s3746_s27 + $0x50] sm:$0xff]  }
  0x12   : > { %732 = vrot.lane.b32.xlu1 %v3630_v0, %s3676_s28  ;;  %v3632_v2 = vld [vmem:[%s3746_s27 + $0x48] sm:$0xff]   ;;  %730 = vrot.lane.b32.xlu0 %v3631_v1, %s3676_s28  ;;  %v3754_v3 = vld [vmem:[%s3746_s27 + $0x40] sm:$0xff]   ;;  %v496_v4 = vshrl.u32 %v3631_v1, 16  ;;  %v499_v5 = vshll.u32 %v3631_v1, 16  ;;  %v503_v6 = vshrl.u32 %v3630_v0, 16  ;;  %v506_v14 = vshll.u32 %v3630_v0, 16 }
  0x13   : > { %v552_v8 = vshrl.u32 %v3754_v3, 16  ;;  %v555_v9 = vshll.u32 %v3754_v3, 16  ;;  %v3765_v11 = vld [vmem:[%s3746_s27 + $0x10] sm:$0xff]   ;;  %v559_v12 = vshrl.u32 %v3632_v2, 16  ;;  %v562_v13 = vshll.u32 %v3632_v2, 16  ;;  %v3795_v35 = vld [vmem:[%s3746_s27 + $0x58] sm:$0xff]  }
  0x14   : > { %v655_v10 = vrot.slane %v499_v5, 1  ;;  %v498_v18 = vrot.slane %v496_v4, 7  ;;  %v505_v19 = vrot.slane %v503_v6, 7  ;;  %v657_v21 = vrot.slane %v506_v14, 1  ;;  %v3637_v37 = vld [vmem:[%s3746_s27 + $0x18] sm:$0xff]   ;;  %v3638_v40 = vld [vmem:[%s3746_s27 + $0x60] sm:$0xff]  }
  0x15   : > { %v671_v15 = vrot.slane %v555_v9, 1  ;;  %v673_v20 = vrot.slane %v562_v13, 1  ;;  %v569_v22 = vshll.u32 %v3758_v7, 16  ;;  %v566_v24 = vshrl.u32 %v3758_v7, 16  ;;  %v3639_v49 = vld [vmem:[%s3746_s27 + $0x20] sm:$0xff]   ;;  %v3819_v58 = vld [vmem:[%s3746_s27 + $0x68] sm:$0xff]  }
  0x16   : > { %748 = vrot.lane.b32.xlu1 %v3632_v2, %s3676_s28  ;;  %746 = vrot.lane.b32.xlu0 %v3754_v3, %s3676_s28  ;;  %v656_v17 = vor.u32 %v655_v10, %v496_v4  ;;  %v510_v25 = vshrl.u32 %v3765_v11, 16  ;;  %v513_v26 = vshll.u32 %v3765_v11, 16  ;;  %v658_v29 = vor.u32 %v657_v21, %v503_v6  ;;  %v3822_v63 = vld [vmem:[%s3746_s27 + $0x28] sm:$0xff]   ;;  %v3830_v6 = vld [vmem:[%s3746_s27 + $0x30] sm:$0xff]  }
  0x17   : > { %v672_v23 = vor.u32 %v671_v15, %v552_v8  ;;  %v674_v28 = vor.u32 %v673_v20, %v559_v12  ;;  %v675_v30 = vrot.slane %v569_v22, 1  ;;  %v3790_v33 = vor.u32 %v506_v14, %v505_v19 }
  0x18   : > { %v711_v27 = vsel %vm3770_vm2, %v656_v17, 0  ;;  %v659_v32 = vrot.slane %v513_v26, 1  ;;  %v3792_v34 = vor.u32 %v499_v5, %v498_v18  ;;  %v561_v36 = vrot.slane %v559_v12, 7  ;;  %v3827_v5 = vld [vmem:[%s3746_s27 + $0x70] sm:$0xff]  }
  0x19   : > { %v719_v31 = vsel %vm3770_vm2, %v672_v23, 0  ;;  %v720_v38 = vsel %vm3770_vm2, %v674_v28, 0  ;;  %v676_v39 = vor.u32 %v675_v30, %v566_v24  ;;  %v712_v41 = vsel %vm3770_vm2, %v658_v29, 0 }
  0x1a   : > { %750 = vrot.lane.b32.xlu1 %v3758_v7, %s3676_s28  ;;  %734 = vrot.lane.b32.xlu0 %v3765_v11, %s3676_s28  ;;  %v660_v42 = vor.u32 %v659_v32, %v510_v25  ;;  %v576_v43 = vshll.u32 %v3795_v35, 16  ;;  %v520_v44 = vshll.u32 %v3637_v37, 16  ;;  %v3807_v45 = vor.u32 %v562_v13, %v561_v36 }
  0x1b   : > { %v721_v46 = vsel %vm3770_vm2, %v676_v39, 0  ;;  %v583_v47 = vshll.u32 %v3638_v40, 16  ;;  %v573_v50 = vshrl.u32 %v3795_v35, 16  ;;  %v517_v52 = vshrl.u32 %v3637_v37, 16  ;;  %v3644_v39 = vld [vmem:[%s3746_s27 + $0x78] sm:$0xff]  }
  0x1c   : > { %v713_v48 = vsel %vm3770_vm2, %v660_v42, 0  ;;  %v677_v51 = vrot.slane %v576_v43, 1  ;;  %v661_v53 = vrot.slane %v520_v44, 1  ;;  %v580_v54 = vshrl.u32 %v3638_v40, 16 }
  0x1d   : > { %v679_v55 = vrot.slane %v583_v47, 1  ;;  %v554_v56 = vrot.slane %v552_v8, 7  ;;  %v527_v57 = vshll.u32 %v3639_v49, 16  ;;  %v568_v59 = vrot.slane %v566_v24, 7 }
  0x1e   : > { %800 = vrot.lane.b32.xlu1 %v719_v31, %s3677_s29  ;;  %784 = vrot.lane.b32.xlu0 %v711_v27, %s3677_s29  ;;  %v512_v60 = vrot.slane %v510_v25, 7  ;;  %v678_v61 = vor.u32 %v677_v51, %v573_v50  ;;  %v524_v62 = vshrl.u32 %v3639_v49, 16  ;;  %v575_v0 = vrot.slane %v573_v50, 7 }
  0x1f   : > { %v519_v1 = vrot.slane %v517_v52, 7  ;;  %v662_v2 = vor.u32 %v661_v53, %v517_v52  ;;  %v582_v4 = vrot.slane %v580_v54, 7  ;;  %v680_v8 = vor.u32 %v679_v55, %v580_v54 }
  0x20   : > { %v526_v10 = vrot.slane %v524_v62, 7  ;;  %v587_v12 = vshrl.u32 %v3819_v58, 16  ;;  %v531_v13 = vshrl.u32 %v3822_v63, 16  ;;  %v663_v14 = vrot.slane %v527_v57, 1 }
  0x21   : > { %v590_v15 = vshll.u32 %v3819_v58, 16  ;;  %v594_v17 = vshrl.u32 %v3827_v5, 16  ;;  %v538_v18 = vshrl.u32 %v3830_v6, 16  ;;  %v722_v19 = vsel %vm3770_vm2, %v678_v61, 0 }
  0x22   : > { %802 = vrot.lane.b32.xlu1 %v720_v38, %s3677_s29  ;;  %786 = vrot.lane.b32.xlu0 %v712_v41, %s3677_s29  ;;  %v589_v20 = vrot.slane %v587_v12, 7  ;;  %v533_v21 = vrot.slane %v531_v13, 7  ;;  %v3842_v23 = vor.u32 %v555_v9, %v554_v56  ;;  %v3847_v27 = vor.u32 %v569_v22, %v568_v59 }
  0x23   : > { %v596_v24 = vrot.slane %v594_v17, 7  ;;  %v540_v25 = vrot.slane %v538_v18, 7  ;;  %v3851_v28 = vor.u32 %v513_v26, %v512_v60  ;;  %v714_v29 = vsel %vm3770_vm2, %v662_v2, 0 }
  0x24   : > { %v3856_v3 = vor.u32 %v576_v43, %v575_v0  ;;  %v3858_v9 = vor.u32 %v520_v44, %v519_v1  ;;  %v3860_v30 = vor.u32 %v583_v47, %v582_v4  ;;  %v664_v7 = vor.u32 %v663_v14, %v524_v62 }
  0x25   : > { %v534_v22 = vshll.u32 %v3822_v63, 16  ;;  %v597_v11 = vshll.u32 %v3827_v5, 16  ;;  %v541_v26 = vshll.u32 %v3830_v6, 16  ;;  %v3865_v31 = vor.u32 %v527_v57, %v526_v10 }
  0x26   : > { %804 = vrot.lane.b32.xlu1 %v721_v46, %s3677_s29  ;;  %788 = vrot.lane.b32.xlu0 %v713_v48, %s3677_s29  ;;  %v3868_v32 = vor.u32 %v590_v15, %v589_v20  ;;  %v723_v38 = vsel %vm3770_vm2, %v680_v8, 0  ;;  %v715_v41 = vsel %vm3770_vm2, %v664_v7, 0  ;;  %v601_v43 = vshrl.u32 %v3644_v39, 16 }
  0x27   : > { %v3872_v36 = vor.u32 %v597_v11, %v596_v24  ;;  %v681_v44 = vrot.slane %v590_v15, 1  ;;  %v665_v48 = vrot.slane %v534_v22, 1  ;;  %v604_v52 = vshll.u32 %v3644_v39, 16 }
  0x28   : > { %v603_v47 = vrot.slane %v601_v43, 7  ;;  %v683_v55 = vrot.slane %v597_v11, 1  ;;  %v667_v60 = vrot.slane %v541_v26, 1 }
  0x29   : > { %v682_v54 = vor.u32 %v681_v44, %v587_v12  ;;  %v666_v59 = vor.u32 %v665_v48, %v531_v13  ;;  %v685_v12 = vrot.slane %v604_v52, 1 }
  0x2a   : > { %752 = vrot.lane.b32.xlu1 %v3795_v35, %s3676_s28  ;;  %736 = vrot.lane.b32.xlu0 %v3637_v37, %s3676_s28  ;;  %v3870_v35 = vor.u32 %v534_v22, %v533_v21  ;;  %v3874_v37 = vor.u32 %v541_v26, %v540_v25  ;;  %v3889_v56 = vor.u32 %v604_v52, %v603_v47  ;;  %v3647_v21 = vld [vmem:[%s4547_s5 + $0x8] sm:$0xff]   ;;  %v3648_v25 = vld [vmem:[%s4547_s5 + $0x10] sm:$0xff]  }
  0x2b   : > { %v684_v62 = vor.u32 %v683_v55, %v594_v17  ;;  %v716_v0 = vsel %vm3770_vm2, %v666_v59, 0  ;;  %v668_v1 = vor.u32 %v667_v60, %v538_v18  ;;  %v686_v17 = vor.u32 %v685_v12, %v601_v43  ;;  %v3649_v22 = vld [vmem:[%s4547_s5 + $0x18] sm:$0xff]  }
  0x2c   : > { %v646_v55 = vsel %vm3936_vm5, 0, %v3847_v27  ;;  %v638_v60 = vsel %vm3936_vm5, 0, %v3851_v28 }
  0x2d   : > { %v725_v4 = vsel %vm3770_vm2, %v684_v62, 0  ;;  %v726_v20 = vsel %vm3770_vm2, %v686_v17, 0  ;;  %v640_v17 = vsel %vm3936_vm5, 0, %v3865_v31 }
  0x2e   : > { %754 = vrot.lane.b32.xlu1 %v3638_v40, %s3676_s28  ;;  %738 = vrot.lane.b32.xlu0 %v3639_v49, %s3676_s28  ;;  %v3645_v40 = vld [vmem:[%s3746_s27 + $0x38] sm:$0xff]   ;;  %v3678_v49 = vmov 0  }
  0x2f   : > { %v545_v42 = vshrl.u32 %v3645_v40, 16  ;;  %v3220_v50 = vcombine.low %v3678_v49, %v3678_v49  ;;  %v548_v51 = vshll.u32 %v3645_v40, 16 }
  0x31   : > { %v547_v46 = vrot.slane %v545_v42, 7  ;;  %v489_v53 = vshrl.u32 %v3220_v50, 16  ;;  %v3625_v14 = vpack.i.bf16 %v3220_v50, %v3220_v50 }
  0x32   : > { %806 = vrot.lane.b32.xlu1 %v722_v19, %s3677_s29  ;;  %790 = vrot.lane.b32.xlu0 %v714_v29, %s3677_s29  ;;  %v3646_v19 = vld [vmem:[%s4547_s5] sm:$0xff]  }
  0x33   : > { %v3891_v57 = vor.u32 %v548_v51, %v547_v46  ;;  %v491_v61 = vrot.slane %v489_v53, 7  ;;  %3541 = vmatprep.subr.bf16.mxu0 %v3646_v19  ;;  %3583 = vmatprep.subr.bf16.mxu1 %v3646_v19  ;;  %v645_v46 = vsel %vm3936_vm5, 0, %v3807_v45 }
  0x34   : > { %3542 = vmatpush3.bf16.msra.mxu0 %v3646_v19  ;;  %3588 = vmatpush3.bf16.msra.mxu1 %v3646_v19 }
  0x35   : > { %3543 = vmatprep.subr.bf16.mxu0 %v3647_v21  ;;  %3584 = vmatprep.subr.bf16.mxu1 %v3647_v21 }
  0x36   : > { %808 = vrot.lane.b32.xlu1 %v723_v38, %s3677_s29  ;;  %792 = vrot.lane.b32.xlu0 %v715_v41, %s3677_s29  ;;  %v644_v38 = vsel %vm3936_vm5, 0, %v3842_v23  ;;  %v636_v41 = vsel %vm3936_vm5, 0, %v3792_v34  ;;  %v637_v34 = vsel %vm3936_vm5, 0, %v3790_v33 }
  0x38   : > { %3544 = vmatpush3.bf16.msra.mxu0 %v3647_v21  ;;  %3589 = vmatpush3.bf16.msra.mxu1 %v3647_v21 }
  0x39   : > { %3545 = vmatprep.subr.bf16.mxu0 %v3648_v25  ;;  %3585 = vmatprep.subr.bf16.mxu1 %v3648_v25 }
  0x3a   : > { %756 = vrot.lane.b32.xlu1 %v3819_v58, %s3676_s28  ;;  %740 = vrot.lane.b32.xlu0 %v3822_v63, %s3676_s28  ;;  %v724_v58 = vsel %vm3770_vm2, %v682_v54, 0  ;;  %v492_v63 = vshll.u32 %v3220_v50, 16 }
  0x3c   : > { %v3901_v2 = vor.u32 %v492_v63, %v491_v61  ;;  %v653_v10 = vrot.slane %v492_v63, 1  ;;  %3546 = vmatpush3.bf16.msra.mxu0 %v3648_v25  ;;  %3590 = vmatpush3.bf16.msra.mxu1 %v3648_v25 }
  0x3d   : > { %3547 = vmatprep.subr.bf16.mxu0 %v3649_v22  ;;  %3586 = vmatprep.subr.bf16.mxu1 %v3649_v22 }
  0x3e   : > { %758 = vrot.lane.b32.xlu1 %v3827_v5, %s3676_s28  ;;  %742 = vrot.lane.b32.xlu0 %v3830_v6, %s3676_s28  ;;  %v669_v5 = vrot.slane %v548_v51, 1  ;;  %v717_v6 = vsel %vm3770_vm2, %v668_v1, 0  ;;  %v654_v15 = vor.u32 %v653_v10, %v489_v53  ;;  %v647_v1 = vsel %vm3936_vm5, 0, %v3856_v3 }
  0x40   : > { %v670_v8 = vor.u32 %v669_v5, %v545_v42  ;;  %v710_v18 = vsel %vm3770_vm2, %v654_v15, 0  ;;  %3548 = vmatpush3.bf16.msra.mxu0 %v3649_v22  ;;  %3591 = vmatpush3.bf16.msra.mxu1 %v3649_v22  ;;  %v639_v5 = vsel %vm3936_vm5, 0, %v3858_v9 }
  0x42   : > { %810 = vrot.lane.b32.xlu1 %v724_v58, %s3677_s29  ;;  %794 = vrot.lane.b32.xlu0 %v716_v0, %s3677_s29  ;;  %v718_v13 = vsel %vm3770_vm2, %v670_v8, 0  ;;  %vm2949_vm2 = vcmask 1047559  }
  0x46   : > { %812 = vrot.lane.b32.xlu1 %v725_v4, %s3677_s29  ;;  %796 = vrot.lane.b32.xlu0 %v717_v6, %s3677_s29 }
  0x4a   : > { %760 = vrot.lane.b32.xlu1 %v3644_v39, %s3676_s28  ;;  %744 = vrot.lane.b32.xlu0 %v3645_v40, %s3676_s28  ;;  %v3650_v40 = vld [vmem:[%s4547_s5 + $0x20] ss:$0 sps:$4 sm:$0xff]  }
  0x4b   : > { %3593 = vmatprep.subr.msk.bf16.mxu0 %vm1133_vm6, %v3650_v40  ;;  %3594 = vmatprep.subr.msk.bf16.mxu1 %vm1133_vm6, %v3650_v40  ;;  %v1135_v42 = vsel %vm1133_vm6, %v3650_v40, 0  ;;  %v650_v40 = vsel %vm3936_vm5, 0, %v3872_v36 }
  0x4c   : > { %3550 = vmatpush3.bf16.msra.mxu0 %v1135_v42  ;;  %3592 = vmatpush3.bf16.msra.mxu1 %v1135_v42  ;;  %v642_v42 = vsel %vm3936_vm5, 0, %v3874_v37 }
  0x4e   : > { %798 = vrot.lane.b32.xlu1 %v718_v13, %s3677_s29  ;;  %3626 = vrot.lane.b32.xlu0 %v3625_v14, %s3676_s28  ;;  %v648_v14 = vsel %vm3936_vm5, 0, %v3860_v30 }
  0x52   : > { %816 = vrot.lane.b32.xlu1 %v710_v18, %s3677_s29  ;;  %814 = vrot.lane.b32.xlu0 %v726_v20, %s3677_s29 }
  0x56   : > { %782 = vrot.lane.b32.xlu0 %v710_v18, %s3677_s29 }
  0x84   : > { %v733_v16 = vpop.permute.xlu1 %732  ;;  %v731_v24 = vpop.permute.xlu0 %730 }
  0x85   : > { %v824_v23 = vsel %vm818_vm7, %v636_v41, %v731_v24  ;;  %v827_v51 = vsel %vm818_vm7, %v637_v34, %v733_v16  ;;  %v649_v24 = vsel %vm3936_vm5, 0, %v3868_v32  ;;  %v635_v34 = vsel %vm3936_vm5, 0, %v3901_v2 }
  0x88   : > { %v749_v29 = vpop.permute.xlu1 %748  ;;  %v747_v7 = vpop.permute.xlu0 %746 }
  0x89   : > { %v848_v43 = vsel %vm818_vm7, %v644_v38, %v747_v7  ;;  %v851_v45 = vsel %vm818_vm7, %v645_v46, %v749_v29  ;;  %v641_v29 = vsel %vm3936_vm5, 0, %v3870_v35 }
  0x8c   : > { %v751_v26 = vpop.permute.xlu1 %750  ;;  %v735_v39 = vpop.permute.xlu0 %734 }
  0x8d   : > { %v854_v61 = vsel %vm818_vm7, %v646_v55, %v751_v26  ;;  %v830_v62 = vsel %vm818_vm7, %v638_v60, %v735_v39 }
  0x90   : > { %v801_v44 = vpop.permute.xlu1 %800  ;;  %v785_v47 = vpop.permute.xlu0 %784 }
  0x91   : > { %v3955_v48 = vsel %vm873_vm8, %v848_v43, %v801_v44  ;;  %v3963_v49 = vsel %vm873_vm8, %v824_v23, %v785_v47 }
  0x92   : > { %942 = vrot.lane.b32.xlu0 %v3955_v48, %s3679_s17  ;;  %926 = vrot.lane.b32.xlu1 %v3963_v49, %s3679_s17 }
  0x94   : > { %v803_v50 = vpop.permute.xlu1 %802  ;;  %v787_v52 = vpop.permute.xlu0 %786 }
  0x95   : > { %v3970_v53 = vsel %vm873_vm8, %v851_v45, %v803_v50  ;;  %v3975_v33 = vsel %vm873_vm8, %v827_v51, %v787_v52  ;;  %v651_v45 = vsel %vm3936_vm5, 0, %v3889_v56  ;;  %v643_v50 = vsel %vm3936_vm5, 0, %v3891_v57 }
  0x96   : > { %944 = vrot.lane.b32.xlu0 %v3970_v53, %s3679_s17  ;;  %928 = vrot.lane.b32.xlu1 %v3975_v33, %s3679_s17 }
  0x98   : > { %v805_v54 = vpop.permute.xlu1 %804  ;;  %v789_v59 = vpop.permute.xlu0 %788 }
  0x99   : > { %v3992_v27 = vsel %vm873_vm8, %v854_v61, %v805_v54  ;;  %v3997_v28 = vsel %vm873_vm8, %v830_v62, %v789_v59 }
  0x9a   : > { %975 = vrot.lane.b32.xlu0 %v3970_v53, %s3680_s18  ;;  %959 = vrot.lane.b32.xlu1 %v3975_v33, %s3680_s18 }
  0x9c   : > { %v753_v58 = vpop.permute.xlu1 %752  ;;  %v737_v63 = vpop.permute.xlu0 %736 }
  0x9d   : > { %v857_v6 = vsel %vm818_vm7, %v647_v1, %v753_v58  ;;  %v833_v10 = vsel %vm818_vm7, %v639_v5, %v737_v63 }
  0x9e   : > { %977 = vrot.lane.b32.xlu0 %v3992_v27, %s3680_s18  ;;  %961 = vrot.lane.b32.xlu1 %v3997_v28, %s3680_s18 }
  0xa0   : > { %v755_v0 = vpop.permute.xlu1 %754  ;;  %v739_v4 = vpop.permute.xlu0 %738 }
  0xa1   : > { %v860_v18 = vsel %vm818_vm7, %v648_v14, %v755_v0  ;;  %v836_v20 = vsel %vm818_vm7, %v640_v17, %v739_v4 }
  0xa2   : > { %946 = vrot.lane.b32.xlu0 %v3992_v27, %s3679_s17  ;;  %930 = vrot.lane.b32.xlu1 %v3997_v28, %s3679_s17 }
  0xa4   : > { %v807_v8 = vpop.permute.xlu1 %806  ;;  %v791_v12 = vpop.permute.xlu0 %790 }
  0xa5   : > { %v4014_v13 = vsel %vm873_vm8, %v857_v6, %v807_v8  ;;  %v4019_v3 = vsel %vm873_vm8, %v833_v10, %v791_v12 }
  0xa6   : > { %948 = vrot.lane.b32.xlu0 %v4014_v13, %s3679_s17  ;;  %932 = vrot.lane.b32.xlu1 %v4019_v3, %s3679_s17 }
  0xa8   : > { %v809_v9 = vpop.permute.xlu1 %808  ;;  %v793_v15 = vpop.permute.xlu0 %792 }
  0xa9   : > { %v4036_v16 = vsel %vm873_vm8, %v860_v18, %v809_v9  ;;  %v4041_v30 = vsel %vm873_vm8, %v836_v20, %v793_v15 }
  0xaa   : > { %979 = vrot.lane.b32.xlu0 %v4014_v13, %s3680_s18  ;;  %963 = vrot.lane.b32.xlu1 %v4019_v3, %s3680_s18 }
  0xac   : > { %v757_v19 = vpop.permute.xlu1 %756  ;;  %v741_v21 = vpop.permute.xlu0 %740 }
  0xad   : > { %v863_v7 = vsel %vm818_vm7, %v649_v24, %v757_v19  ;;  %v839_v26 = vsel %vm818_vm7, %v641_v29, %v741_v21 }
  0xae   : > { %981 = vrot.lane.b32.xlu0 %v4036_v16, %s3680_s18  ;;  %965 = vrot.lane.b32.xlu1 %v4041_v30, %s3680_s18 }
  0xb0   : > { %v759_v31 = vpop.permute.xlu1 %758  ;;  %v743_v25 = vpop.permute.xlu0 %742 }
  0xb1   : > { %v866_v43 = vsel %vm818_vm7, %v650_v40, %v759_v31  ;;  %v842_v44 = vsel %vm818_vm7, %v642_v42, %v743_v25 }
  0xb2   : > { %950 = vrot.lane.b32.xlu0 %v4036_v16, %s3679_s17  ;;  %934 = vrot.lane.b32.xlu1 %v4041_v30, %s3679_s17 }
  0xb4   : > { %v811_v22 = vpop.permute.xlu1 %810  ;;  %v795_v38 = vpop.permute.xlu0 %794 }
  0xb5   : > { %v4058_v39 = vsel %vm873_vm8, %v863_v7, %v811_v22  ;;  %v4063_v32 = vsel %vm873_vm8, %v839_v26, %v795_v38 }
  0xb6   : > { %952 = vrot.lane.b32.xlu0 %v4058_v39, %s3679_s17  ;;  %936 = vrot.lane.b32.xlu1 %v4063_v32, %s3679_s17 }
  0xb8   : > { %v813_v35 = vpop.permute.xlu1 %812  ;;  %v797_v41 = vpop.permute.xlu0 %796 }
  0xb9   : > { %v4080_v47 = vsel %vm873_vm8, %v866_v43, %v813_v35  ;;  %v4085_v36 = vsel %vm873_vm8, %v842_v44, %v797_v41 }
  0xba   : > { %983 = vrot.lane.b32.xlu0 %v4058_v39, %s3680_s18  ;;  %967 = vrot.lane.b32.xlu1 %v4063_v32, %s3680_s18 }
  0xbc   : > { %v761_v23 = vpop.permute.xlu1 %760  ;;  %v745_v46 = vpop.permute.xlu0 %744 }
  0xbd   : > { %v869_v2 = vsel %vm818_vm7, %v651_v45, %v761_v23  ;;  %v845_v55 = vsel %vm818_vm7, %v643_v50, %v745_v46 }
  0xbe   : > { %985 = vrot.lane.b32.xlu0 %v4080_v47, %s3680_s18  ;;  %969 = vrot.lane.b32.xlu1 %v4085_v36, %s3680_s18 }
  0xc0   : > { %v3627_v37 = vpop.permute.xlu0 %3626  ;;  %v799_v52 = vpop.permute.xlu1 %798 }
  0xc1   : > { %v3629_v51 = vunpack.i.h.bf16 %v3627_v37  ;;  %v891_v11 = vsel %vm873_vm8, %v845_v55, %v799_v52  ;;  %v3628_v57 = vunpack.i.l.bf16 %v3627_v37 }
  0xc2   : > { %954 = vrot.lane.b32.xlu0 %v4080_v47, %s3679_s17  ;;  %938 = vrot.lane.b32.xlu1 %v4085_v36, %s3679_s17 }
  0xc3   : > { %v821_v54 = vsel %vm818_vm7, %v635_v34, %v3629_v51  ;;  %v872_v62 = vsel %vm818_vm7, %v635_v34, %v3628_v57 }
  0xc4   : > { %v815_v59 = vpop.permute.xlu0 %814  ;;  %v817_v58 = vpop.permute.xlu1 %816 }
  0xc5   : > { %v907_v56 = vsel %vm873_vm8, %v869_v2, %v815_v59  ;;  %v909_v63 = vsel %vm873_vm8, %v872_v62, %v817_v58 }
  0xc6   : > { %956 = vrot.lane.b32.xlu0 %v907_v56, %s3679_s17  ;;  %940 = vrot.lane.b32.xlu1 %v891_v11, %s3679_s17 }
  0xc8   : > { %v783_v60 = vpop.permute.xlu0 %782 }
  0xc9   : > { %v875_v61 = vsel %vm873_vm8, %v821_v54, %v783_v60 }
  0xca   : > { %987 = vrot.lane.b32.xlu0 %v907_v56, %s3680_s18  ;;  %971 = vrot.lane.b32.xlu1 %v891_v11, %s3680_s18 }
  0xce   : > { %989 = vrot.lane.b32.xlu0 %v909_v63, %s3680_s18  ;;  %973 = vrot.lane.b32.xlu1 %v3955_v48, %s3680_s18 }
 0x104   : > { %v943_v0 = vpop.permute.xlu0 %942  ;;  %v927_v1 = vpop.permute.xlu1 %926 }
 0x105   : > { %v1009_v6 = vsel %vm991_vm9, %v891_v11, %v943_v0  ;;  %v993_v10 = vsel %vm991_vm9, %v875_v61, %v927_v1 }
 0x108   : > { %v945_v4 = vpop.permute.xlu0 %944  ;;  %v929_v5 = vpop.permute.xlu1 %928 }
 0x109   : > { %v1011_v15 = vsel %vm991_vm9, %v3955_v48, %v945_v4  ;;  %v995_v18 = vsel %vm991_vm9, %v3963_v49, %v929_v5  ;;  %v3681_v4 = vmov 1983009808  }
 0x10a   : > { %v1364_v5 = vunpack.c.l.s4 %v3681_v4 }
 0x10c   : > { %v976_v8 = vpop.permute.xlu0 %975  ;;  %v960_v12 = vpop.permute.xlu1 %959 }
 0x10d   : > { %v1042_v9 = vsel %vm1024_vm10, %v1009_v6, %v976_v8  ;;  %v1026_v14 = vsel %vm1024_vm10, %v993_v10, %v960_v12  ;;  %v1366_v6 = vlaneseq  ;;  %v1365_v8 = vunpack.c.0.s8 %v1364_v5 }
 0x10e   : > { %3567 = vmatprep.mubr.msk.bf16.mxu1 %vm1100_vm11, %v1042_v9  ;;  %3551 = vmatprep.mubr.msk.bf16.mxu0 %vm1100_vm11, %v1026_v14 }
 0x10f   : > { %v1367_v10 = vshrl.u32 %v1366_v6, 7 }
 0x110   : > { %v978_v17 = vpop.permute.xlu0 %977  ;;  %v962_v20 = vpop.permute.xlu1 %961 }
 0x111   : > { %v1044_v19 = vsel %vm1024_vm10, %v1011_v15, %v978_v17  ;;  %v1028_v21 = vsel %vm1024_vm10, %v995_v18, %v962_v20  ;;  %v4184_v9 = vsub.s32 %v1365_v8, %v1367_v10 }
 0x112   : > { %3568 = vmatmul.mubr.msk.bf16.vlgmr.msra.gmra.mrb[0].mxu1 %vm1100_vm11, %v1044_v19  ;;  %3552 = vmatmul.mubr.msk.bf16.vlgmr.msra.gmra.mrb[0].mxu0 %vm1100_vm11, %v1028_v21 }
 0x114   : > { %v947_v31 = vpop.permute.xlu0 %946  ;;  %v931_v24 = vpop.permute.xlu1 %930 }
 0x115   : > { %v1013_v48 = vsel %vm991_vm9, %v3970_v53, %v947_v31  ;;  %v997_v49 = vsel %vm991_vm9, %v3975_v33, %v931_v24 }
 0x118   : > { %v949_v25 = vpop.permute.xlu0 %948  ;;  %v933_v29 = vpop.permute.xlu1 %932 }
 0x119   : > { %v1015_v35 = vsel %vm991_vm9, %v3992_v27, %v949_v25  ;;  %v999_v53 = vsel %vm991_vm9, %v3997_v28, %v933_v29 }
 0x11c   : > { %v980_v7 = vpop.permute.xlu0 %979  ;;  %v964_v26 = vpop.permute.xlu1 %963 }
 0x11d   : > { %v1046_v22 = vsel %vm1024_vm10, %v1013_v48, %v980_v7  ;;  %v1030_v38 = vsel %vm1024_vm10, %v997_v49, %v964_v26 }
 0x11e   : > { %3571 = vmatprep.mubr.msk.bf16.mxu1 %vm1100_vm11, %v1046_v22  ;;  %3555 = vmatprep.mubr.msk.bf16.mxu0 %vm1100_vm11, %v1030_v38 }
 0x120   : > { %v982_v40 = vpop.permute.xlu0 %981  ;;  %v966_v42 = vpop.permute.xlu1 %965 }
 0x121   : > { %v1048_v41 = vsel %vm1024_vm10, %v1015_v35, %v982_v40  ;;  %v1032_v33 = vsel %vm1024_vm10, %v999_v53, %v966_v42 }
 0x122   : > { %3572 = vmatmul.mubr.msk.bf16.gmra.mrb[4].mxu1 %vm1100_vm11, %v1048_v41  ;;  %3556 = vmatmul.mubr.msk.bf16.gmra.mrb[4].mxu0 %vm1100_vm11, %v1032_v33 }
 0x124   : > { %v951_v43 = vpop.permute.xlu0 %950  ;;  %v935_v44 = vpop.permute.xlu1 %934 }
 0x125   : > { %v1017_v27 = vsel %vm991_vm9, %v4014_v13, %v951_v43  ;;  %v1001_v28 = vsel %vm991_vm9, %v4019_v3, %v935_v44 }
 0x128   : > { %v953_v23 = vpop.permute.xlu0 %952  ;;  %v937_v46 = vpop.permute.xlu1 %936 }
 0x129   : > { %v1019_v51 = vsel %vm991_vm9, %v4036_v16, %v953_v23  ;;  %v1003_v13 = vsel %vm991_vm9, %v4041_v30, %v937_v46 }
 0x12c   : > { %v984_v37 = vpop.permute.xlu0 %983  ;;  %v968_v45 = vpop.permute.xlu1 %967 }
 0x12d   : > { %v1050_v34 = vsel %vm1024_vm10, %v1017_v27, %v984_v37  ;;  %v1034_v50 = vsel %vm1024_vm10, %v1001_v28, %v968_v45 }
 0x12e   : > { %3575 = vmatprep.mubr.msk.bf16.mxu1 %vm1100_vm11, %v1050_v34  ;;  %3559 = vmatprep.mubr.msk.bf16.mxu0 %vm1100_vm11, %v1034_v50 }
 0x130   : > { %v986_v52 = vpop.permute.xlu0 %985  ;;  %v970_v2 = vpop.permute.xlu1 %969 }
 0x131   : > { %v1052_v54 = vsel %vm1024_vm10, %v1019_v51, %v986_v52  ;;  %v1036_v3 = vsel %vm1024_vm10, %v1003_v13, %v970_v2 }
 0x132   : > { %3576 = vmatmul.mubr.msk.bf16.gmra.mrb[8].mxu1 %vm1100_vm11, %v1052_v54  ;;  %3560 = vmatmul.mubr.msk.bf16.gmra.mrb[8].mxu0 %vm1100_vm11, %v1036_v3 }
 0x134   : > { %v955_v55 = vpop.permute.xlu0 %954  ;;  %v939_v59 = vpop.permute.xlu1 %938 }
 0x135   : > { %v1021_v16 = vsel %vm991_vm9, %v4058_v39, %v955_v55  ;;  %v1005_v57 = vsel %vm991_vm9, %v4063_v32, %v939_v59 }
 0x138   : > { %v957_v56 = vpop.permute.xlu0 %956  ;;  %v941_v11 = vpop.permute.xlu1 %940 }
 0x139   : > { %v1023_v62 = vsel %vm991_vm9, %v4080_v47, %v957_v56  ;;  %v1007_v63 = vsel %vm991_vm9, %v4085_v36, %v941_v11  ;;  %v4182_v47 = vld [vmem:[%s4548_s6] ss:$0 sm:$0xff] }
 0x13c   : > { %v988_v30 = vpop.permute.xlu0 %987  ;;  %v972_v60 = vpop.permute.xlu1 %971 }
 0x13d   : > { %v1054_v61 = vsel %vm1024_vm10, %v1021_v16, %v988_v30  ;;  %v1038_v58 = vsel %vm1024_vm10, %v1005_v57, %v972_v60 }
 0x13e   : > { %3563 = vmatprep.mubr.msk.bf16.mxu0 %vm1100_vm11, %v1038_v58  ;;  %3579 = vmatprep.mubr.msk.bf16.mxu1 %vm1100_vm11, %v1054_v61 }
 0x140   : > { %v990_v39 = vpop.permute.xlu0 %989  ;;  %v974_v0 = vpop.permute.xlu1 %973 }
 0x141   : > { %v1056_v32 = vsel %vm1024_vm10, %v1023_v62, %v990_v39  ;;  %v1040_v1 = vsel %vm1024_vm10, %v1007_v63, %v974_v0 }
 0x142   : > { %3564 = vmatmul.mubr.msk.bf16.gmra.mrb[12].mxu0 %vm1100_vm11, %v1040_v1  ;;  %3580 = vmatmul.mubr.msk.bf16.gmra.mrb[12].mxu1 %vm1100_vm11, %v1056_v32 }
 0x1e5   : > { %v3569_v36 = vpop.f32.mrb[0].mxu1  ;;  %v3553_v12 = vpop.f32.mrb[0].mxu0 }
 0x1e6   : > { %v1244_v14 = vadd.f32 %v3569_v36, %v4182_v47  ;;  %v1235_v15 = vpop.f32.mrb[1].mxu1  ;;  %v1180_v17 = vadd.f32 %v3553_v12, %v4182_v47  ;;  %v1171_v18 = vpop.f32.mrb[1].mxu0 }
 0x1e7   : > { %v1236_v19 = vadd.f32 %v4182_v47, %v1235_v15  ;;  %v3570_v20 = vpop.f32.mrb[2].mxu1  ;;  %v1172_v31 = vadd.f32 %v4182_v47, %v1171_v18  ;;  %v3554_v24 = vpop.f32.mrb[2].mxu0 }
 0x1e8   : > { %v1316_v21 = vmax.f32 %v1244_v14, 0.0  ;;  %v1247_v25 = vadd.f32 %v3570_v20, %v4182_v47  ;;  %v1238_v29 = vpop.f32.mrb[3].mxu1  ;;  %v1300_v48 = vmax.f32 %v1180_v17, 0.0  ;;  %v4192_v49 = vadd.f32 %v3554_v24, %v4182_v47  ;;  %v4194_v22 = vpop.f32.mrb[3].mxu0 }
 0x1e9   : > { %v1314_v7 = vmax.f32 %v1236_v19, 0.0  ;;  %v4197_v26 = vadd.f32 %v4182_v47, %v1238_v29  ;;  %v1298_v40 = vmax.f32 %v1172_v31, 0.0 }
 0x1ea   : > { %v1668_v38 = vcombine.high %v1316_v21, %v1316_v21  ;;  %v1675_v35 = vrot.slane %v1316_v21, %v4184_v9  ;;  %v4200_v53 = vmax.f32 %v1247_v25, 0.0  ;;  %v1396_v41 = vcombine.high %v1300_v48, %v1300_v48 }
 0x1eb   : > { %v1403_v42 = vrot.slane %v1300_v48, %v4184_v9  ;;  %v1634_v33 = vcombine.high %v1314_v7, %v1314_v7  ;;  %v1641_v43 = vrot.slane %v1314_v7, %v4184_v9  ;;  %v1362_v27 = vcombine.high %v1298_v40, %v1298_v40 }
 0x1ec   : > { %v1682_v44 = vrot.slane %v1668_v38, %v4184_v9  ;;  %v1683_v23 = vcombine.high %v1675_v35, %v1675_v35  ;;  %v3332_v46 = vrot.slane %v1675_v35, 9  ;;  %v1410_v37 = vrot.slane %v1396_v41, %v4184_v9 }
 0x1ed   : > { %v1411_v28 = vcombine.high %v1403_v42, %v1403_v42  ;;  %v3268_v34 = vrot.slane %v1403_v42, 9  ;;  %v1369_v45 = vrot.slane %v1298_v40, %v4184_v9  ;;  %v1376_v16 = vrot.slane %v1362_v27, %v4184_v9 }
 0x1ee   : > { %v1684_v50 = vcombine.high %v1682_v44, %v1682_v44  ;;  %v3333_v51 = vrot.slane %v1683_v23, 9  ;;  %v3334_v52 = vrot.slane %v1682_v44, 9  ;;  %v2490_v13 = vmax.f32 %v1675_v35, %v3332_v46 }
 0x1ef   : > { %v1412_v54 = vcombine.high %v1410_v37, %v1410_v37  ;;  %v3269_v2 = vrot.slane %v1411_v28, 9  ;;  %v3270_v3 = vrot.slane %v1410_v37, 9  ;;  %v2426_v55 = vmax.f32 %v1403_v42, %v3268_v34 }
 0x1f0   : > { %v3335_v59 = vrot.slane %v1684_v50, 9  ;;  %v2491_v56 = vmax.f32 %v1683_v23, %v3333_v51  ;;  %v2492_v11 = vmax.f32 %v1682_v44, %v3334_v52  ;;  %v1377_v61 = vcombine.high %v1369_v45, %v1369_v45 }
 0x1f1   : > { %v3271_v57 = vrot.slane %v1412_v54, 9  ;;  %v2427_v30 = vmax.f32 %v1411_v28, %v3269_v2  ;;  %v2428_v60 = vmax.f32 %v1410_v37, %v3270_v3  ;;  %v1378_v62 = vcombine.high %v1376_v16, %v1376_v16 }
 0x1f2   : > { %v2493_v58 = vmax.f32 %v1684_v50, %v3335_v59  ;;  %v3260_v63 = vrot.slane %v1369_v45, 9  ;;  %v3262_v39 = vrot.slane %v1376_v16, 9  ;;  %v3261_v32 = vrot.slane %v1377_v61, 9 }
 0x1f3   : > { %v2429_v0 = vmax.f32 %v1412_v54, %v3271_v57  ;;  %v1648_v1 = vrot.slane %v1634_v33, %v4184_v9  ;;  %v1649_v4 = vcombine.high %v1641_v43, %v1641_v43  ;;  %v3263_v5 = vrot.slane %v1378_v62, 9 }
 0x1f4   : > { %v2418_v6 = vmax.f32 %v1369_v45, %v3260_v63  ;;  %v2420_v8 = vmax.f32 %v1376_v16, %v3262_v39  ;;  %v3324_v10 = vrot.slane %v1641_v43, 9  ;;  %v2419_v36 = vmax.f32 %v1377_v61, %v3261_v32 }
 0x1f5   : > { %v1650_v12 = vcombine.high %v1648_v1, %v1648_v1  ;;  %v3325_v14 = vrot.slane %v1649_v4, 9  ;;  %v3326_v15 = vrot.slane %v1648_v1, 9  ;;  %v4209_v17 = vpop.f32.mrb[4].mxu1  ;;  %v2421_v18 = vmax.f32 %v1378_v62, %v3263_v5  ;;  %v4211_v31 = vpop.f32.mrb[4].mxu0 }
 0x1f6   : > { %v2546_v19 = vmax.f32 %v2418_v6, %v2426_v55  ;;  %v2548_v20 = vmax.f32 %v2420_v8, %v2428_v60  ;;  %v2482_v21 = vmax.f32 %v1641_v43, %v3324_v10  ;;  %v4213_v24 = vpop.f32.mrb[5].mxu1  ;;  %v2547_v25 = vmax.f32 %v2419_v36, %v2427_v30  ;;  %v4215_v38 = vpop.f32.mrb[5].mxu0 }
 0x1f7   : > { %v3327_v29 = vrot.slane %v1650_v12, 9  ;;  %v2483_v48 = vmax.f32 %v1649_v4, %v3325_v14  ;;  %v2484_v7 = vmax.f32 %v1648_v1, %v3326_v15  ;;  %v4217_v35 = vpop.f32.mrb[6].mxu1  ;;  %v2549_v40 = vmax.f32 %v2421_v18, %v2429_v0  ;;  %v4219_v44 = vpop.f32.mrb[6].mxu0 }
 0x1f8   : > { %v3456_v41 = vpack.c.bf16 %v2546_v19, %v2546_v19  ;;  %v3458_v42 = vpack.c.bf16 %v2548_v20, %v2548_v20  ;;  %v2578_v33 = vmax.f32 %v2482_v21, %v2490_v13  ;;  %v4221_v23 = vpop.f32.mrb[7].mxu1  ;;  %v3457_v43 = vpack.c.bf16 %v2547_v25, %v2547_v25  ;;  %v4223_v28 = vpop.f32.mrb[7].mxu0 }
 0x1f9   : > { %v2485_v46 = vmax.f32 %v1650_v12, %v3327_v29  ;;  %v2579_v27 = vmax.f32 %v2483_v48, %v2491_v56  ;;  %v2580_v37 = vmax.f32 %v2484_v7, %v2492_v11  ;;  %v3459_v34 = vpack.c.bf16 %v2549_v40, %v2549_v40 }
 0x1fa   : > { %v2866_v45 = vunpack.c.l.b16 %v3456_v41  ;;  %v2868_v50 = vunpack.c.l.b16 %v3458_v42  ;;  %v3488_v51 = vpack.c.bf16 %v2578_v33, %v2578_v33  ;;  %v2867_v52 = vunpack.c.l.b16 %v3457_v43 }
 0x1fb   : > { %v2581_v54 = vmax.f32 %v2485_v46, %v2493_v58  ;;  %v3489_v2 = vpack.c.bf16 %v2579_v27, %v2579_v27  ;;  %v3490_v3 = vpack.c.bf16 %v2580_v37, %v2580_v37  ;;  %v2869_v13 = vunpack.c.l.b16 %v3459_v34 }
 0x1fc   : > { %v2933_v55 = vrot.slane %v2868_v50, 6  ;;  %v2898_v59 = vunpack.c.l.b16 %v3488_v51  ;;  %v1301_v16 = vmax.f32 %v4192_v49, 0.0  ;;  %v2930_v57 = vrot.slane %v2867_v52, 7 }
 0x1fd   : > { %v3491_v30 = vpack.c.bf16 %v2581_v54, %v2581_v54  ;;  %v2899_v56 = vunpack.c.l.b16 %v3489_v2  ;;  %v2900_v11 = vunpack.c.l.b16 %v3490_v3  ;;  %v2936_v60 = vrot.slane %v2869_v13, 5 }
 0x1fe   : > { %v1413_v61 = vcombine.high %v1301_v16, %v1301_v16  ;;  %v1420_v62 = vrot.slane %v1301_v16, %v4184_v9  ;;  %v1685_v63 = vcombine.high %v4200_v53, %v4200_v53  ;;  %v2932_v58 = vsel %vm2931_vm12, %v2930_v57, %v2866_v45 }
 0x1ff   : > { %v2901_v39 = vunpack.c.l.b16 %v3491_v30  ;;  %v2993_v0 = vrot.slane %v2899_v56, 7  ;;  %v2995_v32 = vrot.slane %v2900_v11, 6  ;;  %v2935_v1 = vsel %vm2934_vm13, %v2933_v55, %v2932_v58 }
 0x200   : > { %v1427_v49 = vrot.slane %v1413_v61, %v4184_v9  ;;  %v1428_v4 = vcombine.high %v1420_v62, %v1420_v62  ;;  %v3272_v5 = vrot.slane %v1420_v62, 9  ;;  %v1692_v10 = vrot.slane %v4200_v53, %v4184_v9 }
 0x201   : > { %v2994_v6 = vsel %vm2931_vm12, %v2993_v0, %v2898_v59  ;;  %v2997_v8 = vrot.slane %v2901_v39, 5  ;;  %v1699_v36 = vrot.slane %v1685_v63, %v4184_v9  ;;  %v1175_v33 = vadd.f32 %v4182_v47, %v4194_v22 }
 0x202   : > { %v2996_v12 = vsel %vm2934_vm13, %v2995_v32, %v2994_v6  ;;  %v1429_v14 = vcombine.high %v1427_v49, %v1427_v49  ;;  %v3273_v15 = vrot.slane %v1428_v4, 9  ;;  %v3274_v18 = vrot.slane %v1427_v49, 9 }
 0x203   : > { %v2430_v19 = vmax.f32 %v1420_v62, %v3272_v5  ;;  %v1700_v20 = vcombine.high %v1692_v10, %v1692_v10  ;;  %v1701_v21 = vcombine.high %v1699_v36, %v1699_v36  ;;  %v3336_v25 = vrot.slane %v1692_v10, 9 }
 0x204   : > { %v3275_v29 = vrot.slane %v1429_v14, 9  ;;  %v4237_v48 = vmax.f32 %v1428_v4, %v3273_v15  ;;  %v4239_v7 = vmax.f32 %v1427_v49, %v3274_v18  ;;  %v3338_v40 = vrot.slane %v1699_v36, 9 }
 0x205   : > { %v3337_v41 = vrot.slane %v1700_v20, 9  ;;  %v3339_v42 = vrot.slane %v1701_v21, 9  ;;  %v2494_v53 = vmax.f32 %v1692_v10, %v3336_v25  ;;  %v4243_v43 = vpop.f32.mrb[8].mxu1  ;;  %v4248_v37 = vsel %vm2937_vm14, %v2936_v60, %v2935_v1  ;;  %v4251_v45 = vpop.f32.mrb[8].mxu0 }
 0x206   : > { %v4245_v46 = vmax.f32 %v1429_v14, %v3275_v29  ;;  %v2496_v27 = vmax.f32 %v1699_v36, %v3338_v40  ;;  %v1315_v34 = vmax.f32 %v4197_v26, 0.0  ;;  %v4253_v50 = vpop.f32.mrb[9].mxu1  ;;  %v1299_v54 = vmax.f32 %v1175_v33, 0.0  ;;  %v4258_v22 = vpop.f32.mrb[9].mxu0 }
 0x207   : > { %v2495_v51 = vmax.f32 %v1700_v20, %v3337_v41  ;;  %v2497_v52 = vmax.f32 %v1701_v21, %v3339_v42  ;;  %v4256_v2 = vsel %vm2937_vm14, %v2997_v8, %v2996_v12  ;;  %v4260_v3 = vpop.f32.mrb[10].mxu1  ;;  %v1196_v26 = vadd.f32 %v4211_v31, %v4182_v47  ;;  %v4267_v16 = vpop.f32.mrb[10].mxu0 }
 0x208   : > { %v1651_v13 = vcombine.high %v1315_v34, %v1315_v34  ;;  %v1658_v55 = vrot.slane %v1315_v34, %v4184_v9  ;;  %v1260_v59 = vadd.f32 %v4209_v17, %v4182_v47  ;;  %v4269_v57 = vpop.f32.mrb[11].mxu1  ;;  %v1379_v30 = vcombine.high %v1299_v54, %v1299_v54  ;;  %v4280_v61 = vpop.f32.mrb[11].mxu0 }
 0x209   : > { %v1386_v56 = vrot.slane %v1299_v54, %v4184_v9  ;;  %v4274_v11 = vadd.f32 %v4182_v47, %v4215_v38  ;;  %v4278_v60 = vadd.f32 %v4182_v47, %v4213_v24  ;;  %v4283_v63 = vmax.f32 %v1196_v26, 0.0 }
 0x20a   : > { %v1665_v31 = vrot.slane %v1651_v13, %v4184_v9  ;;  %v1666_v17 = vcombine.high %v1658_v55, %v1658_v55  ;;  %v3328_v62 = vrot.slane %v1658_v55, 9  ;;  %v1393_v58 = vrot.slane %v1379_v30, %v4184_v9 }
 0x20b   : > { %v1394_v39 = vcombine.high %v1386_v56, %v1386_v56  ;;  %v3264_v0 = vrot.slane %v1386_v56, 9  ;;  %v4286_v32 = vmax.f32 %v1260_v59, 0.0 }
 0x20c   : > { %v1667_v38 = vcombine.high %v1665_v31, %v1665_v31  ;;  %v3329_v1 = vrot.slane %v1666_v17, 9  ;;  %v3330_v49 = vrot.slane %v1665_v31, 9  ;;  %v2486_v24 = vmax.f32 %v1658_v55, %v3328_v62 }
 0x20d   : > { %v1395_v4 = vcombine.high %v1393_v58, %v1393_v58  ;;  %v3265_v5 = vrot.slane %v1394_v39, 9  ;;  %v3266_v6 = vrot.slane %v1393_v58, 9  ;;  %v2422_v8 = vmax.f32 %v1386_v56, %v3264_v0 }
 0x20e   : > { %v3331_v10 = vrot.slane %v1667_v38, 9  ;;  %v2487_v36 = vmax.f32 %v1666_v17, %v3329_v1  ;;  %v2488_v12 = vmax.f32 %v1665_v31, %v3330_v49  ;;  %v2582_v14 = vmax.f32 %v2486_v24, %v2494_v53 }
 0x20f   : > { %v3267_v15 = vrot.slane %v1395_v4, 9  ;;  %v2423_v18 = vmax.f32 %v1394_v39, %v3265_v5  ;;  %v2424_v20 = vmax.f32 %v1393_v58, %v3266_v6  ;;  %v2550_v21 = vmax.f32 %v2422_v8, %v2430_v19 }
 0x210   : > { %v2489_v25 = vmax.f32 %v1667_v38, %v3331_v10  ;;  %v2583_v29 = vmax.f32 %v2487_v36, %v2495_v51  ;;  %v2584_v40 = vmax.f32 %v2488_v12, %v2496_v27  ;;  %v3492_v41 = vpack.c.bf16 %v2582_v14, %v2582_v14 }
 0x211   : > { %v2425_v42 = vmax.f32 %v1395_v4, %v3267_v15  ;;  %v2551_v33 = vmax.f32 %v2423_v18, %v4237_v48  ;;  %v2552_v34 = vmax.f32 %v2424_v20, %v4239_v7  ;;  %v3460_v54 = vpack.c.bf16 %v2550_v21, %v2550_v21 }
 0x212   : > { %v2585_v13 = vmax.f32 %v2489_v25, %v2497_v52  ;;  %v3493_v55 = vpack.c.bf16 %v2583_v29, %v2583_v29  ;;  %v3494_v26 = vpack.c.bf16 %v2584_v40, %v2584_v40  ;;  %v2902_v59 = vunpack.c.l.b16 %v3492_v41 }
 0x213   : > { %v2553_v53 = vmax.f32 %v2425_v42, %v4245_v46  ;;  %v3461_v30 = vpack.c.bf16 %v2551_v33, %v2551_v33  ;;  %v3462_v56 = vpack.c.bf16 %v2552_v34, %v2552_v34  ;;  %v2870_v19 = vunpack.c.l.b16 %v3460_v54 }
 0x214   : > { %v3495_v31 = vpack.c.bf16 %v2585_v13, %v2585_v13  ;;  %v2903_v51 = vunpack.c.l.b16 %v3493_v55  ;;  %v2904_v27 = vunpack.c.l.b16 %v3494_v26  ;;  %v2999_v17 = vrot.slane %v2902_v59, 4 }
 0x215   : > { %v3463_v62 = vpack.c.bf16 %v2553_v53, %v2553_v53  ;;  %v2871_v58 = vunpack.c.l.b16 %v3461_v30  ;;  %v2872_v48 = vunpack.c.l.b16 %v3462_v56  ;;  %v2939_v39 = vrot.slane %v2870_v19, 4  ;;  %v4293_v1 = vpop.f32.mrb[12].mxu0  ;;  %v4295_v46 = vpop.f32.mrb[12].mxu1 }
 0x216   : > { %v2905_v7 = vunpack.c.l.b16 %v3495_v31  ;;  %v3000_v52 = vsel %vm2940_vm15, %v2999_v17, %v4256_v2  ;;  %v3001_v0 = vrot.slane %v2903_v51, 3  ;;  %v3003_v38 = vrot.slane %v2904_v27, 2  ;;  %v4300_v6 = vpop.f32.mrb[13].mxu0  ;;  %v4302_v8 = vpop.f32.mrb[13].mxu1 }
 0x217   : > { %v2873_v49 = vunpack.c.l.b16 %v3463_v62  ;;  %v2941_v24 = vsel %vm2940_vm15, %v2939_v39, %v4248_v37  ;;  %v2942_v4 = vrot.slane %v2871_v58, 3  ;;  %v2945_v5 = vrot.slane %v2872_v48, 2  ;;  %v4309_v14 = vpop.f32.mrb[14].mxu0  ;;  %v4311_v15 = vpop.f32.mrb[14].mxu1 }
 0x218   : > { %v3002_v10 = vsel %vm2943_vm0, %v3001_v0, %v3000_v52  ;;  %v3005_v2 = vrot.slane %v2905_v7, 1  ;;  %v1464_v36 = vcombine.high %v4283_v63, %v4283_v63  ;;  %v1471_v12 = vrot.slane %v4283_v63, %v4184_v9  ;;  %v4317_v25 = vpop.f32.mrb[15].mxu0  ;;  %v4319_v29 = vpop.f32.mrb[15].mxu1 }
 0x219   : > { %v2944_v37 = vsel %vm2943_vm0, %v2942_v4, %v2941_v24  ;;  %v2948_v18 = vrot.slane %v2873_v49, 1  ;;  %v3004_v20 = vsel %vm2946_vm1, %v3003_v38, %v3002_v10  ;;  %v1736_v21 = vcombine.high %v4286_v32, %v4286_v32 }
 0x21a   : > { %v2947_v63 = vsel %vm2946_vm1, %v2945_v5, %v2944_v37  ;;  %v3006_v40 = vsel %vm2949_vm2, %v3005_v2, %v3004_v20  ;;  %v1478_v41 = vrot.slane %v1464_v36, %v4184_v9  ;;  %v1479_v42 = vcombine.high %v1471_v12, %v1471_v12 }
 0x21b   : > { %v2950_v33 = vsel %vm2949_vm2, %v2948_v18, %v2947_v63  ;;  %v3053_v34 = vpack.c.b16 %v3006_v40, %v3006_v40  ;;  %v3284_v54 = vrot.slane %v1471_v12, 9  ;;  %v1743_v13 = vrot.slane %v4286_v32, %v4184_v9 }
 0x21c   : > { %v3049_v55 = vpack.c.b16 %v2950_v33, %v2950_v33  ;;  %v1480_v26 = vcombine.high %v1478_v41, %v1478_v41  ;;  %v3285_v59 = vrot.slane %v1479_v42, 9  ;;  %v3286_v53 = vrot.slane %v1478_v41, 9 }
 0x21d   : > { %3069 = vst [vmem:[%s4324_s23 + $0x10] sm:$0xf] %v3053_v34  ;;  %v2442_v30 = vmax.f32 %v1471_v12, %v3284_v54  ;;  %v1750_v56 = vrot.slane %v1736_v21, %v4184_v9  ;;  %v1751_v19 = vcombine.high %v1743_v13, %v1743_v13  ;;  %v3348_v31 = vrot.slane %v1743_v13, 9 }
 0x21e   : > { %3065 = vst [vmem:[%s4324_s23] sm:$0xf] %v3049_v55  ;;  %v3287_v51 = vrot.slane %v1480_v26, 9  ;;  %v2443_v27 = vmax.f32 %v1479_v42, %v3285_v59  ;;  %v2444_v17 = vmax.f32 %v1478_v41, %v3286_v53  ;;  %v1302_v62 = vmax.f32 %v4274_v11, 0.0 }
 0x21f   : > { %v1752_v58 = vcombine.high %v1750_v56, %v1750_v56  ;;  %v3349_v48 = vrot.slane %v1751_v19, 9  ;;  %v3350_v39 = vrot.slane %v1750_v56, 9  ;;  %v2506_v32 = vmax.f32 %v1743_v13, %v3348_v31 }
 0x220   : > { %v2445_v7 = vmax.f32 %v1480_v26, %v3287_v51  ;;  %v1430_v52 = vcombine.high %v1302_v62, %v1302_v62  ;;  %v1437_v0 = vrot.slane %v1302_v62, %v4184_v9  ;;  %v1318_v38 = vmax.f32 %v4278_v60, 0.0 }
 0x221   : > { %v3351_v49 = vrot.slane %v1752_v58, 9  ;;  %v2507_v24 = vmax.f32 %v1751_v19, %v3349_v48  ;;  %v2508_v4 = vmax.f32 %v1750_v56, %v3350_v39  ;;  %v1199_v5 = vadd.f32 %v4219_v44, %v4182_v47 }
 0x222   : > { %v1444_v10 = vrot.slane %v1430_v52, %v4184_v9  ;;  %v1445_v2 = vcombine.high %v1437_v0, %v1437_v0  ;;  %v3276_v11 = vrot.slane %v1437_v0, 9  ;;  %v1702_v36 = vcombine.high %v1318_v38, %v1318_v38 }
 0x223   : > { %v2509_v12 = vmax.f32 %v1752_v58, %v3351_v49  ;;  %v1709_v37 = vrot.slane %v1318_v38, %v4184_v9  ;;  %v1305_v18 = vmax.f32 %v1199_v5, 0.0  ;;  %v4344_v20 = vadd.f32 %v4217_v35, %v4182_v47 }
 0x224   : > { %v1446_v60 = vcombine.high %v1444_v10, %v1444_v10  ;;  %v3277_v21 = vrot.slane %v1445_v2, 9  ;;  %v3278_v63 = vrot.slane %v1444_v10, 9  ;;  %v2434_v40 = vmax.f32 %v1437_v0, %v3276_v11 }
 0x225   : > { %v1716_v41 = vrot.slane %v1702_v36, %v4184_v9  ;;  %v1717_v44 = vcombine.high %v1709_v37, %v1709_v37  ;;  %v3340_v42 = vrot.slane %v1709_v37, 9  ;;  %v1481_v33 = vcombine.high %v1305_v18, %v1305_v18 }
 0x226   : > { %v3279_v34 = vrot.slane %v1446_v60, 9  ;;  %v2435_v54 = vmax.f32 %v1445_v2, %v3277_v21  ;;  %v2436_v13 = vmax.f32 %v1444_v10, %v3278_v63  ;;  %v2554_v55 = vmax.f32 %v2434_v40, %v2442_v30 }
 0x227   : > { %v1718_v26 = vcombine.high %v1716_v41, %v1716_v41  ;;  %v3341_v59 = vrot.slane %v1717_v44, 9  ;;  %v3342_v53 = vrot.slane %v1716_v41, 9  ;;  %v2498_v56 = vmax.f32 %v1709_v37, %v3340_v42 }
 0x228   : > { %v2437_v19 = vmax.f32 %v1446_v60, %v3279_v34  ;;  %v2555_v35 = vmax.f32 %v2435_v54, %v2443_v27  ;;  %v2556_v31 = vmax.f32 %v2436_v13, %v2444_v17  ;;  %v3464_v51 = vpack.c.bf16 %v2554_v55, %v2554_v55 }
 0x229   : > { %v3343_v62 = vrot.slane %v1718_v26, 9  ;;  %v2499_v58 = vmax.f32 %v1717_v44, %v3341_v59  ;;  %v2500_v48 = vmax.f32 %v1716_v41, %v3342_v53  ;;  %v2586_v39 = vmax.f32 %v2498_v56, %v2506_v32 }
 0x22a   : > { %v2557_v52 = vmax.f32 %v2437_v19, %v2445_v7  ;;  %v3465_v0 = vpack.c.bf16 %v2555_v35, %v2555_v35  ;;  %v3466_v38 = vpack.c.bf16 %v2556_v31, %v2556_v31  ;;  %v2874_v49 = vunpack.c.l.b16 %v3464_v51 }
 0x22b   : > { %v2501_v5 = vmax.f32 %v1718_v26, %v3343_v62  ;;  %v2587_v2 = vmax.f32 %v2499_v58, %v2507_v24  ;;  %v2588_v10 = vmax.f32 %v2500_v48, %v2508_v4  ;;  %v3496_v30 = vpack.c.bf16 %v2586_v39, %v2586_v39 }
 0x22c   : > { %v3467_v11 = vpack.c.bf16 %v2557_v52, %v2557_v52  ;;  %v2875_v36 = vunpack.c.l.b16 %v3465_v0  ;;  %v2876_v21 = vunpack.c.l.b16 %v3466_v38  ;;  %v1488_v37 = vrot.slane %v1305_v18, %v4184_v9 }
 0x22d   : > { %v2589_v27 = vmax.f32 %v2501_v5, %v2509_v12  ;;  %v3497_v17 = vpack.c.bf16 %v2587_v2, %v2587_v2  ;;  %v3498_v60 = vpack.c.bf16 %v2588_v10, %v2588_v10  ;;  %v2906_v63 = vunpack.c.l.b16 %v3496_v30 }
 0x22e   : > { %v2877_v40 = vunpack.c.l.b16 %v3467_v11  ;;  %v2951_v41 = vrot.slane %v2875_v36, 7  ;;  %v2953_v32 = vrot.slane %v2876_v21, 6  ;;  %v1495_v7 = vrot.slane %v1481_v33, %v4184_v9 }
 0x22f   : > { %v3499_v44 = vpack.c.bf16 %v2589_v27, %v2589_v27  ;;  %v2907_v42 = vunpack.c.l.b16 %v3497_v17  ;;  %v2908_v34 = vunpack.c.l.b16 %v3498_v60  ;;  %v1496_v24 = vcombine.high %v1488_v37, %v1488_v37 }
 0x230   : > { %v2952_v4 = vsel %vm2931_vm12, %v2951_v41, %v2874_v49  ;;  %v2955_v54 = vrot.slane %v2877_v40, 5  ;;  %v1497_v13 = vcombine.high %v1495_v7, %v1495_v7  ;;  %v3288_v55 = vrot.slane %v1488_v37, 9 }
 0x231   : > { %v2954_v18 = vsel %vm2934_vm13, %v2953_v32, %v2952_v4  ;;  %v2909_v12 = vunpack.c.l.b16 %v3499_v44  ;;  %v3007_v26 = vrot.slane %v2907_v42, 7  ;;  %v3009_v59 = vrot.slane %v2908_v34, 6 }
 0x232   : > { %v3289_v53 = vrot.slane %v1496_v24, 9  ;;  %v3290_v56 = vrot.slane %v1495_v7, 9  ;;  %v3291_v19 = vrot.slane %v1497_v13, 9  ;;  %v2446_v35 = vmax.f32 %v1488_v37, %v3288_v55 }
 0x233   : > { %v3008_v33 = vsel %vm2931_vm12, %v3007_v26, %v2906_v63  ;;  %v3011_v31 = vrot.slane %v2909_v12, 5  ;;  %v1321_v51 = vmax.f32 %v4344_v20, 0.0  ;;  %v1191_v62 = vadd.f32 %v4182_v47, %v4223_v28 }
 0x234   : > { %v3010_v58 = vsel %vm2934_vm13, %v3009_v59, %v3008_v33  ;;  %v2447_v48 = vmax.f32 %v1496_v24, %v3289_v53  ;;  %v2448_v39 = vmax.f32 %v1495_v7, %v3290_v56  ;;  %v2449_v52 = vmax.f32 %v1497_v13, %v3291_v19 }
 0x235   : > { %v1753_v0 = vcombine.high %v1321_v51, %v1321_v51  ;;  %v1760_v38 = vrot.slane %v1321_v51, %v4184_v9  ;;  %v1303_v49 = vmax.f32 %v1191_v62, 0.0  ;;  %v4358_v5 = vsel %vm2937_vm14, %v2955_v54, %v2954_v18 }
 0x236   : > { %v1255_v2 = vadd.f32 %v4182_v47, %v4221_v23  ;;  %v4363_v20 = vsel %vm2937_vm14, %v3011_v31, %v3010_v58  ;;  %v1212_v28 = vadd.f32 %v4251_v45, %v4182_v47  ;;  %v1276_v10 = vadd.f32 %v4243_v43, %v4182_v47 }
 0x237   : > { %v1767_v30 = vrot.slane %v1753_v0, %v4184_v9  ;;  %v1768_v11 = vcombine.high %v1760_v38, %v1760_v38  ;;  %v3352_v36 = vrot.slane %v1760_v38, 9  ;;  %v1447_v21 = vcombine.high %v1303_v49, %v1303_v49 }
 0x238   : > { %v1454_v37 = vrot.slane %v1303_v49, %v4184_v9  ;;  %v1319_v27 = vmax.f32 %v1255_v2, 0.0  ;;  %v4371_v17 = vmax.f32 %v1212_v28, 0.0  ;;  %v4373_v23 = vmax.f32 %v1276_v10, 0.0 }
 0x239   : > { %v1769_v60 = vcombine.high %v1767_v30, %v1767_v30  ;;  %v3353_v63 = vrot.slane %v1768_v11, 9  ;;  %v3354_v40 = vrot.slane %v1767_v30, 9  ;;  %v2510_v41 = vmax.f32 %v1760_v38, %v3352_v36 }
 0x23a   : > { %v1461_v45 = vrot.slane %v1447_v21, %v4184_v9  ;;  %v1462_v32 = vcombine.high %v1454_v37, %v1454_v37  ;;  %v3280_v43 = vrot.slane %v1454_v37, 9  ;;  %v1719_v7 = vcombine.high %v1319_v27, %v1319_v27 }
 0x23b   : > { %v3355_v44 = vrot.slane %v1769_v60, 9  ;;  %v2511_v42 = vmax.f32 %v1768_v11, %v3353_v63  ;;  %v2512_v34 = vmax.f32 %v1767_v30, %v3354_v40  ;;  %v1726_v24 = vrot.slane %v1319_v27, %v4184_v9 }
 0x23c   : > { %v1463_v4 = vcombine.high %v1461_v45, %v1461_v45  ;;  %v3281_v54 = vrot.slane %v1462_v32, 9  ;;  %v3282_v13 = vrot.slane %v1461_v45, 9  ;;  %v2438_v55 = vmax.f32 %v1454_v37, %v3280_v43 }
 0x23d   : > { %v2513_v18 = vmax.f32 %v1769_v60, %v3355_v44  ;;  %v1733_v12 = vrot.slane %v1719_v7, %v4184_v9  ;;  %v1734_v26 = vcombine.high %v1726_v24, %v1726_v24  ;;  %v3344_v59 = vrot.slane %v1726_v24, 9 }
 0x23e   : > { %v3283_v53 = vrot.slane %v1463_v4, 9  ;;  %v2439_v56 = vmax.f32 %v1462_v32, %v3281_v54  ;;  %v2440_v19 = vmax.f32 %v1461_v45, %v3282_v13  ;;  %v2558_v33 = vmax.f32 %v2438_v55, %v2446_v35 }
 0x23f   : > { %v1735_v31 = vcombine.high %v1733_v12, %v1733_v12  ;;  %v3345_v51 = vrot.slane %v1734_v26, 9  ;;  %v3346_v62 = vrot.slane %v1733_v12, 9  ;;  %v2502_v58 = vmax.f32 %v1726_v24, %v3344_v59 }
 0x240   : > { %v2441_v0 = vmax.f32 %v1463_v4, %v3283_v53  ;;  %v2559_v38 = vmax.f32 %v2439_v56, %v2447_v48  ;;  %v2560_v49 = vmax.f32 %v2440_v19, %v2448_v39  ;;  %v3468_v2 = vpack.c.bf16 %v2558_v33, %v2558_v33 }
 0x241   : > { %v3347_v28 = vrot.slane %v1735_v31, 9  ;;  %v2503_v10 = vmax.f32 %v1734_v26, %v3345_v51  ;;  %v2504_v30 = vmax.f32 %v1733_v12, %v3346_v62  ;;  %v2590_v11 = vmax.f32 %v2502_v58, %v2510_v41 }
 0x242   : > { %v2561_v36 = vmax.f32 %v2441_v0, %v2449_v52  ;;  %v3469_v21 = vpack.c.bf16 %v2559_v38, %v2559_v38  ;;  %v3470_v37 = vpack.c.bf16 %v2560_v49, %v2560_v49  ;;  %v2878_v27 = vunpack.c.l.b16 %v3468_v2 }
 0x243   : > { %v2505_v60 = vmax.f32 %v1735_v31, %v3347_v28  ;;  %v2591_v63 = vmax.f32 %v2503_v10, %v2511_v42  ;;  %v2592_v40 = vmax.f32 %v2504_v30, %v2512_v34  ;;  %v3500_v35 = vpack.c.bf16 %v2590_v11, %v2590_v11 }
 0x244   : > { %v3471_v45 = vpack.c.bf16 %v2561_v36, %v2561_v36  ;;  %v2879_v32 = vunpack.c.l.b16 %v3469_v21  ;;  %v2880_v43 = vunpack.c.l.b16 %v3470_v37  ;;  %v2957_v7 = vrot.slane %v2878_v27, 4 }
 0x245   : > { %v2593_v44 = vmax.f32 %v2505_v60, %v2513_v18  ;;  %v3501_v48 = vpack.c.bf16 %v2591_v63, %v2591_v63  ;;  %v3502_v39 = vpack.c.bf16 %v2592_v40, %v2592_v40  ;;  %v2910_v24 = vunpack.c.l.b16 %v3500_v35 }
 0x246   : > { %v2881_v4 = vunpack.c.l.b16 %v3471_v45  ;;  %v2958_v41 = vsel %vm2940_vm15, %v2957_v7, %v4358_v5  ;;  %v2959_v52 = vrot.slane %v2879_v32, 3  ;;  %v2961_v54 = vrot.slane %v2880_v43, 2 }
 0x247   : > { %v3503_v13 = vpack.c.bf16 %v2593_v44, %v2593_v44  ;;  %v2911_v55 = vunpack.c.l.b16 %v3501_v48  ;;  %v2912_v12 = vunpack.c.l.b16 %v3502_v39  ;;  %v3013_v42 = vrot.slane %v2910_v24, 4 }
 0x248   : > { %v2960_v34 = vsel %vm2943_vm0, %v2959_v52, %v2958_v41  ;;  %v2963_v26 = vrot.slane %v2881_v4, 1  ;;  %v1532_v59 = vcombine.high %v4371_v17, %v4371_v17  ;;  %v1539_v18 = vrot.slane %v4371_v17, %v4184_v9 }
 0x249   : > { %v2962_v53 = vsel %vm2946_vm1, %v2961_v54, %v2960_v34  ;;  %v2913_v56 = vunpack.c.l.b16 %v3503_v13  ;;  %v3014_v5 = vsel %vm2940_vm15, %v3013_v42, %v4363_v20  ;;  %v3015_v19 = vrot.slane %v2911_v55, 3 }
 0x24a   : > { %v2964_v33 = vsel %vm2949_vm2, %v2963_v26, %v2962_v53  ;;  %v3017_v31 = vrot.slane %v2912_v12, 2  ;;  %v1546_v51 = vrot.slane %v1532_v59, %v4184_v9  ;;  %v1547_v62 = vcombine.high %v1539_v18, %v1539_v18 }
 0x24b   : > { %v3050_v58 = vpack.c.b16 %v2964_v33, %v2964_v33  ;;  %v3016_v0 = vsel %vm2943_vm0, %v3015_v19, %v3014_v5  ;;  %v3019_v38 = vrot.slane %v2913_v56, 1  ;;  %v3300_v49 = vrot.slane %v1539_v18, 9 }
 0x24c   : > { %v3018_v17 = vsel %vm2946_vm1, %v3017_v31, %v3016_v0  ;;  %v1548_v2 = vcombine.high %v1546_v51, %v1546_v51  ;;  %v3301_v28 = vrot.slane %v1547_v62, 9  ;;  %v3302_v10 = vrot.slane %v1546_v51, 9 }
 0x24d   : > { %3066 = vst [vmem:[%s4324_s23 + $0x4] sm:$0xf] %v3050_v58  ;;  %v3020_v20 = vsel %vm2949_vm2, %v3019_v38, %v3018_v17  ;;  %v2458_v30 = vmax.f32 %v1539_v18, %v3300_v49  ;;  %v1804_v11 = vcombine.high %v4373_v23, %v4373_v23  ;;  %v1811_v36 = vrot.slane %v4373_v23, %v4184_v9 }
 0x24e   : > { %v3054_v21 = vpack.c.b16 %v3020_v20, %v3020_v20  ;;  %v3303_v37 = vrot.slane %v1548_v2, 9  ;;  %v2459_v27 = vmax.f32 %v1547_v62, %v3301_v28  ;;  %v2460_v60 = vmax.f32 %v1546_v51, %v3302_v10 }
 0x24f   : > { %v1818_v63 = vrot.slane %v1804_v11, %v4184_v9  ;;  %v1819_v40 = vcombine.high %v1811_v36, %v1811_v36  ;;  %v3364_v35 = vrot.slane %v1811_v36, 9  ;;  %v1204_v45 = vadd.f32 %v4182_v47, %v4258_v22 }
 0x250   : > { %3070 = vst [vmem:[%s4324_s23 + $0x14] sm:$0xf] %v3054_v21  ;;  %v2461_v32 = vmax.f32 %v1548_v2, %v3303_v37  ;;  %v1268_v43 = vadd.f32 %v4182_v47, %v4253_v50  ;;  %v1215_v7 = vadd.f32 %v4267_v16, %v4182_v47  ;;  %v1279_v23 = vadd.f32 %v4260_v3, %v4182_v47 }
 0x251   : > { %v1820_v44 = vcombine.high %v1818_v63, %v1818_v63  ;;  %v3365_v48 = vrot.slane %v1819_v40, 9  ;;  %v3366_v39 = vrot.slane %v1818_v63, 9  ;;  %v2522_v24 = vmax.f32 %v1811_v36, %v3364_v35 }
 0x252   : > { %v1306_v4 = vmax.f32 %v1204_v45, 0.0  ;;  %v1322_v41 = vmax.f32 %v1268_v43, 0.0  ;;  %v1309_v52 = vmax.f32 %v1215_v7, 0.0  ;;  %v4408_v54 = vmax.f32 %v1279_v23, 0.0 }
 0x253   : > { %v3367_v22 = vrot.slane %v1820_v44, 9  ;;  %v2523_v13 = vmax.f32 %v1819_v40, %v3365_v48  ;;  %v2524_v55 = vmax.f32 %v1818_v63, %v3366_v39  ;;  %v4412_v50 = vadd.f32 %v4182_v47, %v4280_v61 }
 0x254   : > { %v1498_v16 = vcombine.high %v1306_v4, %v1306_v4  ;;  %v1505_v12 = vrot.slane %v1306_v4, %v4184_v9  ;;  %v1770_v3 = vcombine.high %v1322_v41, %v1322_v41  ;;  %v1777_v42 = vrot.slane %v1322_v41, %v4184_v9 }
 0x255   : > { %v2525_v34 = vmax.f32 %v1820_v44, %v3367_v22  ;;  %v1549_v26 = vcombine.high %v1309_v52, %v1309_v52  ;;  %v1556_v59 = vrot.slane %v1309_v52, %v4184_v9  ;;  %v1821_v18 = vcombine.high %v4408_v54, %v4408_v54 }
 0x256   : > { %v1512_v53 = vrot.slane %v1498_v16, %v4184_v9  ;;  %v1513_v56 = vcombine.high %v1505_v12, %v1505_v12  ;;  %v3292_v5 = vrot.slane %v1505_v12, 9  ;;  %v1784_v47 = vrot.slane %v1770_v3, %v4184_v9 }
 0x257   : > { %v1785_v61 = vcombine.high %v1777_v42, %v1777_v42  ;;  %v3356_v19 = vrot.slane %v1777_v42, 9  ;;  %v1563_v33 = vrot.slane %v1549_v26, %v4184_v9  ;;  %v1564_v31 = vcombine.high %v1556_v59, %v1556_v59 }
 0x258   : > { %v1514_v51 = vcombine.high %v1512_v53, %v1512_v53  ;;  %v3293_v62 = vrot.slane %v1513_v56, 9  ;;  %v3294_v58 = vrot.slane %v1512_v53, 9  ;;  %v2450_v0 = vmax.f32 %v1505_v12, %v3292_v5 }
 0x259   : > { %v1786_v38 = vcombine.high %v1784_v47, %v1784_v47  ;;  %v3357_v49 = vrot.slane %v1785_v61, 9  ;;  %v3358_v17 = vrot.slane %v1784_v47, 9  ;;  %v2514_v2 = vmax.f32 %v1777_v42, %v3356_v19 }
 0x25a   : > { %v3295_v28 = vrot.slane %v1514_v51, 9  ;;  %v2451_v10 = vmax.f32 %v1513_v56, %v3293_v62  ;;  %v2452_v20 = vmax.f32 %v1512_v53, %v3294_v58  ;;  %v2562_v11 = vmax.f32 %v2450_v0, %v2458_v30 }
 0x25b   : > { %v3359_v36 = vrot.slane %v1786_v38, 9  ;;  %v2515_v21 = vmax.f32 %v1785_v61, %v3357_v49  ;;  %v2516_v37 = vmax.f32 %v1784_v47, %v3358_v17  ;;  %v2594_v63 = vmax.f32 %v2514_v2, %v2522_v24 }
 0x25c   : > { %v2453_v40 = vmax.f32 %v1514_v51, %v3295_v28  ;;  %v2563_v35 = vmax.f32 %v2451_v10, %v2459_v27  ;;  %v2564_v45 = vmax.f32 %v2452_v20, %v2460_v60  ;;  %v3472_v43 = vpack.c.bf16 %v2562_v11, %v2562_v11 }
 0x25d   : > { %v2517_v7 = vmax.f32 %v1786_v38, %v3359_v36  ;;  %v2595_v23 = vmax.f32 %v2515_v21, %v2523_v13  ;;  %v2596_v44 = vmax.f32 %v2516_v37, %v2524_v55  ;;  %v3504_v48 = vpack.c.bf16 %v2594_v63, %v2594_v63 }
 0x25e   : > { %v2565_v39 = vmax.f32 %v2453_v40, %v2461_v32  ;;  %v3473_v4 = vpack.c.bf16 %v2563_v35, %v2563_v35  ;;  %v3474_v41 = vpack.c.bf16 %v2564_v45, %v2564_v45  ;;  %v2882_v52 = vunpack.c.l.b16 %v3472_v43 }
 0x25f   : > { %v2597_v22 = vmax.f32 %v2517_v7, %v2525_v34  ;;  %v3505_v16 = vpack.c.bf16 %v2595_v23, %v2595_v23  ;;  %v3506_v12 = vpack.c.bf16 %v2596_v44, %v2596_v44  ;;  %v2914_v30 = vunpack.c.l.b16 %v3504_v48 }
 0x260   : > { %v3475_v3 = vpack.c.bf16 %v2565_v39, %v2565_v39  ;;  %v2883_v42 = vunpack.c.l.b16 %v3473_v4  ;;  %v2884_v26 = vunpack.c.l.b16 %v3474_v41  ;;  %v1565_v24 = vcombine.high %v1563_v33, %v1563_v33 }
 0x261   : > { %v3507_v53 = vpack.c.bf16 %v2597_v22, %v2597_v22  ;;  %v2915_v27 = vunpack.c.l.b16 %v3505_v16  ;;  %v2916_v60 = vunpack.c.l.b16 %v3506_v12  ;;  %v3304_v56 = vrot.slane %v1556_v59, 9 }
 0x262   : > { %v2885_v5 = vunpack.c.l.b16 %v3475_v3  ;;  %v2965_v13 = vrot.slane %v2883_v42, 7  ;;  %v2967_v55 = vrot.slane %v2884_v26, 6  ;;  %v3305_v47 = vrot.slane %v1564_v31, 9 }
 0x263   : > { %v2917_v32 = vunpack.c.l.b16 %v3507_v53  ;;  %v3021_v61 = vrot.slane %v2915_v27, 7  ;;  %v3023_v19 = vrot.slane %v2916_v60, 6  ;;  %v3306_v51 = vrot.slane %v1563_v33, 9 }
 0x264   : > { %v2966_v34 = vsel %vm2931_vm12, %v2965_v13, %v2882_v52  ;;  %v2969_v62 = vrot.slane %v2885_v5, 5  ;;  %v3307_v58 = vrot.slane %v1565_v24, 9  ;;  %v2462_v0 = vmax.f32 %v1556_v59, %v3304_v56 }
 0x265   : > { %v2968_v38 = vsel %vm2934_vm13, %v2967_v55, %v2966_v34  ;;  %v3022_v49 = vsel %vm2931_vm12, %v3021_v61, %v2914_v30  ;;  %v3025_v17 = vrot.slane %v2917_v32, 5  ;;  %v2463_v2 = vmax.f32 %v1564_v31, %v3305_v47  ;;  %v4439_v31 = vld [vmem:[%s4548_s6] ss:$0 sm:$0xff] }
 0x266   : > { %v3024_v28 = vsel %vm2934_vm13, %v3023_v19, %v3022_v49  ;;  %v2464_v10 = vmax.f32 %v1563_v33, %v3306_v51  ;;  %v2465_v20 = vmax.f32 %v1565_v24, %v3307_v58  ;;  %v1828_v11 = vrot.slane %v4408_v54, %v4184_v9 }
 0x267   : > { %v1835_v36 = vrot.slane %v1821_v18, %v4184_v9  ;;  %v1307_v59 = vmax.f32 %v4412_v50, 0.0  ;;  %v4434_v21 = vsel %vm2937_vm14, %v2969_v62, %v2968_v38  ;;  %v1271_v33 = vadd.f32 %v4439_v31, %v4269_v57 }
 0x268   : > { %v1836_v37 = vcombine.high %v1828_v11, %v1828_v11  ;;  %v3368_v63 = vrot.slane %v1828_v11, 9  ;;  %v4444_v40 = vsel %vm2937_vm14, %v3025_v17, %v3024_v28  ;;  %v1228_v54 = vadd.f32 %v4439_v31, %v4293_v1 }
 0x269   : > { %v1837_v50 = vcombine.high %v1835_v36, %v1835_v36  ;;  %v3370_v18 = vrot.slane %v1835_v36, 9  ;;  %v1515_v35 = vcombine.high %v1307_v59, %v1307_v59  ;;  %v1522_v45 = vrot.slane %v1307_v59, %v4184_v9 }
 0x26a   : > { %v3369_v43 = vrot.slane %v1836_v37, 9  ;;  %v2526_v7 = vmax.f32 %v1828_v11, %v3368_v63  ;;  %v1323_v23 = vmax.f32 %v1271_v33, 0.0  ;;  %v4449_v44 = vmax.f32 %v1228_v54, 0.0 }
 0x26b   : > { %v3371_v48 = vrot.slane %v1837_v50, 9  ;;  %v2528_v57 = vmax.f32 %v1835_v36, %v3370_v18  ;;  %v1529_v39 = vrot.slane %v1515_v35, %v4184_v9  ;;  %v1530_v4 = vcombine.high %v1522_v45, %v1522_v45 }
 0x26c   : > { %v2527_v41 = vmax.f32 %v1836_v37, %v3369_v43  ;;  %v3296_v52 = vrot.slane %v1522_v45, 9  ;;  %v1787_v22 = vcombine.high %v1323_v23, %v1323_v23  ;;  %v1794_v1 = vrot.slane %v1323_v23, %v4184_v9 }
 0x26d   : > { %v2529_v16 = vmax.f32 %v1837_v50, %v3371_v48  ;;  %v1531_v12 = vcombine.high %v1529_v39, %v1529_v39  ;;  %v3297_v30 = vrot.slane %v1530_v4, 9  ;;  %v3298_v3 = vrot.slane %v1529_v39, 9 }
 0x26e   : > { %v2454_v42 = vmax.f32 %v1522_v45, %v3296_v52  ;;  %v1801_v26 = vrot.slane %v1787_v22, %v4184_v9  ;;  %v1802_v24 = vcombine.high %v1794_v1, %v1794_v1  ;;  %v3360_v53 = vrot.slane %v1794_v1, 9 }
 0x26f   : > { %v3299_v27 = vrot.slane %v1531_v12, 9  ;;  %v2455_v60 = vmax.f32 %v1530_v4, %v3297_v30  ;;  %v2456_v56 = vmax.f32 %v1529_v39, %v3298_v3  ;;  %v1600_v5 = vcombine.high %v4449_v44, %v4449_v44 }
 0x270   : > { %v2566_v13 = vmax.f32 %v2454_v42, %v2462_v0  ;;  %v1803_v55 = vcombine.high %v1801_v26, %v1801_v26  ;;  %v3361_v47 = vrot.slane %v1802_v24, 9  ;;  %v3362_v32 = vrot.slane %v1801_v26, 9 }
 0x271   : > { %v2457_v61 = vmax.f32 %v1531_v12, %v3299_v27  ;;  %v2567_v19 = vmax.f32 %v2455_v60, %v2463_v2  ;;  %v2568_v51 = vmax.f32 %v2456_v56, %v2464_v10  ;;  %v2518_v34 = vmax.f32 %v1794_v1, %v3360_v53 }
 0x272   : > { %v3476_v62 = vpack.c.bf16 %v2566_v13, %v2566_v13  ;;  %v3363_v58 = vrot.slane %v1803_v55, 9  ;;  %v2519_v38 = vmax.f32 %v1802_v24, %v3361_v47  ;;  %v2520_v49 = vmax.f32 %v1801_v26, %v3362_v32 }
 0x273   : > { %v2569_v17 = vmax.f32 %v2457_v61, %v2465_v20  ;;  %v3477_v28 = vpack.c.bf16 %v2567_v19, %v2567_v19  ;;  %v3478_v11 = vpack.c.bf16 %v2568_v51, %v2568_v51  ;;  %v2598_v36 = vmax.f32 %v2518_v34, %v2526_v7 }
 0x274   : > { %v2886_v59 = vunpack.c.l.b16 %v3476_v62  ;;  %v2521_v33 = vmax.f32 %v1803_v55, %v3363_v58  ;;  %v2599_v37 = vmax.f32 %v2519_v38, %v2527_v41  ;;  %v2600_v63 = vmax.f32 %v2520_v49, %v2528_v57 }
 0x275   : > { %v3479_v0 = vpack.c.bf16 %v2569_v17, %v2569_v17  ;;  %v2887_v54 = vunpack.c.l.b16 %v3477_v28  ;;  %v2888_v50 = vunpack.c.l.b16 %v3478_v11  ;;  %v3508_v18 = vpack.c.bf16 %v2598_v36, %v2598_v36 }
 0x276   : > { %v2971_v35 = vrot.slane %v2886_v59, 4  ;;  %v2601_v2 = vmax.f32 %v2521_v33, %v2529_v16  ;;  %v3509_v10 = vpack.c.bf16 %v2599_v37, %v2599_v37  ;;  %v3510_v45 = vpack.c.bf16 %v2600_v63, %v2600_v63 }
 0x277   : > { %v2889_v43 = vunpack.c.l.b16 %v3479_v0  ;;  %v2973_v23 = vrot.slane %v2887_v54, 3  ;;  %v2975_v48 = vrot.slane %v2888_v50, 2  ;;  %v2918_v39 = vunpack.c.l.b16 %v3508_v18 }
 0x278   : > { %v2972_v20 = vsel %vm2940_vm15, %v2971_v35, %v4434_v21  ;;  %v3511_v7 = vpack.c.bf16 %v2601_v2, %v2601_v2  ;;  %v2919_v4 = vunpack.c.l.b16 %v3509_v10  ;;  %v2920_v52 = vunpack.c.l.b16 %v3510_v45 }
 0x279   : > { %v2974_v57 = vsel %vm2943_vm0, %v2973_v23, %v2972_v20  ;;  %v2977_v41 = vrot.slane %v2889_v43, 1  ;;  %v3027_v22 = vrot.slane %v2918_v39, 4  ;;  %v1607_v1 = vrot.slane %v4449_v44, %v4184_v9 }
 0x27a   : > { %v2976_v16 = vsel %vm2946_vm1, %v2975_v48, %v2974_v57  ;;  %v2921_v12 = vunpack.c.l.b16 %v3511_v7  ;;  %v3029_v30 = vrot.slane %v2919_v4, 3  ;;  %v3031_v3 = vrot.slane %v2920_v52, 2 }
 0x27b   : > { %v2978_v42 = vsel %vm2949_vm2, %v2977_v41, %v2976_v16  ;;  %v3028_v21 = vsel %vm2940_vm15, %v3027_v22, %v4444_v40  ;;  %v1614_v26 = vrot.slane %v1600_v5, %v4184_v9  ;;  %v1615_v24 = vcombine.high %v1607_v1, %v1607_v1 }
 0x27c   : > { %v3051_v53 = vpack.c.b16 %v2978_v42, %v2978_v42  ;;  %v3030_v27 = vsel %vm2943_vm0, %v3029_v30, %v3028_v21  ;;  %v3033_v60 = vrot.slane %v2921_v12, 1  ;;  %v3316_v56 = vrot.slane %v1607_v1, 9 }
 0x27d   : > { %v3032_v44 = vsel %vm2946_vm1, %v3031_v3, %v3030_v27  ;;  %v1616_v13 = vcombine.high %v1614_v26, %v1614_v26  ;;  %v3317_v55 = vrot.slane %v1615_v24, 9  ;;  %v3318_v47 = vrot.slane %v1614_v26, 9 }
 0x27e   : > { %3067 = vst [vmem:[%s4324_s23 + $0x8] sm:$0xf] %v3051_v53  ;;  %v3034_v32 = vsel %vm2949_vm2, %v3033_v60, %v3032_v44  ;;  %v2474_v61 = vmax.f32 %v1607_v1, %v3316_v56  ;;  %v1292_v40 = vadd.f32 %v4439_v31, %v4295_v46  ;;  %v1220_v5 = vadd.f32 %v4439_v31, %v4300_v6 }
 0x27f   : > { %v3055_v19 = vpack.c.b16 %v3034_v32, %v3034_v32  ;;  %v3319_v51 = vrot.slane %v1616_v13, 9  ;;  %v2475_v34 = vmax.f32 %v1615_v24, %v3317_v55  ;;  %v2476_v62 = vmax.f32 %v1614_v26, %v3318_v47 }
 0x280   : > { %v1328_v58 = vmax.f32 %v1292_v40, 0.0  ;;  %v1310_v38 = vmax.f32 %v1220_v5, 0.0  ;;  %v1284_v49 = vadd.f32 %v4439_v31, %v4302_v8  ;;  %v1231_v17 = vadd.f32 %v4439_v31, %v4309_v14 }
 0x281   : > { %3071 = vst [vmem:[%s4324_s23 + $0x18] sm:$0xf] %v3055_v19  ;;  %v2477_v28 = vmax.f32 %v1616_v13, %v3319_v51  ;;  %v1295_v46 = vadd.f32 %v4439_v31, %v4311_v15  ;;  %v1223_v6 = vadd.f32 %v4439_v31, %v4317_v25  ;;  %v4485_v11 = vadd.f32 %v4439_v31, %v4319_v29 }
 0x282   : > { %v1872_v36 = vcombine.high %v1328_v58, %v1328_v58  ;;  %v1879_v59 = vrot.slane %v1328_v58, %v4184_v9  ;;  %v1566_v33 = vcombine.high %v1310_v38, %v1310_v38  ;;  %v1573_v8 = vrot.slane %v1310_v38, %v4184_v9 }
 0x283   : > { %v1326_v37 = vmax.f32 %v1284_v49, 0.0  ;;  %v4489_v14 = vmax.f32 %v1231_v17, 0.0  ;;  %v4491_v63 = vmax.f32 %v1295_v46, 0.0  ;;  %v4493_v0 = vmax.f32 %v1223_v6, 0.0 }
 0x284   : > { %v1886_v15 = vrot.slane %v1872_v36, %v4184_v9  ;;  %v1887_v25 = vcombine.high %v1879_v59, %v1879_v59  ;;  %v3380_v54 = vrot.slane %v1879_v59, 9  ;;  %v1580_v29 = vrot.slane %v1566_v33, %v4184_v9 }
 0x285   : > { %v1581_v31 = vcombine.high %v1573_v8, %v1573_v8  ;;  %v3308_v50 = vrot.slane %v1573_v8, 9  ;;  %v1838_v18 = vcombine.high %v1326_v37, %v1326_v37  ;;  %v1845_v35 = vrot.slane %v1326_v37, %v4184_v9 }
 0x286   : > { %v1888_v2 = vcombine.high %v1886_v15, %v1886_v15  ;;  %v3381_v10 = vrot.slane %v1887_v25, 9  ;;  %v3382_v45 = vrot.slane %v1886_v15, 9  ;;  %v2538_v43 = vmax.f32 %v1879_v59, %v3380_v54 }
 0x287   : > { %v1582_v23 = vcombine.high %v1580_v29, %v1580_v29  ;;  %v3309_v48 = vrot.slane %v1581_v31, 9  ;;  %v3310_v39 = vrot.slane %v1580_v29, 9  ;;  %v2466_v20 = vmax.f32 %v1573_v8, %v3308_v50 }
 0x288   : > { %v3383_v7 = vrot.slane %v1888_v2, 9  ;;  %v2539_v4 = vmax.f32 %v1887_v25, %v3381_v10  ;;  %v2540_v52 = vmax.f32 %v1886_v15, %v3382_v45  ;;  %v1852_v57 = vrot.slane %v1838_v18, %v4184_v9 }
 0x289   : > { %v3311_v41 = vrot.slane %v1582_v23, 9  ;;  %v2467_v22 = vmax.f32 %v1581_v31, %v3309_v48  ;;  %v2468_v1 = vmax.f32 %v1580_v29, %v3310_v39  ;;  %v2570_v16 = vmax.f32 %v2466_v20, %v2474_v61 }
 0x28a   : > { %v2541_v12 = vmax.f32 %v1888_v2, %v3383_v7  ;;  %v1853_v30 = vcombine.high %v1845_v35, %v1845_v35  ;;  %v1854_v3 = vcombine.high %v1852_v57, %v1852_v57  ;;  %v3372_v42 = vrot.slane %v1845_v35, 9 }
 0x28b   : > { %v2469_v21 = vmax.f32 %v1582_v23, %v3311_v41  ;;  %v2571_v26 = vmax.f32 %v2467_v22, %v2475_v34  ;;  %v2572_v24 = vmax.f32 %v2468_v1, %v2476_v62  ;;  %v3480_v53 = vpack.c.bf16 %v2570_v16, %v2570_v16 }
 0x28c   : > { %v3373_v27 = vrot.slane %v1853_v30, 9  ;;  %v3374_v60 = vrot.slane %v1852_v57, 9  ;;  %v3375_v56 = vrot.slane %v1854_v3, 9  ;;  %v2530_v44 = vmax.f32 %v1845_v35, %v3372_v42 }
 0x28d   : > { %v2573_v13 = vmax.f32 %v2469_v21, %v2477_v28  ;;  %v3481_v55 = vpack.c.bf16 %v2571_v26, %v2571_v26  ;;  %v3482_v47 = vpack.c.bf16 %v2572_v24, %v2572_v24  ;;  %v2890_v32 = vunpack.c.l.b16 %v3480_v53 }
 0x28e   : > { %v2531_v40 = vmax.f32 %v1853_v30, %v3373_v27  ;;  %v2532_v5 = vmax.f32 %v1852_v57, %v3374_v60  ;;  %v2533_v19 = vmax.f32 %v1854_v3, %v3375_v56  ;;  %v2602_v61 = vmax.f32 %v2530_v44, %v2538_v43 }
 0x28f   : > { %v3483_v51 = vpack.c.bf16 %v2573_v13, %v2573_v13  ;;  %v2891_v58 = vunpack.c.l.b16 %v3481_v55  ;;  %v2892_v38 = vunpack.c.l.b16 %v3482_v47  ;;  %v1617_v34 = vcombine.high %v4489_v14, %v4489_v14 }
 0x290   : > { %v2603_v62 = vmax.f32 %v2531_v40, %v2539_v4  ;;  %v2604_v49 = vmax.f32 %v2532_v5, %v2540_v52  ;;  %v2605_v17 = vmax.f32 %v2533_v19, %v2541_v12  ;;  %v3512_v46 = vpack.c.bf16 %v2602_v61, %v2602_v61 }
 0x291   : > { %v2893_v6 = vunpack.c.l.b16 %v3483_v51  ;;  %v2979_v36 = vrot.slane %v2891_v58, 7  ;;  %v2981_v28 = vrot.slane %v2892_v38, 6  ;;  %v1624_v59 = vrot.slane %v4489_v14, %v4184_v9 }
 0x292   : > { %v3513_v33 = vpack.c.bf16 %v2603_v62, %v2603_v62  ;;  %v3514_v8 = vpack.c.bf16 %v2604_v49, %v2604_v49  ;;  %v3515_v37 = vpack.c.bf16 %v2605_v17, %v2605_v17  ;;  %v2922_v15 = vunpack.c.l.b16 %v3512_v46 }
 0x293   : > { %v2980_v25 = vsel %vm2931_vm12, %v2979_v36, %v2890_v32  ;;  %v2983_v54 = vrot.slane %v2893_v6, 5  ;;  %v1631_v29 = vrot.slane %v1617_v34, %v4184_v9  ;;  %v1632_v31 = vcombine.high %v1624_v59, %v1624_v59 }
 0x294   : > { %v2982_v50 = vsel %vm2934_vm13, %v2981_v28, %v2980_v25  ;;  %v2923_v18 = vunpack.c.l.b16 %v3513_v33  ;;  %v2924_v35 = vunpack.c.l.b16 %v3514_v8  ;;  %v2925_v2 = vunpack.c.l.b16 %v3515_v37 }
 0x295   : > { %v1633_v10 = vcombine.high %v1631_v29, %v1631_v29  ;;  %v3320_v45 = vrot.slane %v1624_v59, 9  ;;  %v3321_v43 = vrot.slane %v1632_v31, 9  ;;  %v3322_v23 = vrot.slane %v1631_v29, 9 }
 0x296   : > { %v3035_v14 = vrot.slane %v2923_v18, 7  ;;  %v3037_v48 = vrot.slane %v2924_v35, 6  ;;  %v3039_v39 = vrot.slane %v2925_v2, 5  ;;  %v1889_v20 = vcombine.high %v4491_v63, %v4491_v63 }
 0x297   : > { %v3323_v7 = vrot.slane %v1633_v10, 9  ;;  %v2478_v4 = vmax.f32 %v1624_v59, %v3320_v45  ;;  %v2479_v52 = vmax.f32 %v1632_v31, %v3321_v43  ;;  %v2480_v57 = vmax.f32 %v1631_v29, %v3322_v23 }
 0x298   : > { %v3036_v41 = vsel %vm2931_vm12, %v3035_v14, %v2922_v15  ;;  %v1896_v22 = vrot.slane %v4491_v63, %v4184_v9  ;;  %v1903_v1 = vrot.slane %v1889_v20, %v4184_v9  ;;  %v1583_v16 = vcombine.high %v4493_v0, %v4493_v0 }
 0x299   : > { %v3038_v12 = vsel %vm2934_vm13, %v3037_v48, %v3036_v41  ;;  %v2481_v30 = vmax.f32 %v1633_v10, %v3323_v7  ;;  %v1590_v3 = vrot.slane %v4493_v0, %v4184_v9  ;;  %v2984_v42 = vsel %vm2937_vm14, %v2983_v54, %v2982_v50 }
 0x29a   : > { %v1904_v21 = vcombine.high %v1896_v22, %v1896_v22  ;;  %v1905_v26 = vcombine.high %v1903_v1, %v1903_v1  ;;  %v3384_v24 = vrot.slane %v1896_v22, 9  ;;  %v3386_v53 = vrot.slane %v1903_v1, 9 }
 0x29b   : > { %v1597_v27 = vrot.slane %v1583_v16, %v4184_v9  ;;  %v1598_v63 = vcombine.high %v1590_v3, %v1590_v3  ;;  %v3312_v60 = vrot.slane %v1590_v3, 9  ;;  %v1327_v56 = vmax.f32 %v4485_v11, 0.0 }
 0x29c   : > { %v3385_v44 = vrot.slane %v1904_v21, 9  ;;  %v3387_v13 = vrot.slane %v1905_v26, 9  ;;  %v2542_v55 = vmax.f32 %v1896_v22, %v3384_v24  ;;  %v2544_v47 = vmax.f32 %v1903_v1, %v3386_v53 }
 0x29d   : > { %v1599_v32 = vcombine.high %v1597_v27, %v1597_v27  ;;  %v3313_v40 = vrot.slane %v1598_v63, 9  ;;  %v3314_v5 = vrot.slane %v1597_v27, 9  ;;  %v2470_v0 = vmax.f32 %v1590_v3, %v3312_v60 }
 0x29e   : > { %v2543_v19 = vmax.f32 %v1904_v21, %v3385_v44  ;;  %v2545_v61 = vmax.f32 %v1905_v26, %v3387_v13  ;;  %v1855_v51 = vcombine.high %v1327_v56, %v1327_v56  ;;  %v1862_v58 = vrot.slane %v1327_v56, %v4184_v9 }
 0x29f   : > { %v3315_v38 = vrot.slane %v1599_v32, 9  ;;  %v2471_v34 = vmax.f32 %v1598_v63, %v3313_v40  ;;  %v2472_v62 = vmax.f32 %v1597_v27, %v3314_v5  ;;  %v2574_v49 = vmax.f32 %v2470_v0, %v2478_v4 }
 0x2a0   : > { %v1869_v17 = vrot.slane %v1855_v51, %v4184_v9  ;;  %v1870_v11 = vcombine.high %v1862_v58, %v1862_v58  ;;  %v3376_v46 = vrot.slane %v1862_v58, 9  ;;  %v3040_v6 = vsel %vm2937_vm14, %v3039_v39, %v3038_v12 }
 0x2a1   : > { %v2473_v36 = vmax.f32 %v1599_v32, %v3315_v38  ;;  %v2575_v28 = vmax.f32 %v2471_v34, %v2479_v52  ;;  %v2576_v59 = vmax.f32 %v2472_v62, %v2480_v57  ;;  %v3484_v33 = vpack.c.bf16 %v2574_v49, %v2574_v49 }
 0x2a2   : > { %v1871_v8 = vcombine.high %v1869_v17, %v1869_v17  ;;  %v3377_v37 = vrot.slane %v1870_v11, 9  ;;  %v3378_v15 = vrot.slane %v1869_v17, 9  ;;  %v2534_v25 = vmax.f32 %v1862_v58, %v3376_v46 }
 0x2a3   : > { %v2577_v54 = vmax.f32 %v2473_v36, %v2481_v30  ;;  %v3485_v29 = vpack.c.bf16 %v2575_v28, %v2575_v28  ;;  %v3486_v31 = vpack.c.bf16 %v2576_v59, %v2576_v59  ;;  %v2894_v50 = vunpack.c.l.b16 %v3484_v33 }
 0x2a4   : > { %v3379_v18 = vrot.slane %v1871_v8, 9  ;;  %v2535_v35 = vmax.f32 %v1870_v11, %v3377_v37  ;;  %v2536_v2 = vmax.f32 %v1869_v17, %v3378_v15  ;;  %v2606_v9 = vmax.f32 %v2534_v25, %v2542_v55 }
 0x2a5   : > { %v3487_v10 = vpack.c.bf16 %v2577_v54, %v2577_v54  ;;  %v2895_v45 = vunpack.c.l.b16 %v3485_v29  ;;  %v2896_v43 = vunpack.c.l.b16 %v3486_v31  ;;  %v2985_v23 = vrot.slane %v2894_v50, 4 }
 0x2a6   : > { %v2537_v14 = vmax.f32 %v1871_v8, %v3379_v18  ;;  %v2607_v48 = vmax.f32 %v2535_v35, %v2543_v19  ;;  %v2608_v39 = vmax.f32 %v2536_v2, %v2544_v47  ;;  %v3516_v20 = vpack.c.bf16 %v2606_v9, %v2606_v9 }
 0x2a7   : > { %v2897_v7 = vunpack.c.l.b16 %v3487_v10  ;;  %v2986_v4 = vsel %vm2940_vm15, %v2985_v23, %v2984_v42  ;;  %v2987_v52 = vrot.slane %v2895_v45, 3  ;;  %v2989_v57 = vrot.slane %v2896_v43, 2 }
 0x2a8   : > { %v2609_v41 = vmax.f32 %v2537_v14, %v2545_v61  ;;  %v3517_v22 = vpack.c.bf16 %v2607_v48, %v2607_v48  ;;  %v3518_v1 = vpack.c.bf16 %v2608_v39, %v2608_v39  ;;  %v2926_v16 = vunpack.c.l.b16 %v3516_v20 }
 0x2a9   : > { %v2988_v12 = vsel %vm2943_vm0, %v2987_v52, %v2986_v4  ;;  %v2991_v30 = vrot.slane %v2897_v7, 1 }
 0x2aa   : > { %v2990_v3 = vsel %vm2946_vm1, %v2989_v57, %v2988_v12  ;;  %v3519_v21 = vpack.c.bf16 %v2609_v41, %v2609_v41  ;;  %v2927_v26 = vunpack.c.l.b16 %v3517_v22  ;;  %v2928_v24 = vunpack.c.l.b16 %v3518_v1 }
 0x2ab   : > { %v2992_v53 = vsel %vm2949_vm2, %v2991_v30, %v2990_v3  ;;  %v3041_v27 = vrot.slane %v2926_v16, 4 }
 0x2ac   : > { %v3052_v42 = vpack.c.b16 %v2992_v53, %v2992_v53  ;;  %v2929_v63 = vunpack.c.l.b16 %v3519_v21  ;;  %v3043_v60 = vrot.slane %v2927_v26, 3  ;;  %v3045_v44 = vrot.slane %v2928_v24, 2 }
 0x2ad   : > { %v3042_v56 = vsel %vm2940_vm15, %v3041_v27, %v3040_v6 }
 0x2ae   : > { %3068 = vst [vmem:[%s4324_s23 + $0xc] sm:$0xf] %v3052_v42  ;;  %v3044_v13 = vsel %vm2943_vm0, %v3043_v60, %v3042_v56  ;;  %v3047_v55 = vrot.slane %v2929_v63, 1 }
 0x2af   : > { %v3046_v47 = vsel %vm2946_vm1, %v3045_v44, %v3044_v13 }
 0x2b0   : > { %v3048_v32 = vsel %vm2949_vm2, %v3047_v55, %v3046_v47 }
 0x2b1   : > { %v3056_v40 = vpack.c.b16 %v3048_v32, %v3048_v32 }
 0x2b3   : > { %3072 = vst [vmem:[%s4324_s23 + $0x1c] sm:$0xf] %v3056_v40 }
 0x2b4 PF: > { %s19_s24 = sadd.s32 1, %s3674_s24   ;;  %s4554_s23 = smov %s3670_s1 }
 0x2b5   : > { %p16_p5 = scmp.ge.s32.totalorder %s19_s24, 4   ;;  %s4555_s1 = smov %s4557_s3 }
 0x2b7   :  { %18 = sbr.rel (!%p16_p5) target bundleno = 2 (0x2), region = 76 }

// kernel: classifier_forward.3
= control target key start
LH: loop header
LB: loop body
LE: loop exit
PB: predicated region body
PF: predicated region fallthrough
CT: control target
= control target key end

     0   :  { %s3086_s28 = smov 0   ;;  %s3088_s3 = smov 0   ;;  %s3653_s0 = inlined_call_operand.<no memory space> [shape: s32[1], index: 0, kind: input, shape index: {}]   ;;  %s3654_s1 = inlined_call_operand.<no memory space> [shape: s32[1], index: 1, kind: input, shape index: {}]   ;;  %s3655_s2 = inlined_call_operand.vmem [shape: bf16[2,8,8,128], index: 2, kind: input, shape index: {}, may-alias: {2,3,4}]   ;;  %s3656_s3 = inlined_call_operand.vmem [shape: bf16[2,8,8,128], index: 3, kind: input, shape index: {}, may-alias: {2,3,4}]   ;;  %s3657_s4 = inlined_call_operand.vmem [shape: bf16[2,8,8,128], index: 4, kind: input, shape index: {}, may-alias: {2,3,4}]   ;;  %s3658_s5 = inlined_call_operand.vmem [shape: bf16[3,384,128], index: 5, kind: input, shape index: {}]   ;;  %s3659_s6 = inlined_call_operand.vmem [shape: f32[1,128], index: 6, kind: input, shape index: {}]   ;;  %s3660_s7 = inlined_call_operand.vmem [shape: bf16[128,128], index: 7, kind: input, shape index: {}]   ;;  %s3661_s8 = inlined_call_operand.vmem [shape: f32[1,128], index: 8, kind: input, shape index: {}]   ;;  %s3662_s9 = inlined_call_operand.vmem [shape: f32[2,4,4,128], index: 9, kind: output, shape index: {}]  }
   0x1   :  { %s3090_s4 = smov 0  }
   0x2 LB: > { %s33_s29 = sadd.s32 1, %s3026_s3  ;;  %p2328_p0 = scmp.ge.s32.totalorder %s3030_s4, 1  ;;  %s3030_s4 = sphi %s3090_s4, %s21_s4   ;;  %s3026_s3 = sphi %s3088_s3, %s3668_s3   ;;  %s3022_s28 = sphi %s3086_s28, %s3667_s28  }
   0x3   : > { %p35_p1 = scmp.ge.s32.totalorder %s33_s29, 2  ;;  %p300_p2 = scmp.lt.s32.totalorder %s3030_s4, 3 }
   0x5   : > { %s3670_s29 = smov (%p35_p1, %s33_s29), 0  ;;  %p301_p3 = pnand %p2328_p0, %p300_p2 }
   0x6   : > { %v2913_v0 = vld [vmem:[%s3658_s5 + $0x100] sm:$0xff] (!%p301_p3)   ;;  %v2916_v3 = vld [vmem:[%s3658_s5 + $0x108] sm:$0xff] (!%p301_p3)   ;;  %v2919_v6 = vld [vmem:[%s3658_s5 + $0x110] sm:$0xff] (!%p301_p3)   ;;  %p359_p4 = scmp.lt.s32.totalorder (!%p301_p3), %s3022_s28, 1  ;;  %vm525_vm0 = vcmask (!%p301_p3), 1040384   ;;  %vm568_vm1 = vcmask (!%p301_p3), 1043456  }
   0x7   : > { %304 = sbr.rel (%p301_p3) target bundleno = 608 (0x260), region = 48  ;;  %v2914_v1 = vld [vmem:[%s3658_s5 + $0x140] sm:$0xff] (!%p301_p3)   ;;  %2588 = vmatprep.subr.bf16.mxu0 (!%p301_p3), %v2913_v0  ;;  %v2917_v4 = vld [vmem:[%s3658_s5 + $0x148] sm:$0xff] (!%p301_p3)   ;;  %v2920_v7 = vld [vmem:[%s3658_s5 + $0x150] sm:$0xff] (!%p301_p3)   ;;  %vm526_vm2 = vsmask.f32 (!%p301_p3), 256 }
   0x8   : > { %v2915_v2 = vld [vmem:[%s3658_s5 + $0xc0] sm:$0xff] (!%p301_p3)   ;;  %2753 = vmatprep.subr.bf16.mxu1 (!%p301_p3), %v2914_v1  ;;  %v2918_v5 = vld [vmem:[%s3658_s5 + $0xc8] sm:$0xff] (!%p301_p3)   ;;  %v2921_v8 = vld [vmem:[%s3658_s5 + $0xd0] sm:$0xff] (!%p301_p3)   ;;  %vm569_vm3 = vsmask.f32 (!%p301_p3), 3328  ;;  %vm3034_vm6 = vmmov (!%p301_p3), 0  }
   0x9   : > { %2589 = vmatpush3.bf16.msra.mxu0 (!%p301_p3), %v2915_v2  ;;  %2754 = vmatpush3.bf16.msra.mxu1 (!%p301_p3), %v2914_v1  ;;  %v2922_v9 = vld [vmem:[%s3658_s5 + $0x118] sm:$0xff] (!%p301_p3)   ;;  %v2925_v12 = vld [vmem:[%s3658_s5 + $0x120] sm:$0xff] (!%p301_p3)   ;;  %v2928_v15 = vld [vmem:[%s3658_s5 + $0x128] sm:$0xff] (!%p301_p3)   ;;  %vm2066_vm7 = vcmask (!%p301_p3), 1041409   ;;  %vm2069_vm8 = vcmask (!%p301_p3), 1042434   ;;  %vm2072_vm9 = vcmask (!%p301_p3), 1043459  }
   0xa   : > { %2590 = vmatprep.subr.bf16.mxu0 (!%p301_p3), %v2916_v3  ;;  %2755 = vmatprep.subr.bf16.mxu1 (!%p301_p3), %v2917_v4  ;;  %v2923_v10 = vld [vmem:[%s3658_s5 + $0x158] sm:$0xff] (!%p301_p3)   ;;  %v2926_v13 = vld [vmem:[%s3658_s5 + $0x160] sm:$0xff] (!%p301_p3)   ;;  %v2929_v16 = vld [vmem:[%s3658_s5 + $0x168] sm:$0xff] (!%p301_p3)   ;;  %v3032_v3 = vmov (!%p301_p3), 0   ;;  %vm2075_vm10 = vcmask (!%p301_p3), 1044484   ;;  %vm2078_vm11 = vcmask (!%p301_p3), 1045509  }
   0xb   : > { %v2924_v11 = vld [vmem:[%s3658_s5 + $0xd8] sm:$0xff] (!%p301_p3)   ;;  %v2927_v14 = vld [vmem:[%s3658_s5 + $0xe0] sm:$0xff] (!%p301_p3)   ;;  %v2930_v17 = vld [vmem:[%s3658_s5 + $0xe8] sm:$0xff] (!%p301_p3)   ;;  %vm2081_vm12 = vcmask (!%p301_p3), 1046534   ;;  %vm2084_vm13 = vcmask (!%p301_p3), 1047559  }
   0xc   : > { %v2931_v18 = vld [vmem:[%s3658_s5 + $0x130] sm:$0xff] (!%p301_p3)   ;;  %v2934_v21 = vld [vmem:[%s3658_s5 + $0x138] sm:$0xff] (!%p301_p3)   ;;  %v2941_v37 = vld [vmem:[%s3658_s5 + $0x40] sm:$0xff] (!%p301_p3)  }
   0xd   : > { %2591 = vmatpush3.bf16.msra.mxu0 (!%p301_p3), %v2918_v5  ;;  %2756 = vmatpush3.bf16.msra.mxu1 (!%p301_p3), %v2917_v4  ;;  %v2932_v19 = vld [vmem:[%s3658_s5 + $0x170] sm:$0xff] (!%p301_p3)   ;;  %v2935_v24 = vld [vmem:[%s3658_s5 + $0x178] sm:$0xff] (!%p301_p3)   ;;  %v3211_v38 = vld [vmem:[%s3658_s5 + $0x80] sm:$0xff] (!%p301_p3)   ;;  %v3261_v4 = vcombine.low (!%p301_p3), %v3032_v3, %v3032_v3 }
   0xe   : > { %2592 = vmatprep.subr.bf16.mxu0 %v2919_v6  ;;  %2757 = vmatprep.subr.bf16.mxu1 %v2920_v7  ;;  %s3672_s28 = smov (!%p359_p4, %s3022_s28), 1  ;;  %v2933_v20 = vld [vmem:[%s3658_s5 + $0xf0] sm:$0xff]   ;;  %v2936_v29 = vld [vmem:[%s3658_s5 + $0xf8] sm:$0xff]   ;;  %vm3215_vm4 = vmand %vm525_vm0, %vm526_vm2 }
   0xf   : > { %s2586_s22 = sshll.u32 %s3672_s28, 5  ;;  %vm3224_vm5 = vmand %vm568_vm1, %vm569_vm3  ;;  %v2944_v60 = vld [vmem:[%s3658_s5] sm:$0xff]   ;;  %v2945_v63 = vld [vmem:[%s3658_s5 + $0x48] sm:$0xff]   ;;  %s2587_s26 = sshll.u32 %s3672_s28, 4 }
  0x10   : > { %s3174_s10 = scalar_lea.vmem %s3655_s2, %s2586_s22  ;;  %s396_s13 = scalar_lea.vmem %s3662_s9, %s2587_s26 }
  0x11   : > { %2593 = vmatpush3.bf16.msra.mxu0 %v2921_v8  ;;  %2758 = vmatpush3.bf16.msra.mxu1 %v2920_v7  ;;  %v3183_v22 = vld [vmem:[%s3174_s10] sm:$0xf]  ;;  %v3186_v23 = vld [vmem:[%s3174_s10 + $0x4] sm:$0xf]  ;;  %v3198_v28 = vld [vmem:[%s3174_s10 + $0x8] sm:$0xf] }
  0x12   : > { %2594 = vmatprep.subr.bf16.mxu0 %v2922_v9  ;;  %2759 = vmatprep.subr.bf16.mxu1 %v2923_v10  ;;  %v2338_v25 = vcombine.low %v3183_v22, %v3183_v22  ;;  %v2339_v26 = vcombine.low %v3186_v23, %v3186_v23  ;;  %v2396_v27 = vcombine.low %v3183_v22, %v3186_v23  ;;  %v3220_v44 = vld [vmem:[%s3174_s10 + $0xc] sm:$0xf] }
  0x13   : > { %v2340_v30 = vcombine.low %v3198_v28, %v3198_v28  ;;  %v2341_v47 = vcombine.low %v3220_v44, %v3220_v44  ;;  %v2399_v55 = vcombine.low %v3198_v28, %v3220_v44  ;;  %v2947_v7 = vld [vmem:[%s3658_s5 + $0x8] sm:$0xff]  }
  0x14   : > { %v453_v31 = vshrl.u32 %v2338_v25, 16  ;;  %v456_v32 = vshll.u32 %v2338_v25, 16  ;;  %v460_v33 = vshrl.u32 %v2339_v26, 16  ;;  %v463_v34 = vshll.u32 %v2339_v26, 16  ;;  %914 = vmatprep.mubr.bf16.mxu0 %v2396_v27 }
  0x15   : > { %2595 = vmatpush3.bf16.msra.mxu0 %v2924_v11  ;;  %2760 = vmatpush3.bf16.msra.mxu1 %v2923_v10  ;;  %v467_v35 = vshrl.u32 %v2340_v30, 16  ;;  %v470_v36 = vshll.u32 %v2340_v30, 16  ;;  %v474_v53 = vshrl.u32 %v2341_v47, 16  ;;  %v477_v54 = vshll.u32 %v2341_v47, 16  ;;  %v2949_v10 = vld [vmem:[%s3658_s5 + $0x50] sm:$0xff]  }
  0x16   : > { %2596 = vmatprep.subr.bf16.mxu0 %v2925_v12  ;;  %2761 = vmatprep.subr.bf16.mxu1 %v2926_v13  ;;  %v455_v39 = vrot.slane %v453_v31, 7  ;;  %v462_v40 = vrot.slane %v460_v33, 7  ;;  %v540_v42 = vrot.slane %v456_v32, 1  ;;  %v542_v43 = vrot.slane %v463_v34, 1 }
  0x17   : > { %v544_v45 = vrot.slane %v470_v36, 1  ;;  %v546_v0 = vrot.slane %v477_v54, 1  ;;  %v469_v1 = vrot.slane %v467_v35, 7  ;;  %v476_v2 = vrot.slane %v474_v53, 7 }
  0x18   : > { %v458_v48 = vor.u32 %v456_v32, %v455_v39  ;;  %v465_v49 = vor.u32 %v463_v34, %v462_v40  ;;  %v541_v50 = vor.u32 %v540_v42, %v453_v31  ;;  %v543_v51 = vor.u32 %v542_v43, %v460_v33  ;;  %v2958_v39 = vld [vmem:[%s3658_s5 + $0x60] sm:$0xff]   ;;  %v2953_v40 = vld [vmem:[%s3658_s5 + $0x98] sm:$0xff]  }
  0x19   : > { %2597 = vmatpush3.bf16.msra.mxu0 %v2927_v14  ;;  %2762 = vmatpush3.bf16.msra.mxu1 %v2926_v13  ;;  %v545_v52 = vor.u32 %v544_v45, %v467_v35  ;;  %v547_v6 = vor.u32 %v546_v0, %v474_v53  ;;  %v472_v8 = vor.u32 %v470_v36, %v469_v1  ;;  %v2946_v14 = vld [vmem:[%s3658_s5 + $0x88] sm:$0xff]   ;;  %v2954_v35 = vld [vmem:[%s3658_s5 + $0x18] sm:$0xff]  }
  0x1a   : > { %2598 = vmatprep.subr.bf16.mxu0 %v2928_v15  ;;  %2763 = vmatprep.subr.bf16.mxu1 %v2929_v16  ;;  %v3234_v56 = vsel %vm3215_vm4, 0, %v458_v48  ;;  %v3238_v57 = vsel %vm3215_vm4, 0, %v465_v49  ;;  %v3242_v58 = vsel %vm3224_vm5, %v541_v50, 0  ;;  %v3246_v59 = vsel %vm3224_vm5, %v543_v51, 0  ;;  %v3330_v45 = vld [vmem:[%s3174_s10 + $0x18] sm:$0xf] }
  0x1b   : > { %v2395_v61 = vcombine.low %v3234_v56, %v3238_v57  ;;  %v2397_v62 = vcombine.low %v3242_v58, %v3246_v59  ;;  %v3265_v5 = vsel %vm3224_vm5, %v545_v52, 0  ;;  %v479_v9 = vor.u32 %v477_v54, %v476_v2  ;;  %v2960_v48 = vld [vmem:[%s3658_s5 + $0x20] sm:$0xff]   ;;  %v3336_v49 = vld [vmem:[%s3174_s10 + $0x1c] sm:$0xf] }
  0x1c   : > { %v3275_v11 = vsel %vm3224_vm5, %v547_v6, 0  ;;  %v3279_v12 = vsel %vm3215_vm4, 0, %v472_v8  ;;  %v2344_v50 = vcombine.low %v3330_v45, %v3330_v45  ;;  %v2345_v54 = vcombine.low %v3336_v49, %v3336_v49 }
  0x1d   : > { %2599 = vmatpush3.bf16.msra.mxu0 %v2930_v17  ;;  %2764 = vmatpush3.bf16.msra.mxu1 %v2929_v16  ;;  %v2400_v13 = vcombine.low %v3265_v5, %v3275_v11  ;;  %v3288_v15 = vsel %vm3215_vm4, 0, %v479_v9  ;;  %v446_v16 = vshrl.u32 %v3261_v4, 16  ;;  %v2963_v9 = vld [vmem:[%s3658_s5 + $0x28] sm:$0xff]  }
  0x1e   : > { %2600 = vmatprep.subr.bf16.mxu0 %v2931_v18  ;;  %2765 = vmatprep.subr.bf16.mxu1 %v2932_v19  ;;  %v2398_v17 = vcombine.low %v3279_v12, %v3288_v15  ;;  %v2951_v18 = vld [vmem:[%s3658_s5 + $0x10] sm:$0xff]   ;;  %v498_v0 = vshll.u32 %v2344_v50, 16  ;;  %v502_v2 = vshrl.u32 %v2345_v54, 16  ;;  %v505_v6 = vshll.u32 %v2345_v54, 16 }
  0x1f   : > { %2769 = vmatprep.mubr.bf16.mxu1 %v2397_v62  ;;  %v3316_v34 = vrot.slane %v446_v16, 7  ;;  %v2961_v62 = vld [vmem:[%s3658_s5 + $0x68] sm:$0xff]   ;;  %v2436_v54 = vcombine.low %v3246_v59, %v3265_v5  ;;  %v2434_v5 = vcombine.low %v3238_v57, %v3279_v12  ;;  %v2981_v57 = vld [vmem:[%s3658_s5 + $0x210] sm:$0xff]  }
  0x21   : > { %2601 = vmatpush3.bf16.msra.mxu0 %v2933_v20  ;;  %2766 = vmatpush3.bf16.msra.mxu1 %v2932_v19  ;;  %v3297_v19 = vld [vmem:[%s3174_s10 + $0x10] sm:$0xf]  ;;  %v3300_v20 = vld [vmem:[%s3174_s10 + $0x14] sm:$0xf] }
  0x22   : > { %2602 = vmatprep.subr.bf16.mxu0 %v2934_v21  ;;  %2767 = vmatprep.subr.bf16.mxu1 %v2935_v24  ;;  %v449_v21 = vshll.u32 %v3261_v4, 16  ;;  %v2342_v25 = vcombine.low %v3297_v19, %v3297_v19  ;;  %v2343_v26 = vcombine.low %v3300_v20, %v3300_v20  ;;  %v2402_v27 = vcombine.low %v3297_v19, %v3300_v20 }
  0x24   : > { %v481_v30 = vshrl.u32 %v2342_v25, 16  ;;  %v488_v31 = vshrl.u32 %v2343_v26, 16  ;;  %v484_v32 = vshll.u32 %v2342_v25, 16  ;;  %v491_v33 = vshll.u32 %v2343_v26, 16 }
  0x25   : > { %2603 = vmatpush3.bf16.msra.mxu0 %v2936_v29  ;;  %2768 = vmatpush3.bf16.msra.mxu1 %v2935_v24  ;;  %v2952_v24 = vld [vmem:[%s3658_s5 + $0x58] sm:$0xff]   ;;  %v2950_v29 = vld [vmem:[%s3658_s5 + $0x90] sm:$0xff]   ;;  %v538_v36 = vrot.slane %v449_v21, 1 }
  0x26   : > { %2640 = vmatprep.subr.bf16.mxu0 %v2941_v37  ;;  %2777 = vmatprep.subr.bf16.mxu1 %v3211_v38  ;;  %v483_v37 = vrot.slane %v481_v30, 7  ;;  %v548_v47 = vrot.slane %v484_v32, 1  ;;  %v550_v51 = vrot.slane %v491_v33, 1 }
  0x27   : > { %v539_v8 = vor.u32 %v538_v36, %v446_v16  ;;  %v2967_v16 = vld [vmem:[%s3658_s5 + $0x70] sm:$0xff]  }
  0x28   : > { %915 = vmatmul.mubr.bf16.vlgmr.msra.gmra.mrb[0].mxu0 %v2395_v61  ;;  %2770 = vmatmul.mubr.bf16.vlgmr.msra.gmra.mrb[0].mxu1 %v2400_v13  ;;  %v486_v42 = vor.u32 %v484_v32, %v483_v37  ;;  %v2959_v61 = vld [vmem:[%s3658_s5 + $0xa0] sm:$0xff]   ;;  %v549_v1 = vor.u32 %v548_v47, %v481_v30  ;;  %v2969_v36 = vld [vmem:[%s3658_s5 + $0x30] sm:$0xff]   ;;  %v451_v37 = vor.u32 %v449_v21, %v3316_v34  ;;  %v2970_v21 = vld [vmem:[%s3658_s5 + $0x78] sm:$0xff]  }
  0x29   : > { %2641 = vmatpush3.bf16.msra.mxu0 %v2944_v60  ;;  %922 = vmatprep.mubr.bf16.mxu0 %v2399_v55  ;;  %v2405_v55 = vcombine.low %v3330_v45, %v3336_v49  ;;  %v3381_v32 = vsel %vm3224_vm5, %v539_v8, 0  ;;  %v2971_v47 = vld [vmem:[%s3658_s5 + $0xb8] sm:$0xff]  }
  0x2a   : > { %2642 = vmatprep.subr.bf16.mxu0 %v2945_v63  ;;  %2778 = vmatpush3.bf16.msra.mxu1 %v3211_v38  ;;  %v490_v38 = vrot.slane %v488_v31, 7  ;;  %v3342_v52 = vsel %vm3215_vm4, 0, %v486_v42  ;;  %v495_v63 = vshrl.u32 %v2344_v50, 16  ;;  %v3365_v13 = vsel %vm3224_vm5, %v549_v1, 0  ;;  %v2990_v1 = vld [vmem:[%s3658_s5 + $0x1e8] sm:$0xff]   ;;  %v2997_v8 = vld [vmem:[%s3658_s5 + $0x1f8] sm:$0xff]  }
  0x2b   : > { %2779 = vmatprep.subr.bf16.mxu1 %v2946_v14  ;;  %v2433_v46 = vcombine.low %v3381_v32, %v3242_v58  ;;  %v3421_v34 = vsel %vm3215_vm4, 0, %v451_v37  ;;  %v2973_v58 = vld [vmem:[%s3658_s5 + $0x1c0] sm:$0xff]   ;;  %v3439_v50 = vcombine.low %v3186_v23, %v3198_v28  ;;  %v2978_v23 = vld [vmem:[%s3658_s5 + $0x188] sm:$0xff]   ;;  %v2980_v28 = vld [vmem:[%s3658_s5 + $0x1d0] sm:$0xff]   ;;  %v3461_v59 = vcombine.low %v3275_v11, %v3365_v13 }
  0x2c   : > { %v493_v43 = vor.u32 %v491_v33, %v490_v38  ;;  %v2431_v41 = vcombine.low %v3421_v34, %v3234_v56  ;;  %v2974_v56 = vld [vmem:[%s3658_s5 + $0x200] sm:$0xff]   ;;  %v2984_v11 = vld [vmem:[%s3658_s5 + $0x218] sm:$0xff]  }
  0x2d   : > { %2643 = vmatpush3.bf16.msra.mxu0 %v2947_v7  ;;  %v551_v7 = vor.u32 %v550_v51, %v488_v31  ;;  %v2976_v51 = vld [vmem:[%s3658_s5 + $0x1c8] sm:$0xff]  }
  0x2e   : > { %2644 = vmatprep.subr.bf16.mxu0 %v2949_v10  ;;  %2780 = vmatpush3.bf16.msra.mxu1 %v2946_v14  ;;  %v3346_v53 = vsel %vm3215_vm4, 0, %v493_v43  ;;  %v497_v10 = vrot.slane %v495_v63, 7  ;;  %v552_v14 = vrot.slane %v498_v0, 1  ;;  %v2972_v43 = vld [vmem:[%s3658_s5 + $0x38] sm:$0xff]  }
  0x2f   : > { %2781 = vmatprep.subr.bf16.mxu1 %v2950_v29  ;;  %v2401_v60 = vcombine.low %v3342_v52, %v3346_v53 }
  0x30   : > { %923 = vmatmul.mubr.bf16.gmra.mrb[4].mxu0 %v2398_v17  ;;  %v504_v17 = vrot.slane %v502_v2, 7  ;;  %v500_v25 = vor.u32 %v498_v0, %v497_v10  ;;  %v2437_v0 = vcombine.low %v3288_v15, %v3342_v52  ;;  %v2992_v15 = vld [vmem:[%s3658_s5 + $0x1a8] sm:$0xff]   ;;  %v2994_v52 = vld [vmem:[%s3658_s5 + $0x1f0] sm:$0xff]   ;;  %v2998_v10 = vld [vmem:[%s3658_s5 + $0x238] sm:$0xff]  }
  0x31   : > { %2645 = vmatpush3.bf16.msra.mxu0 %v2951_v18  ;;  %930 = vmatprep.mubr.bf16.mxu0 %v2402_v27  ;;  %v3369_v18 = vsel %vm3224_vm5, %v551_v7, 0  ;;  %v553_v27 = vor.u32 %v552_v14, %v495_v63  ;;  %v2989_v63 = vld [vmem:[%s3658_s5 + $0x1a0] sm:$0xff]   ;;  %v2996_v7 = vld [vmem:[%s3658_s5 + $0x1b0] sm:$0xff]   ;;  %v2516_v14 = vcombine.low %v3336_v49, %v3032_v3  ;;  %v3003_v49 = vld [vmem:[%s3660_s7 + $0x18] sm:$0xff]  }
  0x32   : > { %2646 = vmatprep.subr.bf16.mxu0 %v2952_v24  ;;  %2782 = vmatpush3.bf16.msra.mxu1 %v2950_v29  ;;  %v554_v24 = vrot.slane %v505_v6, 1  ;;  %v2403_v26 = vcombine.low %v3365_v13, %v3369_v18  ;;  %v2962_v29 = vld [vmem:[%s3658_s5 + $0xa8] sm:$0xff]   ;;  %v507_v30 = vor.u32 %v505_v6, %v504_v17  ;;  %v3385_v33 = vsel %vm3215_vm4, 0, %v500_v25  ;;  %v3004_v25 = vld [vmem:[%s3660_s7 + $0x20] sm:$0xff]  }
  0x33   : > { %2783 = vmatprep.subr.bf16.mxu1 %v2953_v40  ;;  %v2441_v6 = vcombine.low %v3300_v20, %v3330_v45  ;;  %v2991_v20 = vld [vmem:[%s3658_s5 + $0x228] sm:$0xff]   ;;  %v2440_v45 = vcombine.low %v3346_v53, %v3385_v33  ;;  %v2999_v53 = vld [vmem:[%s3658_s5 + $0x1b8] sm:$0xff]  }
  0x34   : > { %v555_v31 = vor.u32 %v554_v24, %v502_v2  ;;  %2773 = vmatprep.mubr.bf16.mxu1 %v2403_v26  ;;  %v3399_v38 = vsel %vm3215_vm4, 0, %v507_v30  ;;  %v2988_v2 = vld [vmem:[%s3658_s5 + $0x220] sm:$0xff]   ;;  %v3001_v24 = vld [vmem:[%s3660_s7 + $0x8] sm:$0xff]  }
  0x35   : > { %2647 = vmatpush3.bf16.msra.mxu0 %v2954_v35  ;;  %v3389_v35 = vsel %vm3224_vm5, %v553_v27, 0  ;;  %v2404_v42 = vcombine.low %v3385_v33, %v3399_v38  ;;  %v2515_v17 = vcombine.low %v3399_v38, %v3421_v34  ;;  %v3005_v27 = vld [vmem:[%s3660_s7 + $0x28] sm:$0xff]  }
  0x36   : > { %2648 = vmatprep.subr.bf16.mxu0 %v2958_v39  ;;  %2784 = vmatpush3.bf16.msra.mxu1 %v2953_v40  ;;  %v3403_v39 = vsel %vm3224_vm5, %v555_v31, 0  ;;  %v2432_v40 = vcombine.low %v3032_v3, %v3183_v22  ;;  %v2968_v22 = vld [vmem:[%s3658_s5 + $0xb0] sm:$0xff]   ;;  %v2442_v12 = vcombine.low %v3369_v18, %v3389_v35  ;;  %v3000_v18 = vld [vmem:[%s3660_s7] sm:$0xff]  }
  0x37   : > { %2785 = vmatprep.subr.bf16.mxu1 %v2959_v61  ;;  %v2406_v4 = vcombine.low %v3389_v35, %v3403_v39  ;;  %v2517_v13 = vcombine.low %v3403_v39, %v3381_v32  ;;  %v3002_v3 = vld [vmem:[%s3660_s7 + $0x10] sm:$0xff]  }
  0x38   : > { %931 = vmatmul.mubr.bf16.gmra.mrb[8].mxu0 %v2401_v60  ;;  %v2982_v60 = vld [vmem:[%s3658_s5 + $0x190] sm:$0xff]  }
  0x39   : > { %2649 = vmatpush3.bf16.msra.mxu0 %v2960_v48  ;;  %938 = vmatprep.mubr.bf16.mxu0 %v2405_v55  ;;  %v2975_v48 = vld [vmem:[%s3658_s5 + $0x180] sm:$0xff]   ;;  %v2977_v55 = vld [vmem:[%s3658_s5 + $0x208] sm:$0xff]   ;;  %v3006_v35 = vld [vmem:[%s3660_s7 + $0x30] sm:$0xff]  }
  0x3a   : > { %2650 = vmatprep.subr.bf16.mxu0 %v2961_v62  ;;  %2786 = vmatpush3.bf16.msra.mxu1 %v2959_v61  ;;  %v2438_v61 = vcombine.low %v3220_v44, %v3297_v19  ;;  %v2983_v62 = vld [vmem:[%s3658_s5 + $0x1d8] sm:$0xff]   ;;  %v2987_v19 = vld [vmem:[%s3658_s5 + $0x1e0] sm:$0xff]  }
  0x3b   : > { %2787 = vmatprep.subr.bf16.mxu1 %v2962_v29  ;;  %2774 = vmatmul.mubr.bf16.gmra.mrb[4].mxu1 %v2406_v4  ;;  %v2985_v44 = vld [vmem:[%s3658_s5 + $0x198] sm:$0xff]  }
  0x3c   : > { %2793 = vmatprep.mubr.bf16.mxu1 %v2433_v46 }
  0x3d   : > { %2651 = vmatpush3.bf16.msra.mxu0 %v2963_v9  ;;  %v2995_v9 = vld [vmem:[%s3658_s5 + $0x230] sm:$0xff]  }
  0x3e   : > { %2652 = vmatprep.subr.bf16.mxu0 %v2967_v16  ;;  %2788 = vmatpush3.bf16.msra.mxu1 %v2962_v29  ;;  %v3033_v16 = vmov 0.0  }
  0x3f   : > { %2789 = vmatprep.subr.bf16.mxu1 %v2968_v22 }
  0x40   : > { %939 = vmatmul.mubr.bf16.gmra.mrb[12].mxu0 %v2404_v42 }
  0x41   : > { %2653 = vmatpush3.bf16.msra.mxu0 %v2969_v36  ;;  %1212 = vmatprep.mubr.bf16.mxu0 %v2432_v40  ;;  %v3007_v36 = vld [vmem:[%s3660_s7 + $0x38] sm:$0xff]  }
  0x42   : > { %2654 = vmatprep.subr.bf16.mxu0 %v2970_v21  ;;  %2790 = vmatpush3.bf16.msra.mxu1 %v2968_v22 }
  0x43   : > { %2791 = vmatprep.subr.bf16.mxu1 %v2971_v47 }
  0x45   : > { %2655 = vmatpush3.bf16.msra.mxu0 %v2972_v43 }
  0x46   : > { %2692 = vmatprep.subr.bf16.mxu0 %v2973_v58  ;;  %2792 = vmatpush3.bf16.msra.mxu1 %v2971_v47 }
  0x47   : > { %2801 = vmatprep.subr.bf16.mxu1 %v2974_v56 }
  0x48   : > { %1213 = vmatmul.mubr.bf16.vlgmr.msra.gmra.mrb[16].mxu0 %v2431_v41 }
  0x49   : > { %2693 = vmatpush3.bf16.msra.mxu0 %v2975_v48  ;;  %1220 = vmatprep.mubr.bf16.mxu0 %v3439_v50 }
  0x4a   : > { %2694 = vmatprep.subr.bf16.mxu0 %v2976_v51  ;;  %2794 = vmatmul.mubr.bf16.vlgmr.msra.gmra.mrb[0].mxu1 %v2436_v54 }
  0x4b   : > { %2802 = vmatpush3.bf16.msra.mxu1 %v2974_v56  ;;  %2797 = vmatprep.mubr.bf16.mxu1 %v3461_v59 }
  0x4c   : > { %2803 = vmatprep.subr.bf16.mxu1 %v2977_v55 }
  0x4d   : > { %2695 = vmatpush3.bf16.msra.mxu0 %v2978_v23 }
  0x4e   : > { %2696 = vmatprep.subr.bf16.mxu0 %v2980_v28 }
  0x4f   : > { %2804 = vmatpush3.bf16.msra.mxu1 %v2977_v55 }
  0x50   : > { %1221 = vmatmul.mubr.bf16.gmra.mrb[20].mxu0 %v2434_v5  ;;  %2805 = vmatprep.subr.bf16.mxu1 %v2981_v57 }
  0x51   : > { %2697 = vmatpush3.bf16.msra.mxu0 %v2982_v60  ;;  %1228 = vmatprep.mubr.bf16.mxu0 %v2438_v61 }
  0x52   : > { %2698 = vmatprep.subr.bf16.mxu0 %v2983_v62  ;;  %2798 = vmatmul.mubr.bf16.gmra.mrb[4].mxu1 %v2442_v12 }
  0x53   : > { %2806 = vmatpush3.bf16.msra.mxu1 %v2981_v57  ;;  %2817 = vmatprep.mubr.bf16.mxu1 %v2436_v54 }
  0x54   : > { %2807 = vmatprep.subr.bf16.mxu1 %v2984_v11 }
  0x55   : > { %2699 = vmatpush3.bf16.msra.mxu0 %v2985_v44 }
  0x56   : > { %2700 = vmatprep.subr.bf16.mxu0 %v2987_v19 }
  0x57   : > { %2808 = vmatpush3.bf16.msra.mxu1 %v2984_v11 }
  0x58   : > { %1229 = vmatmul.mubr.bf16.gmra.mrb[24].mxu0 %v2437_v0  ;;  %2809 = vmatprep.subr.bf16.mxu1 %v2988_v2 }
  0x59   : > { %2701 = vmatpush3.bf16.msra.mxu0 %v2989_v63  ;;  %1236 = vmatprep.mubr.bf16.mxu0 %v2441_v6 }
  0x5a   : > { %2702 = vmatprep.subr.bf16.mxu0 %v2990_v1 }
  0x5b   : > { %2810 = vmatpush3.bf16.msra.mxu1 %v2988_v2 }
  0x5c   : > { %2811 = vmatprep.subr.bf16.mxu1 %v2991_v20 }
  0x5d   : > { %2703 = vmatpush3.bf16.msra.mxu0 %v2992_v15 }
  0x5e   : > { %2704 = vmatprep.subr.bf16.mxu0 %v2994_v52 }
  0x5f   : > { %2812 = vmatpush3.bf16.msra.mxu1 %v2991_v20 }
  0x60   : > { %1237 = vmatmul.mubr.bf16.gmra.mrb[28].mxu0 %v2440_v45  ;;  %2813 = vmatprep.subr.bf16.mxu1 %v2995_v9 }
  0x61   : > { %2705 = vmatpush3.bf16.msra.mxu0 %v2996_v7  ;;  %1545 = vmatprep.mubr.bf16.mxu0 %v3439_v50 }
  0x62   : > { %2706 = vmatprep.subr.bf16.mxu0 %v2997_v8 }
  0x63   : > { %2814 = vmatpush3.bf16.msra.mxu1 %v2995_v9 }
  0x64   : > { %2815 = vmatprep.subr.bf16.mxu1 %v2998_v10 }
  0x65   : > { %2707 = vmatpush3.bf16.msra.mxu0 %v2999_v53 }
  0x66   : > { %2825 = vmatprep.subr.bf16.mxu0 %v3033_v16 }
  0x67   : > { %2816 = vmatpush3.bf16.msra.mxu1 %v2998_v10 }
  0x68   : > { %1546 = vmatmul.mubr.bf16.vlgmr.msra.gmra.mrb[32].mxu0 %v2434_v5 }
  0x69   : > { %1553 = vmatprep.mubr.bf16.mxu0 %v2438_v61  ;;  %2826 = vmatpush3.bf16.msra.mxu0 %v3000_v18 }
  0x6a   : > { %2818 = vmatmul.mubr.bf16.vlgmr.msra.gmra.mrb[0].mxu1 %v3461_v59  ;;  %2827 = vmatprep.subr.bf16.mxu0 %v3033_v16 }
  0x6b   : > { %2821 = vmatprep.mubr.bf16.mxu1 %v2442_v12 }
  0x6d   : > { %2828 = vmatpush3.bf16.msra.mxu0 %v3001_v24 }
  0x6e   : > { %2829 = vmatprep.subr.bf16.mxu0 %v3033_v16 }
  0x70   : > { %1554 = vmatmul.mubr.bf16.gmra.mrb[36].mxu0 %v2437_v0 }
  0x71   : > { %1561 = vmatprep.mubr.bf16.mxu0 %v2441_v6  ;;  %2830 = vmatpush3.bf16.msra.mxu0 %v3002_v3  ;;  %v3035_v3 = vmov 1983009808  }
  0x72   : > { %2822 = vmatmul.mubr.bf16.gmra.mrb[4].mxu1 %v2517_v13  ;;  %2831 = vmatprep.subr.bf16.mxu0 %v3033_v16 }
  0x75   : > { %2832 = vmatpush3.bf16.msra.mxu0 %v3003_v49  ;;  %v1684_v49 = vunpack.c.l.s4 %v3035_v3 }
  0x76   : > { %2833 = vmatprep.subr.bf16.mxu0 %v3033_v16 }
  0x78   : > { %1562 = vmatmul.mubr.bf16.gmra.mrb[40].mxu0 %v2440_v45 }
  0x79   : > { %1569 = vmatprep.mubr.bf16.mxu0 %v2516_v14  ;;  %2834 = vmatpush3.bf16.msra.mxu0 %v3004_v25  ;;  %v1686_v25 = vlaneseq }
  0x7a   : > { %2835 = vmatprep.subr.bf16.mxu0 %v3033_v16 }
  0x7d   : > { %2836 = vmatpush3.bf16.msra.mxu0 %v3005_v27 }
  0x7e   : > { %2837 = vmatprep.subr.bf16.mxu0 %v3033_v16 }
  0x80   : > { %1570 = vmatmul.mubr.bf16.gmra.mrb[44].mxu0 %v2515_v17 }
  0x81   : > { %2838 = vmatpush3.bf16.msra.mxu0 %v3006_v35  ;;  %2841 = vmatprep.mubr.msk.bf16.mxu0 %vm3034_vm6, %v3033_v16  ;;  %v1687_v35 = vshrl.u32 %v1686_v25, 7 }
  0x82   : > { %2839 = vmatprep.subr.bf16.mxu0 %v3033_v16 }
  0x85   : > { %2840 = vmatpush3.bf16.msra.mxu0 %v3007_v36 }
  0xfb   : > { %v2604_v26 = vpop.f32.mrb[0].mxu0 }
  0xfc   : > { %v2605_v29 = vpop.f32.mrb[1].mxu0 }
  0xfd   : > { %v2606_v30 = vadd.f32 %v2605_v29, %v2604_v26  ;;  %v2607_v31 = vpop.f32.mrb[2].mxu0 }
  0xfe   : > { %v2608_v32 = vpop.f32.mrb[3].mxu0 }
  0xff   : > { %v2609_v33 = vadd.f32 %v2608_v32, %v2607_v31 }
 0x103   : > { %v2610_v37 = vpop.f32.mrb[4].mxu0 }
 0x104   : > { %v2611_v38 = vpop.f32.mrb[5].mxu0 }
 0x105   : > { %v2612_v39 = vadd.f32 %v2611_v38, %v2610_v37  ;;  %v2613_v40 = vpop.f32.mrb[6].mxu0  ;;  %v3570_v37 = vld [vmem:[%s3659_s6] ss:$0 sm:$0xff] }
 0x106   : > { %v2614_v42 = vpop.f32.mrb[7].mxu0 }
 0x107   : > { %v2615_v4 = vadd.f32 %v2614_v42, %v2613_v40 }
 0x10b   : > { %v2616_v21 = vpop.f32.mrb[8].mxu0 }
 0x10c   : > { %v2617_v46 = vpop.f32.mrb[9].mxu0 }
 0x10d   : > { %v2618_v22 = vadd.f32 %v2617_v46, %v2616_v21  ;;  %v2619_v34 = vpop.f32.mrb[10].mxu0 }
 0x10e   : > { %v2620_v43 = vpop.f32.mrb[11].mxu0 }
 0x10f   : > { %v2621_v58 = vadd.f32 %v2620_v43, %v2619_v34 }
 0x113   : > { %v2622_v47 = vpop.f32.mrb[12].mxu0 }
 0x114   : > { %v2623_v41 = vpop.f32.mrb[13].mxu0 }
 0x115   : > { %v2624_v48 = vadd.f32 %v2623_v41, %v2622_v47  ;;  %v2625_v50 = vpop.f32.mrb[14].mxu0 }
 0x116   : > { %v2626_v51 = vpop.f32.mrb[15].mxu0 }
 0x117   : > { %v2627_v56 = vadd.f32 %v2626_v51, %v2625_v50 }
 0x11b   : > { %v2656_v54 = vpop.f32.mrb[16].mxu0 }
 0x11c   : > { %v2657_v23 = vpop.f32.mrb[17].mxu0 }
 0x11d   : > { %v2658_v28 = vadd.f32 %v2657_v23, %v2656_v54  ;;  %v2659_v55 = vpop.f32.mrb[18].mxu0 }
 0x11e   : > { %v2660_v59 = vpop.f32.mrb[19].mxu0 }
 0x11f   : > { %v2848_v5 = vadd.f32 %v2658_v28, %v2606_v30  ;;  %v2661_v60 = vadd.f32 %v2660_v59, %v2659_v55 }
 0x121   : > { %v2854_v61 = vadd.f32 %v2661_v60, %v2609_v33  ;;  %v1685_v33 = vunpack.c.0.s8 %v1684_v49 }
 0x123   : > { %v2662_v62 = vpop.f32.mrb[20].mxu0  ;;  %v3573_v46 = vsub.s32 %v1685_v33, %v1687_v35 }
 0x124   : > { %v2663_v57 = vpop.f32.mrb[21].mxu0 }
 0x125   : > { %v2664_v11 = vadd.f32 %v2663_v57, %v2662_v62  ;;  %v2665_v44 = vpop.f32.mrb[22].mxu0 }
 0x126   : > { %v2666_v12 = vpop.f32.mrb[23].mxu0 }
 0x127   : > { %v2845_v19 = vadd.f32 %v2664_v11, %v2612_v39  ;;  %v2667_v63 = vadd.f32 %v2666_v12, %v2665_v44 }
 0x129   : > { %v2851_v0 = vadd.f32 %v2667_v63, %v2615_v4 }
 0x12b   : > { %v2668_v1 = vpop.f32.mrb[24].mxu0 }
 0x12c   : > { %v2669_v2 = vpop.f32.mrb[25].mxu0 }
 0x12d   : > { %v2670_v6 = vadd.f32 %v2669_v2, %v2668_v1  ;;  %v2671_v15 = vpop.f32.mrb[26].mxu0 }
 0x12e   : > { %v2672_v52 = vpop.f32.mrb[27].mxu0 }
 0x12f   : > { %v3559_v20 = vadd.f32 %v2670_v6, %v2618_v22  ;;  %v2673_v45 = vadd.f32 %v2672_v52, %v2671_v15 }
 0x131   : > { %v3561_v7 = vadd.f32 %v2673_v45, %v2621_v58 }
 0x133   : > { %v2674_v8 = vpop.f32.mrb[28].mxu0 }
 0x134   : > { %v2675_v9 = vpop.f32.mrb[29].mxu0 }
 0x135   : > { %v2676_v53 = vadd.f32 %v2675_v9, %v2674_v8  ;;  %v2677_v10 = vpop.f32.mrb[30].mxu0 }
 0x136   : > { %v2678_v13 = vpop.f32.mrb[31].mxu0 }
 0x137   : > { %v3563_v14 = vadd.f32 %v2676_v53, %v2624_v48  ;;  %v2679_v17 = vadd.f32 %v2678_v13, %v2677_v10 }
 0x139   : > { %v3565_v18 = vadd.f32 %v2679_v17, %v2627_v56 }
 0x13b   : > { %v2708_v16 = vpop.f32.mrb[32].mxu0 }
 0x13c   : > { %v2709_v24 = vpop.f32.mrb[33].mxu0 }
 0x13d   : > { %v2710_v26 = vadd.f32 %v2709_v24, %v2708_v16  ;;  %v2711_v27 = vpop.f32.mrb[34].mxu0  ;;  %v2819_v32 = vpop.f32.mrb[0].mxu1 }
 0x13e   : > { %v2712_v29 = vpop.f32.mrb[35].mxu0  ;;  %v1612_v36 = vpop.f32.mrb[1].mxu1 }
 0x13f   : > { %v2849_v30 = vadd.f32 %v2848_v5, %v2710_v26  ;;  %v2713_v31 = vadd.f32 %v2712_v29, %v2711_v27  ;;  %v2820_v40 = vpop.f32.mrb[2].mxu1 }
 0x140   : > { %v1615_v42 = vpop.f32.mrb[3].mxu1 }
 0x141   : > { %v2855_v38 = vadd.f32 %v2854_v61, %v2713_v31  ;;  %v2850_v39 = vadd.f32 %v2849_v30, %v1612_v36 }
 0x143   : > { %v2714_v4 = vpop.f32.mrb[36].mxu0  ;;  %v1658_v21 = vadd.f32 %v2850_v39, %v3570_v37  ;;  %v2856_v22 = vadd.f32 %v2855_v38, %v1615_v42 }
 0x144   : > { %v2715_v34 = vpop.f32.mrb[37].mxu0 }
 0x145   : > { %v2716_v43 = vadd.f32 %v2715_v34, %v2714_v4  ;;  %v2717_v58 = vpop.f32.mrb[38].mxu0  ;;  %v1666_v47 = vmax.f32 %v1658_v21, 0.0  ;;  %v1659_v41 = vadd.f32 %v2856_v22, %v3570_v37  ;;  %v3577_v28 = vpop.f32.mrb[4].mxu1 }
 0x146   : > { %v2718_v48 = vpop.f32.mrb[39].mxu0  ;;  %v3579_v59 = vpop.f32.mrb[5].mxu1 }
 0x147   : > { %v2846_v50 = vadd.f32 %v2845_v19, %v2716_v43  ;;  %v2719_v51 = vadd.f32 %v2718_v48, %v2717_v58  ;;  %v1682_v56 = vcombine.high %v1666_v47, %v1666_v47  ;;  %v1689_v54 = vrot.slane %v1666_v47, %v3573_v46  ;;  %v3582_v11 = vpop.f32.mrb[6].mxu1 }
 0x148   : > { %v1667_v23 = vmax.f32 %v1659_v41, 0.0  ;;  %v3586_v63 = vpop.f32.mrb[7].mxu1 }
 0x149   : > { %v2847_v55 = vadd.f32 %v2846_v50, %v2819_v32  ;;  %v2852_v5 = vadd.f32 %v2851_v0, %v2719_v51  ;;  %v1696_v60 = vrot.slane %v1682_v56, %v3573_v46  ;;  %v1697_v61 = vcombine.high %v1689_v54, %v1689_v54 }
 0x14a   : > { %v2543_v62 = vrot.slane %v1689_v54, 9  ;;  %v1699_v57 = vcombine.high %v1667_v23, %v1667_v23  ;;  %v1706_v44 = vrot.slane %v1667_v23, %v3573_v46 }
 0x14b   : > { %v1660_v12 = vadd.f32 %v2847_v55, %v3570_v37  ;;  %v2853_v19 = vadd.f32 %v2852_v5, %v2820_v40  ;;  %v2720_v1 = vpop.f32.mrb[40].mxu0  ;;  %v1698_v2 = vcombine.high %v1696_v60, %v1696_v60  ;;  %v2544_v6 = vrot.slane %v1697_v61, 9 }
 0x14c   : > { %v2545_v15 = vrot.slane %v1696_v60, 9  ;;  %v1946_v52 = vmax.f32 %v1689_v54, %v2543_v62  ;;  %v2721_v0 = vpop.f32.mrb[41].mxu0  ;;  %v1713_v45 = vrot.slane %v1699_v57, %v3573_v46  ;;  %v1714_v8 = vcombine.high %v1706_v44, %v1706_v44 }
 0x14d   : > { %v2547_v9 = vrot.slane %v1706_v44, 9  ;;  %v1668_v53 = vmax.f32 %v1660_v12, 0.0  ;;  %v3589_v10 = vpop.f32.mrb[42].mxu0  ;;  %v2546_v13 = vrot.slane %v1698_v2, 9  ;;  %v1947_v17 = vmax.f32 %v1697_v61, %v2544_v6 }
 0x14e   : > { %v1948_v16 = vmax.f32 %v1696_v60, %v2545_v15  ;;  %v1661_v24 = vadd.f32 %v2853_v19, %v3570_v37  ;;  %v2724_v3 = vpop.f32.mrb[43].mxu0  ;;  %v1715_v49 = vcombine.high %v1713_v45, %v1713_v45  ;;  %v2548_v25 = vrot.slane %v1714_v8, 9 }
 0x14f   : > { %v2549_v26 = vrot.slane %v1713_v45, 9  ;;  %v1950_v27 = vmax.f32 %v1706_v44, %v2547_v9  ;;  %v1949_v29 = vmax.f32 %v1698_v2, %v2546_v13  ;;  %v1716_v30 = vcombine.high %v1668_v53, %v1668_v53 }
 0x150   : > { %v1723_v31 = vrot.slane %v1668_v53, %v3573_v46  ;;  %v1669_v32 = vmax.f32 %v1661_v24, 0.0  ;;  %v2550_v33 = vrot.slane %v1715_v49, 9  ;;  %v1951_v35 = vmax.f32 %v1714_v8, %v2548_v25 }
 0x151   : > { %v1952_v36 = vmax.f32 %v1713_v45, %v2549_v26  ;;  %v1978_v38 = vmax.f32 %v1946_v52, %v1950_v27  ;;  %v1730_v39 = vrot.slane %v1716_v30, %v3573_v46  ;;  %v2722_v8 = vadd.f32 %v2721_v0, %v2720_v1 }
 0x152   : > { %v1731_v40 = vcombine.high %v1723_v31, %v1723_v31  ;;  %v2551_v42 = vrot.slane %v1723_v31, 9  ;;  %v1733_v4 = vcombine.high %v1669_v32, %v1669_v32  ;;  %v1953_v21 = vmax.f32 %v1715_v49, %v2550_v33 }
 0x153   : > { %v1979_v22 = vmax.f32 %v1947_v17, %v1951_v35  ;;  %v1980_v34 = vmax.f32 %v1948_v16, %v1952_v36  ;;  %v1994_v43 = vpack.c.bf16 %v1978_v38, %v1978_v38  ;;  %v2726_v58 = vpop.f32.mrb[44].mxu0  ;;  %v1732_v47 = vcombine.high %v1730_v39, %v1730_v39 }
 0x154   : > { %v2552_v41 = vrot.slane %v1731_v40, 9  ;;  %v2553_v48 = vrot.slane %v1730_v39, 9  ;;  %v1954_v50 = vmax.f32 %v1723_v31, %v2551_v42  ;;  %v2727_v51 = vpop.f32.mrb[45].mxu0  ;;  %v1981_v56 = vmax.f32 %v1949_v29, %v1953_v21 }
 0x155   : > { %v1995_v54 = vpack.c.bf16 %v1979_v22, %v1979_v22  ;;  %v1996_v23 = vpack.c.bf16 %v1980_v34, %v1980_v34  ;;  %v2049_v55 = vunpack.c.l.b16 %v1994_v43  ;;  %v2729_v5 = vpop.f32.mrb[46].mxu0  ;;  %v2554_v60 = vrot.slane %v1732_v47, 9 }
 0x156   : > { %v1955_v61 = vmax.f32 %v1731_v40, %v2552_v41  ;;  %v1956_v62 = vmax.f32 %v1730_v39, %v2553_v48  ;;  %v1740_v57 = vrot.slane %v1669_v32, %v3573_v46  ;;  %v2730_v44 = vpop.f32.mrb[47].mxu0  ;;  %v1997_v12 = vpack.c.bf16 %v1981_v56, %v1981_v56 }
 0x157   : > { %v2050_v19 = vunpack.c.l.b16 %v1995_v54  ;;  %v2051_v2 = vunpack.c.l.b16 %v1996_v23  ;;  %v1747_v6 = vrot.slane %v1733_v4, %v3573_v46  ;;  %v1957_v15 = vmax.f32 %v1732_v47, %v2554_v60 }
 0x158   : > { %v1748_v52 = vcombine.high %v1740_v57, %v1740_v57  ;;  %v2555_v45 = vrot.slane %v1740_v57, 9  ;;  %v2052_v9 = vunpack.c.l.b16 %v1997_v12  ;;  %v2861_v25 = vadd.f32 %v3559_v20, %v2722_v8 }
 0x159   : > { %v2065_v53 = vrot.slane %v2050_v19, 7  ;;  %v2068_v13 = vrot.slane %v2051_v2, 6  ;;  %v1749_v17 = vcombine.high %v1747_v6, %v1747_v6  ;;  %v2557_v24 = vrot.slane %v1747_v6, 9 }
 0x15a   : > { %v2556_v16 = vrot.slane %v1748_v52, 9  ;;  %v1958_v49 = vmax.f32 %v1740_v57, %v2555_v45  ;;  %v2071_v27 = vrot.slane %v2052_v9, 5  ;;  %v2725_v30 = vadd.f32 %v2724_v3, %v3589_v10 }
 0x15b   : > { %v2067_v26 = vsel %vm2066_vm7, %v2065_v53, %v2049_v55  ;;  %v2558_v29 = vrot.slane %v1749_v17, 9  ;;  %v1960_v33 = vmax.f32 %v1747_v6, %v2557_v24  ;;  %v2862_v36 = vadd.f32 %v2861_v25, %v3579_v59 }
 0x15c   : > { %v2070_v31 = vsel %vm2069_vm8, %v2068_v13, %v2067_v26  ;;  %v1959_v32 = vmax.f32 %v1748_v52, %v2556_v16  ;;  %v1982_v1 = vmax.f32 %v1954_v50, %v1958_v49  ;;  %v2867_v38 = vadd.f32 %v3561_v7, %v2725_v30 }
 0x15d   : > { %v2073_v0 = vsel %vm2072_vm9, %v2071_v27, %v2070_v31  ;;  %v1961_v35 = vmax.f32 %v1749_v17, %v2558_v29  ;;  %v1984_v20 = vmax.f32 %v1956_v62, %v1960_v33  ;;  %v2728_v42 = vadd.f32 %v2727_v51, %v2726_v58 }
 0x15e   : > { %v1983_v39 = vmax.f32 %v1955_v61, %v1959_v32  ;;  %v1998_v40 = vpack.c.bf16 %v1982_v1, %v1982_v1  ;;  %v1662_v4 = vadd.f32 %v2862_v36, %v3570_v37  ;;  %v2868_v10 = vadd.f32 %v2867_v38, %v3586_v63 }
 0x15f   : > { %v2731_v3 = vadd.f32 %v2730_v44, %v2729_v5  ;;  %v1985_v21 = vmax.f32 %v1957_v15, %v1961_v35  ;;  %v2000_v34 = vpack.c.bf16 %v1984_v20, %v1984_v20  ;;  %v2858_v47 = vadd.f32 %v3563_v14, %v2728_v42 }
 0x160   : > { %v1999_v22 = vpack.c.bf16 %v1983_v39, %v1983_v39  ;;  %v2053_v43 = vunpack.c.l.b16 %v1998_v40  ;;  %v1670_v41 = vmax.f32 %v1662_v4, 0.0  ;;  %v1663_v59 = vadd.f32 %v2868_v10, %v3570_v37 }
 0x161   : > { %v2864_v7 = vadd.f32 %v3565_v18, %v2731_v3  ;;  %v2859_v58 = vadd.f32 %v2858_v47, %v3577_v28  ;;  %v3613_v23 = vunpack.c.l.b16 %v2000_v34  ;;  %v2001_v55 = vpack.c.bf16 %v1985_v21, %v1985_v21 }
 0x162   : > { %v3608_v48 = vunpack.c.l.b16 %v1999_v22  ;;  %v2074_v50 = vrot.slane %v2053_v43, 4  ;;  %v1750_v51 = vcombine.high %v1670_v41, %v1670_v41  ;;  %v1757_v63 = vrot.slane %v1670_v41, %v3573_v46 }
 0x163   : > { %v1671_v56 = vmax.f32 %v1663_v59, 0.0  ;;  %v2865_v54 = vadd.f32 %v2864_v7, %v3582_v11  ;;  %v1664_v14 = vadd.f32 %v2859_v58, %v3570_v37  ;;  %v2080_v33 = vrot.slane %v3613_v23, 2 }
 0x164   : > { %v1764_v5 = vrot.slane %v1750_v51, %v3573_v46  ;;  %v1765_v18 = vcombine.high %v1757_v63, %v1757_v63  ;;  %v2559_v60 = vrot.slane %v1757_v63, 9  ;;  %v2077_v62 = vrot.slane %v3608_v48, 3 }
 0x165   : > { %v1767_v61 = vcombine.high %v1671_v56, %v1671_v56  ;;  %v1774_v28 = vrot.slane %v1671_v56, %v3573_v46  ;;  %v1672_v57 = vmax.f32 %v1664_v14, 0.0  ;;  %v2076_v44 = vsel %vm2075_vm10, %v2074_v50, %v2073_v0 }
 0x166   : > { %v1766_v12 = vcombine.high %v1764_v5, %v1764_v5  ;;  %v2560_v11 = vrot.slane %v1765_v18, 9  ;;  %v2561_v19 = vrot.slane %v1764_v5, 9  ;;  %v1665_v2 = vadd.f32 %v2865_v54, %v3570_v37 }
 0x167   : > { %v1781_v6 = vrot.slane %v1767_v61, %v3573_v46  ;;  %v1782_v15 = vcombine.high %v1774_v28, %v1774_v28  ;;  %v2563_v52 = vrot.slane %v1774_v28, 9  ;;  %v1784_v45 = vcombine.high %v1672_v57, %v1672_v57 }
 0x168   : > { %v2562_v8 = vrot.slane %v1766_v12, 9  ;;  %v1962_v9 = vmax.f32 %v1757_v63, %v2559_v60  ;;  %v1963_v53 = vmax.f32 %v1765_v18, %v2560_v11  ;;  %v1791_v13 = vrot.slane %v1672_v57, %v3573_v46 }
 0x169   : > { %v1783_v17 = vcombine.high %v1781_v6, %v1781_v6  ;;  %v2564_v16 = vrot.slane %v1782_v15, 9  ;;  %v2565_v24 = vrot.slane %v1781_v6, 9  ;;  %v1966_v49 = vmax.f32 %v1774_v28, %v2563_v52 }
 0x16a   : > { %v1964_v25 = vmax.f32 %v1764_v5, %v2561_v19  ;;  %v1798_v26 = vrot.slane %v1784_v45, %v3573_v46  ;;  %v1799_v27 = vcombine.high %v1791_v13, %v1791_v13  ;;  %v2567_v37 = vrot.slane %v1791_v13, 9 }
 0x16b   : > { %v2566_v29 = vrot.slane %v1783_v17, 9  ;;  %v1967_v30 = vmax.f32 %v1782_v15, %v2564_v16  ;;  %v1968_v31 = vmax.f32 %v1781_v6, %v2565_v24  ;;  %v1986_v32 = vmax.f32 %v1962_v9, %v1966_v49 }
 0x16c   : > { %v1800_v1 = vcombine.high %v1798_v26, %v1798_v26  ;;  %v2568_v0 = vrot.slane %v1799_v27, 9  ;;  %v2056_v35 = vunpack.c.l.b16 %v2001_v55  ;;  %v1965_v36 = vmax.f32 %v1766_v12, %v2562_v8 }
 0x16d   : > { %v1969_v38 = vmax.f32 %v1783_v17, %v2566_v29  ;;  %v1987_v39 = vmax.f32 %v1963_v53, %v1967_v30  ;;  %v1988_v20 = vmax.f32 %v1964_v25, %v1968_v31  ;;  %v2002_v40 = vpack.c.bf16 %v1986_v32, %v1986_v32 }
 0x16e   : > { %v2569_v42 = vrot.slane %v1798_v26, 9  ;;  %v1970_v4 = vmax.f32 %v1791_v13, %v2567_v37  ;;  %v1673_v10 = vmax.f32 %v1665_v2, 0.0  ;;  %v2570_v34 = vrot.slane %v1800_v1, 9 }
 0x16f   : > { %v1989_v3 = vmax.f32 %v1965_v36, %v1969_v38  ;;  %v2003_v21 = vpack.c.bf16 %v1987_v39, %v1987_v39  ;;  %v2004_v22 = vpack.c.bf16 %v1988_v20, %v1988_v20  ;;  %v1971_v43 = vmax.f32 %v1799_v27, %v2568_v0  ;;  %v2575_v36 = vld [vmem:[%s3661_s8] ss:$0 sm:$0xff] }
 0x170   : > { %v1801_v47 = vcombine.high %v1673_v10, %v1673_v10  ;;  %v1808_v41 = vrot.slane %v1673_v10, %v3573_v46  ;;  %v2079_v59 = vsel %vm2078_vm11, %v2077_v62, %v2076_v44  ;;  %v2083_v54 = vrot.slane %v2056_v35, 1 }
 0x171   : > { %v2005_v7 = vpack.c.bf16 %v1989_v3, %v1989_v3  ;;  %v2058_v48 = vunpack.c.l.b16 %v2003_v21  ;;  %v2059_v50 = vunpack.c.l.b16 %v2004_v22  ;;  %v2082_v58 = vsel %vm2081_vm12, %v2080_v33, %v2079_v59 }
 0x172   : > { %v1815_v51 = vrot.slane %v1801_v47, %v3573_v46  ;;  %v1816_v63 = vcombine.high %v1808_v41, %v1808_v41  ;;  %v2571_v56 = vrot.slane %v1808_v41, 9  ;;  %v2057_v23 = vunpack.c.l.b16 %v2002_v40 }
 0x173   : > { %v2060_v14 = vunpack.c.l.b16 %v2005_v7  ;;  %v2086_v55 = vrot.slane %v2058_v48, 7  ;;  %v2088_v5 = vrot.slane %v2059_v50, 6  ;;  %v1972_v44 = vmax.f32 %v1798_v26, %v2569_v42 }
 0x174   : > { %v1817_v18 = vcombine.high %v1815_v51, %v1815_v51  ;;  %v2572_v60 = vrot.slane %v1816_v63, 9  ;;  %v2573_v61 = vrot.slane %v1815_v51, 9  ;;  %v1974_v28 = vmax.f32 %v1808_v41, %v2571_v56 }
 0x175   : > { %v2087_v62 = vsel %vm2066_vm7, %v2086_v55, %v2057_v23  ;;  %v2090_v57 = vrot.slane %v2060_v14, 5  ;;  %v2085_v12 = vsel %vm2084_vm13, %v2083_v54, %v2082_v58  ;;  %v1973_v52 = vmax.f32 %v1800_v1, %v2570_v34 }
 0x176   : > { %v2089_v11 = vsel %vm2069_vm8, %v2088_v5, %v2087_v62  ;;  %v2574_v46 = vrot.slane %v1817_v18, 9  ;;  %v1975_v19 = vmax.f32 %v1816_v63, %v2572_v60  ;;  %v1976_v2 = vmax.f32 %v1815_v51, %v2573_v61 }
 0x177   : > { %v1990_v6 = vmax.f32 %v1970_v4, %v1974_v28  ;;  %v2091_v15 = vsel %vm2072_vm9, %v2090_v57, %v2089_v11 }
 0x178   : > { %v1977_v45 = vmax.f32 %v1817_v18, %v2574_v46  ;;  %v1991_v8 = vmax.f32 %v1971_v43, %v1975_v19  ;;  %v1992_v9 = vmax.f32 %v1972_v44, %v1976_v2 }
 0x179   : > { %v2006_v53 = vpack.c.bf16 %v1990_v6, %v1990_v6 }
 0x17a   : > { %v2007_v13 = vpack.c.bf16 %v1991_v8, %v1991_v8  ;;  %v2008_v17 = vpack.c.bf16 %v1992_v9, %v1992_v9  ;;  %v1993_v16 = vmax.f32 %v1973_v52, %v1977_v45 }
 0x17b   : > { %v2061_v24 = vunpack.c.l.b16 %v2006_v53 }
 0x17c   : > { %v2062_v49 = vunpack.c.l.b16 %v2007_v13  ;;  %v2063_v25 = vunpack.c.l.b16 %v2008_v17  ;;  %v2009_v26 = vpack.c.bf16 %v1993_v16, %v1993_v16 }
 0x17d   : > { %v2092_v27 = vrot.slane %v2061_v24, 4 }
 0x17e   : > { %v2094_v37 = vrot.slane %v2062_v49, 3  ;;  %v2096_v29 = vrot.slane %v2063_v25, 2  ;;  %v2064_v30 = vunpack.c.l.b16 %v2009_v26 }
 0x17f   : > { %v2093_v31 = vsel %vm2075_vm10, %v2092_v27, %v2091_v15 }
 0x180   : > { %v2095_v32 = vsel %vm2078_vm11, %v2094_v37, %v2093_v31  ;;  %v2098_v33 = vrot.slane %v2064_v30, 1 }
 0x181   : > { %v2097_v1 = vsel %vm2081_vm12, %v2096_v29, %v2095_v32 }
 0x182   : > { %v2099_v0 = vsel %vm2084_vm13, %v2098_v33, %v2097_v1 }
 0x183   : > { %v2100_v35 = vpack.c.b16 %v2099_v0, %v2085_v12 }
 0x185   : > { %2842 = vmatmul.mubr.bf16.vlgmr.msra.gmra.mrb[48].mxu0 %v2100_v35 }
 0x258   : > { %v2184_v38 = vpop.f32.mrb[48].mxu0 }
 0x259   : > { %v2185_v39 = vadd.f32 %v2575_v36, %v2184_v38  ;;  %v2843_v20 = vpop.f32.mrb[49].mxu0 }
 0x25a   : > { %v2187_v40 = vpop.f32.mrb[50].mxu0 }
 0x25b   : > { %v2193_v42 = vcombine.high %v2185_v39, %v2185_v39  ;;  %2197 = vst [vmem:[%s396_s13] sm:$0xf] %v2185_v39  ;;  %v2188_v4 = vadd.f32 %v2575_v36, %v2187_v40  ;;  %v2844_v10 = vpop.f32.mrb[51].mxu0 }
 0x25d   : > { %2198 = vst [vmem:[%s396_s13 + $0x4] sm:$0xf] %v2193_v42  ;;  %v2194_v3 = vcombine.high %v2188_v4, %v2188_v4  ;;  %2199 = vst [vmem:[%s396_s13 + $0x8] sm:$0xf] %v2188_v4 }
 0x25f   : > { %2200 = vst [vmem:[%s396_s13 + $0xc] sm:$0xf] %v2194_v3 }
 0x260 PF: > { %s21_s4 = sadd.s32 1, %s3030_s4   ;;  %s3667_s28 = smov %s3026_s3 }
 0x261   : > { %p18_p5 = scmp.ge.s32.totalorder %s21_s4, 4   ;;  %s3668_s3 = smov %s3670_s29 }
 0x263   :  { %20 = sbr.rel (!%p18_p5) target bundleno = 2 (0x2), region = 86 }

</bundles_post_ra>
